<compile_context>
chip_gen: v7x
topology: tpu7x:2x2x1
jax: 0.10.0
libtpu: 0.0.40
codegen_flags: <defaults>
</compile_context>

<pallas_src>
import functools

import jax
import jax.numpy as jnp
from jax.experimental import pallas as pl
from jax.experimental.pallas import tpu as pltpu


def _round_up(n, m):
    return ((n + m - 1) // m) * m


def _pick_block_b(batch, np_nodes, cap=16):
    """Batch-block size: enough rows to fill the MXU M dim, divides batch.

    Per-element live set is ~(NP*Fin + 3*NP*128 + NP*NP)*4B, so cap=16 stays
    far below v5e's 16 MiB default scoped VMEM and v7x's 64 MiB physical.
    """
    target = max(1, -(-256 // np_nodes))          # rows to fill MXU M ~= 256
    bb = max(1, min(batch, cap, target))
    while batch % bb:
        bb -= 1
    return bb


# ----------------------------------------------------------------------------
# Fused 3-layer GAT kernel: BB batch elements per grid step.
#   x:(BB,NP,Fin) bf16   gwK:(FinK,FoutK) bf16   waK:(FinK,2) f32
#   -> o:(BB,region_size,out_features) f32   (padded rows/cols sliced in-kernel)
# Padded key columns are masked with -1e30 so real rows are computed exactly.
# ----------------------------------------------------------------------------
def gat_stack_kernel(x_ref,
                     w1_ref, wa1_ref,
                     w2_ref, wa2_ref,
                     w3_ref, wa3_ref,
                     o_ref, *, n_valid, region_size, out_features, slope):
    bb, np_nodes, _ = x_ref.shape
    neg = jnp.float32(-1e30)
    col = jax.lax.broadcasted_iota(jnp.int32, (1, 1, np_nodes), 2)   # (1,1,NP)
    key_mask = col < n_valid

    def layer(h, w_ref, wa_ref, apply_elu):
        k = h.shape[-1]
        f = w_ref.shape[-1]
        h2 = h.reshape(bb * np_nodes, k)          # NP % 16 == 0 => trivial merge
        # Feature projection: one big matmul over all BB*NP rows (bf16 MXU
        # path, f32 accumulation).
        wh = jnp.dot(h2.astype(jnp.bfloat16), w_ref[...],
                     preferred_element_type=jnp.float32)
        wh = wh.reshape(bb, np_nodes, f)                             # (BB,NP,F)
        # Attention projections with pre-folded (W @ a): independent of wh.
        proj = jnp.dot(h2.astype(jnp.float32), wa_ref[...],
                       preferred_element_type=jnp.float32)
        proj = proj.reshape(bb, np_nodes, 2)
        src = proj[:, :, 0:1]                                        # (BB,NP,1)
        dst = jnp.swapaxes(proj[:, :, 1:2], 1, 2)                    # (BB,1,NP)
        e = src + dst                                                # (BB,NP,NP)
        e = jnp.where(e > 0, e, slope * e)                           # LeakyReLU
        e = jnp.where(key_mask, e, neg)                              # mask pad keys
        e = e - jnp.max(e, axis=-1, keepdims=True)                   # stable softmax
        p = jnp.exp(e)
        attn = p / jnp.sum(p, axis=-1, keepdims=True)
        out = jnp.einsum("bqk,bkd->bqd", attn, wh,
                         preferred_element_type=jnp.float32)         # (BB,NP,F)
        if apply_elu:
            out = jnp.where(out > 0, out, jnp.exp(jnp.minimum(out, 0.0)) - 1.0)
        return out

    h = x_ref[...]                                                   # bf16
    h = layer(h, w1_ref, wa1_ref, True)
    h = layer(h, w2_ref, wa2_ref, True)
    h = layer(h, w3_ref, wa3_ref, False)
    # Drop padded nodes / padded feature lanes before the HBM writeback.
    o_ref[...] = h[:, :region_size, :out_features]


def gat_stack(x, params, *, n_valid, region_size, out_features, slope=0.3):
    B, NP, Fin = x.shape
    BB = _pick_block_b(B, NP)
    kern = functools.partial(gat_stack_kernel, n_valid=n_valid,
                             region_size=region_size,
                             out_features=out_features, slope=slope)

    def const(shape):
        return pl.BlockSpec(shape, lambda b: (0,) * len(shape))

    return pl.pallas_call(
        kern,
        out_shape=jax.ShapeDtypeStruct((B, region_size, out_features),
                                       jnp.float32),
        grid=(B // BB,),
        in_specs=[
            pl.BlockSpec((BB, NP, Fin), lambda b: (b, 0, 0)),
            const(params["gw1"].shape), const(params["wa1"].shape),
            const(params["gw2"].shape), const(params["wa2"].shape),
            const(params["gw3"].shape), const(params["wa3"].shape),
        ],
        out_specs=pl.BlockSpec((BB, region_size, out_features),
                               lambda b: (b, 0, 0)),
        compiler_params=pltpu.CompilerParams(dimension_semantics=("parallel",)),
    )(x, params["gw1"], params["wa1"], params["gw2"], params["wa2"],
      params["gw3"], params["wa3"])


# ----------------------------------------------------------------------------
# Fused MLP head kernel (whole batch at once; BN uses batch statistics).
#   feat = relu(bn2(fc1(relu(bn1(x)))))   -> out_feature (B, 512)
#   out  = fc3(relu(bn3(fc2(feat))))      -> logits      (B, 2)
# Input x is the flattened 500-d GAT feature zero-padded to 512; bn1/fc1
# parameters are zero-padded on those 12 columns so the padding is exact.
# TODO(synk): if B ever grows large (thousands), tile this over B with a
#             two-pass BatchNorm to respect v7x's smaller VMEM.
# ----------------------------------------------------------------------------
def mlp_head_kernel(x_ref,
                    g1_ref, b1_ref, w1_ref, c1_ref,
                    g2_ref, b2_ref, w2_ref, c2_ref,
                    g3_ref, b3_ref, w3_ref, c3_ref,
                    feat_ref, out_ref):
    eps = 1e-5

    def bn(v, g_ref, b_ref):
        mean = jnp.mean(v, axis=0, keepdims=True)
        var = jnp.mean((v - mean) * (v - mean), axis=0, keepdims=True)
        return g_ref[...] * (v - mean) * jax.lax.rsqrt(var + eps) + b_ref[...]

    x = x_ref[...].astype(jnp.float32)                                # (B, 512)

    h = jnp.maximum(bn(x, g1_ref, b1_ref), 0.0)                       # bn1 + relu
    h = jnp.dot(h.astype(jnp.bfloat16), w1_ref[...],
                preferred_element_type=jnp.float32) + c1_ref[...]     # fc1
    feat = jnp.maximum(bn(h, g2_ref, b2_ref), 0.0)                    # bn2 + relu
    feat_ref[...] = feat                                              # (B, 512)

    h = jnp.dot(feat.astype(jnp.bfloat16), w2_ref[...],
                preferred_element_type=jnp.float32) + c2_ref[...]     # fc2
    h = jnp.maximum(bn(h, g3_ref, b3_ref), 0.0)                       # bn3 + relu
    out_ref[...] = (jnp.dot(h, w3_ref[...],
                            preferred_element_type=jnp.float32)
                    + c3_ref[...])                                    # fc3 (B, 2)


def mlp_head(x, params):
    B = x.shape[0]

    def fullspec(shape):
        return pl.BlockSpec(shape, lambda *_: (0,) * len(shape))

    inputs = (x,
              params["g1"], params["b1"], params["w1"], params["c1"],
              params["g2"], params["b2"], params["w2"], params["c2"],
              params["g3"], params["b3"], params["w3"], params["c3"])

    return pl.pallas_call(
        mlp_head_kernel,
        out_shape=(jax.ShapeDtypeStruct((B, 512), jnp.float32),
                   jax.ShapeDtypeStruct((B, 2), jnp.float32)),
        grid=(1,),
        in_specs=[fullspec(a.shape) for a in inputs],
        out_specs=(fullspec((B, 512)), fullspec((B, 2))),
    )(*inputs)


# ----------------------------------------------------------------------------
# Full GATNET forward (glue in plain JAX; compute in the two kernels above).
# ----------------------------------------------------------------------------
def gatnet_forward(x, params, *, region_size, out_features_num):
    B, N, _ = x.shape
    NP = _round_up(max(N, 16), 16)             # bf16 sublane-aligned node dim
    xp = jnp.pad(x, ((0, 0), (0, NP - N), (0, 0))).astype(jnp.bfloat16)

    gat_out = gat_stack(xp, params, n_valid=N, region_size=region_size,
                        out_features=out_features_num)    # (B, region, out_f)

    # torch.squeeze + flatten: the padded-node/feature slice already happened
    # in-kernel, so only a contiguous reshape + 12-column zero-pad (4 KB)
    # remain outside; bn1/fc1 params are padded to match.
    flat = gat_out.reshape(B, region_size * out_features_num)         # (B, 500)
    d_pad = params["w1"].shape[0]                                     # 512
    flat = jnp.pad(flat, ((0, 0), (0, d_pad - flat.shape[1])))

    out_feature, out = mlp_head(flat, params)
    return out_feature, out


def init_params(key, region_size, in_f, h1, h2, out_f):
    assert region_size * out_f == 500, "bn1 expects 500 flattened GAT features"
    h1p, h2p, ofp = (_round_up(v, 128) for v in (h1, h2, out_f))
    d_flat, d_pad = 500, 512

    ks = jax.random.split(key, 12)

    def n(k, shape, scale):
        return (scale * jax.random.normal(k, shape)).astype(jnp.float32)

    def padded(arr, shape, dtype=jnp.float32):
        out = jnp.zeros(shape, dtype)
        return out.at[tuple(slice(0, s) for s in arr.shape)].set(arr.astype(dtype))

    # GAT layer parameters (f32 masters), attention vectors folded into the
    # weights in f32: wa_k = W_k @ a_k  ->  (Fin_k, 2).
    gw1 = n(ks[0], (in_f, h1), 0.1); ga1 = n(ks[1], (h1, 2), 0.1)
    gw2 = n(ks[2], (h1, h2), 0.1);   ga2 = n(ks[3], (h2, 2), 0.1)
    gw3 = n(ks[4], (h2, out_f), 0.1); ga3 = n(ks[5], (out_f, 2), 0.1)

    return {
        # GAT weights bf16 (DMA/MXU path), folded attention projections f32.
        "gw1": padded(gw1, (in_f, h1p), jnp.bfloat16),
        "wa1": gw1 @ ga1,                                   # (in_f, 2) f32
        "gw2": padded(gw2, (h1p, h2p), jnp.bfloat16),
        "wa2": padded(gw2 @ ga2, (h1p, 2)),
        "gw3": padded(gw3, (h2p, ofp), jnp.bfloat16),
        "wa3": padded(gw3 @ ga3, (h2p, 2)),
        # bn1 / fc1 (500 -> zero-padded to 512).
        "g1": padded(jnp.ones((1, d_flat), jnp.float32), (1, d_pad)),
        "b1": jnp.zeros((1, d_pad), jnp.float32),
        "w1": padded(n(ks[6], (d_flat, 512), 0.05), (d_pad, 512), jnp.bfloat16),
        "c1": n(ks[7], (1, 512), 0.05),
        # bn2 / fc2
        "g2": jnp.ones((1, 512), jnp.float32), "b2": jnp.zeros((1, 512), jnp.float32),
        "w2": n(ks[8], (512, 64), 0.05).astype(jnp.bfloat16),
        "c2": n(ks[9], (1, 64), 0.05),
        # bn3 / fc3
        "g3": jnp.ones((1, 64), jnp.float32), "b3": jnp.zeros((1, 64), jnp.float32),
        "w3": n(ks[10], (64, 2), 0.05), "c3": n(ks[11], (1, 2), 0.05),
    }


if __name__ == "__main__":
    # Small shapes consistent with the module: region_size * out_features = 500.
    B, REGION, IN_F, H1, H2, OUT_F = 2, 50, 16, 32, 16, 10

    key = jax.random.PRNGKey(0)
    kx, kp = jax.random.split(key)
    x = jax.random.normal(kx, (B, REGION, IN_F), dtype=jnp.float32)
    params = init_params(kp, REGION, IN_F, H1, H2, OUT_F)

    fwd = jax.jit(functools.partial(gatnet_forward,
                                    region_size=REGION, out_features_num=OUT_F))
    out_feature, out = fwd(x, params)
    jax.block_until_ready((out_feature, out))

    assert out_feature.shape == (B, 512) and out.shape == (B, 2)
    assert bool(jnp.all(jnp.isfinite(out_feature))) and bool(jnp.all(jnp.isfinite(out)))
    print("KERNEL_OK")
</pallas_src>

<mosaic_0001>
module attributes {stable_mosaic.version = 11 : i64} {
  func.func @gat_stack_kernel(%arg0: i32, %arg1: memref<2x64x16xbf16, #tpu.memory_space<vmem>>, %arg2: memref<16x128xbf16, #tpu.memory_space<vmem>>, %arg3: memref<16x2xf32, #tpu.memory_space<vmem>>, %arg4: memref<128x128xbf16, #tpu.memory_space<vmem>>, %arg5: memref<128x2xf32, #tpu.memory_space<vmem>>, %arg6: memref<128x128xbf16, #tpu.memory_space<vmem>>, %arg7: memref<128x2xf32, #tpu.memory_space<vmem>>, %arg8: memref<2x50x10xf32, #tpu.memory_space<vmem>>) attributes {dimension_semantics = [#tpu.dimension_semantics<parallel>], iteration_bounds = array<i64: 1>, scalar_prefetch = 0 : i64, scratch_operands = 0 : i64, tpu.core_type = #tpu.core_type<tc>, window_params = [{transform_indices = @transform_0, window_bounds = array<i64: 2, 64, 16>}, {pipeline_mode = #tpu.pipeline_mode<synchronous>, transform_indices = @transform_1, window_bounds = array<i64: 16, 128>}, {pipeline_mode = #tpu.pipeline_mode<synchronous>, transform_indices = @transform_2, window_bounds = array<i64: 16, 2>}, {pipeline_mode = #tpu.pipeline_mode<synchronous>, transform_indices = @transform_3, window_bounds = array<i64: 128, 128>}, {pipeline_mode = #tpu.pipeline_mode<synchronous>, transform_indices = @transform_4, window_bounds = array<i64: 128, 2>}, {pipeline_mode = #tpu.pipeline_mode<synchronous>, transform_indices = @transform_5, window_bounds = array<i64: 128, 128>}, {pipeline_mode = #tpu.pipeline_mode<synchronous>, transform_indices = @transform_6, window_bounds = array<i64: 128, 2>}, {transform_indices = @transform_7, window_bounds = array<i64: 2, 50, 10>}]} {
    %0 = tpu.iota {dimensions = array<i32: 2>} : vector<1x1x64xi32>
    %c50_i32 = arith.constant 50 : i32
    %1 = vector.broadcast %c50_i32 : i32 to vector<1x1x64xi32>
    %2 = arith.cmpi slt, %0, %1 : vector<1x1x64xi32>
    %c0 = arith.constant 0 : index
    %c0_0 = arith.constant 0 : index
    %c0_1 = arith.constant 0 : index
    %3 = vector.load %arg1[%c0, %c0_0, %c0_1] : memref<2x64x16xbf16, #tpu.memory_space<vmem>>, vector<2x64x16xbf16>
    %4 = vector.shape_cast %3 : vector<2x64x16xbf16> to vector<128x16xbf16>
    %c0_2 = arith.constant 0 : index
    %c0_3 = arith.constant 0 : index
    %5 = vector.load %arg2[%c0_2, %c0_3] : memref<16x128xbf16, #tpu.memory_space<vmem>>, vector<16x128xbf16>
    %cst = arith.constant dense<0.000000e+00> : vector<128x128xf32>
    %6 = tpu.matmul %4, %5, %cst {dimension_numbers = #tpu.dot_dimension_numbers<[1], [0], [0], [1], [0, 0, 1, 1], [], []>} : vector<128x16xbf16>, vector<16x128xbf16>, vector<128x128xf32> -> vector<128x128xf32>
    %7 = vector.shape_cast %6 : vector<128x128xf32> to vector<2x64x128xf32>
    %8 = arith.extf %4 : vector<128x16xbf16> to vector<128x16xf32>
    %c0_4 = arith.constant 0 : index
    %c0_5 = arith.constant 0 : index
    %9 = vector.load %arg3[%c0_4, %c0_5] : memref<16x2xf32, #tpu.memory_space<vmem>>, vector<16x2xf32>
    %cst_6 = arith.constant dense<0.000000e+00> : vector<128x2xf32>
    %10 = tpu.matmul %8, %9, %cst_6 {dimension_numbers = #tpu.dot_dimension_numbers<[1], [0], [0], [1], [0, 0, 1, 1], [], []>} : vector<128x16xf32>, vector<16x2xf32>, vector<128x2xf32> -> vector<128x2xf32>
    %11 = vector.shape_cast %10 : vector<128x2xf32> to vector<2x64x2xf32>
    %12 = vector.extract_strided_slice %11 {offsets = [0, 0, 0], sizes = [2, 64, 1], strides = [1, 1, 1]} : vector<2x64x2xf32> to vector<2x64x1xf32>
    %13 = vector.extract_strided_slice %11 {offsets = [0, 0, 1], sizes = [2, 64, 1], strides = [1, 1, 1]} : vector<2x64x2xf32> to vector<2x64x1xf32>
    %14 = tpu.transpose %13, [0, 2, 1] : vector<2x64x1xf32> -> vector<2x1x64xf32>
    %15 = vector.broadcast %12 : vector<2x64x1xf32> to vector<2x64x64xf32>
    %16 = vector.broadcast %14 : vector<2x1x64xf32> to vector<2x64x64xf32>
    %17 = arith.addf %15, %16 : vector<2x64x64xf32>
    %cst_7 = arith.constant 0.000000e+00 : f32
    %18 = vector.broadcast %cst_7 : f32 to vector<2x64x64xf32>
    %19 = arith.cmpf ogt, %17, %18 : vector<2x64x64xf32>
    %cst_8 = arith.constant 3.000000e-01 : f32
    %20 = vector.broadcast %cst_8 : f32 to vector<2x64x64xf32>
    %21 = arith.mulf %20, %17 : vector<2x64x64xf32>
    %22 = arith.select %19, %17, %21 : vector<2x64x64xi1>, vector<2x64x64xf32>
    %cst_9 = arith.constant -1.000000e+30 : f32
    %23 = vector.shape_cast %2 : vector<1x1x64xi1> to vector<1x1x64xi1>
    %24 = vector.broadcast %23 : vector<1x1x64xi1> to vector<2x64x64xi1>
    %25 = vector.broadcast %cst_9 : f32 to vector<2x64x64xf32>
    %26 = arith.select %24, %22, %25 : vector<2x64x64xi1>, vector<2x64x64xf32>
    %cst_10 = arith.constant dense<0xFF800000> : vector<2x64xf32>
    %27 = vector.multi_reduction <maximumf>, %26, %cst_10 [2] : vector<2x64x64xf32> to vector<2x64xf32>
    %28 = vector.shape_cast %27 : vector<2x64xf32> to vector<2x64x1xf32>
    %29 = vector.broadcast %28 : vector<2x64x1xf32> to vector<2x64x64xf32>
    %30 = arith.subf %26, %29 : vector<2x64x64xf32>
    %31 = math.exp %30 : vector<2x64x64xf32>
    %cst_11 = arith.constant dense<0.000000e+00> : vector<2x64xf32>
    %32 = vector.multi_reduction <add>, %31, %cst_11 [2] : vector<2x64x64xf32> to vector<2x64xf32>
    %33 = vector.shape_cast %32 : vector<2x64xf32> to vector<2x64x1xf32>
    %34 = vector.broadcast %33 : vector<2x64x1xf32> to vector<2x64x64xf32>
    %35 = arith.divf %31, %34 : vector<2x64x64xf32>
    "tpu.trace_start"() <{level = 10 : i32, message = "bqk,bkd->bqd"}> : () -> ()
    %cst_12 = arith.constant dense<0.000000e+00> : vector<2x64x128xf32>
    %36 = tpu.matmul %35, %7, %cst_12 {dimension_numbers = #tpu.dot_dimension_numbers<[2], [1], [1], [2], [0, 0, 0, 1, 1, 2], [0], [0]>} : vector<2x64x64xf32>, vector<2x64x128xf32>, vector<2x64x128xf32> -> vector<2x64x128xf32>
    %cst_13 = arith.constant 0.000000e+00 : f32
    "tpu.trace_stop"() : () -> ()
    %37 = vector.broadcast %cst_13 : f32 to vector<2x64x128xf32>
    %38 = arith.cmpf ogt, %36, %37 : vector<2x64x128xf32>
    %cst_14 = arith.constant 0.000000e+00 : f32
    %39 = vector.broadcast %cst_14 : f32 to vector<2x64x128xf32>
    %40 = arith.minimumf %36, %39 : vector<2x64x128xf32>
    %41 = math.exp %40 : vector<2x64x128xf32>
    %cst_15 = arith.constant 1.000000e+00 : f32
    %42 = vector.broadcast %cst_15 : f32 to vector<2x64x128xf32>
    %43 = arith.subf %41, %42 : vector<2x64x128xf32>
    %44 = arith.select %38, %36, %43 : vector<2x64x128xi1>, vector<2x64x128xf32>
    %45 = vector.shape_cast %44 : vector<2x64x128xf32> to vector<128x128xf32>
    %46 = arith.truncf %45 : vector<128x128xf32> to vector<128x128xbf16>
    %c0_16 = arith.constant 0 : index
    %c0_17 = arith.constant 0 : index
    %47 = vector.load %arg4[%c0_16, %c0_17] : memref<128x128xbf16, #tpu.memory_space<vmem>>, vector<128x128xbf16>
    %cst_18 = arith.constant dense<0.000000e+00> : vector<128x128xf32>
    %48 = tpu.matmul %46, %47, %cst_18 {dimension_numbers = #tpu.dot_dimension_numbers<[1], [0], [0], [1], [0, 0, 1, 1], [], []>} : vector<128x128xbf16>, vector<128x128xbf16>, vector<128x128xf32> -> vector<128x128xf32>
    %49 = vector.shape_cast %48 : vector<128x128xf32> to vector<2x64x128xf32>
    %c0_19 = arith.constant 0 : index
    %c0_20 = arith.constant 0 : index
    %50 = vector.load %arg5[%c0_19, %c0_20] : memref<128x2xf32, #tpu.memory_space<vmem>>, vector<128x2xf32>
    %cst_21 = arith.constant dense<0.000000e+00> : vector<128x2xf32>
    %51 = tpu.matmul %45, %50, %cst_21 {dimension_numbers = #tpu.dot_dimension_numbers<[1], [0], [0], [1], [0, 0, 1, 1], [], []>} : vector<128x128xf32>, vector<128x2xf32>, vector<128x2xf32> -> vector<128x2xf32>
    %52 = vector.shape_cast %51 : vector<128x2xf32> to vector<2x64x2xf32>
    %53 = vector.extract_strided_slice %52 {offsets = [0, 0, 0], sizes = [2, 64, 1], strides = [1, 1, 1]} : vector<2x64x2xf32> to vector<2x64x1xf32>
    %54 = vector.extract_strided_slice %52 {offsets = [0, 0, 1], sizes = [2, 64, 1], strides = [1, 1, 1]} : vector<2x64x2xf32> to vector<2x64x1xf32>
    %55 = tpu.transpose %54, [0, 2, 1] : vector<2x64x1xf32> -> vector<2x1x64xf32>
    %56 = vector.broadcast %53 : vector<2x64x1xf32> to vector<2x64x64xf32>
    %57 = vector.broadcast %55 : vector<2x1x64xf32> to vector<2x64x64xf32>
    %58 = arith.addf %56, %57 : vector<2x64x64xf32>
    %cst_22 = arith.constant 0.000000e+00 : f32
    %59 = vector.broadcast %cst_22 : f32 to vector<2x64x64xf32>
    %60 = arith.cmpf ogt, %58, %59 : vector<2x64x64xf32>
    %cst_23 = arith.constant 3.000000e-01 : f32
    %61 = vector.broadcast %cst_23 : f32 to vector<2x64x64xf32>
    %62 = arith.mulf %61, %58 : vector<2x64x64xf32>
    %63 = arith.select %60, %58, %62 : vector<2x64x64xi1>, vector<2x64x64xf32>
    %cst_24 = arith.constant -1.000000e+30 : f32
    %64 = vector.shape_cast %2 : vector<1x1x64xi1> to vector<1x1x64xi1>
    %65 = vector.broadcast %64 : vector<1x1x64xi1> to vector<2x64x64xi1>
    %66 = vector.broadcast %cst_24 : f32 to vector<2x64x64xf32>
    %67 = arith.select %65, %63, %66 : vector<2x64x64xi1>, vector<2x64x64xf32>
    %cst_25 = arith.constant dense<0xFF800000> : vector<2x64xf32>
    %68 = vector.multi_reduction <maximumf>, %67, %cst_25 [2] : vector<2x64x64xf32> to vector<2x64xf32>
    %69 = vector.shape_cast %68 : vector<2x64xf32> to vector<2x64x1xf32>
    %70 = vector.broadcast %69 : vector<2x64x1xf32> to vector<2x64x64xf32>
    %71 = arith.subf %67, %70 : vector<2x64x64xf32>
    %72 = math.exp %71 : vector<2x64x64xf32>
    %cst_26 = arith.constant dense<0.000000e+00> : vector<2x64xf32>
    %73 = vector.multi_reduction <add>, %72, %cst_26 [2] : vector<2x64x64xf32> to vector<2x64xf32>
    %74 = vector.shape_cast %73 : vector<2x64xf32> to vector<2x64x1xf32>
    %75 = vector.broadcast %74 : vector<2x64x1xf32> to vector<2x64x64xf32>
    %76 = arith.divf %72, %75 : vector<2x64x64xf32>
    "tpu.trace_start"() <{level = 10 : i32, message = "bqk,bkd->bqd"}> : () -> ()
    %cst_27 = arith.constant dense<0.000000e+00> : vector<2x64x128xf32>
    %77 = tpu.matmul %76, %49, %cst_27 {dimension_numbers = #tpu.dot_dimension_numbers<[2], [1], [1], [2], [0, 0, 0, 1, 1, 2], [0], [0]>} : vector<2x64x64xf32>, vector<2x64x128xf32>, vector<2x64x128xf32> -> vector<2x64x128xf32>
    %cst_28 = arith.constant 0.000000e+00 : f32
    "tpu.trace_stop"() : () -> ()
    %78 = vector.broadcast %cst_28 : f32 to vector<2x64x128xf32>
    %79 = arith.cmpf ogt, %77, %78 : vector<2x64x128xf32>
    %cst_29 = arith.constant 0.000000e+00 : f32
    %80 = vector.broadcast %cst_29 : f32 to vector<2x64x128xf32>
    %81 = arith.minimumf %77, %80 : vector<2x64x128xf32>
    %82 = math.exp %81 : vector<2x64x128xf32>
    %cst_30 = arith.constant 1.000000e+00 : f32
    %83 = vector.broadcast %cst_30 : f32 to vector<2x64x128xf32>
    %84 = arith.subf %82, %83 : vector<2x64x128xf32>
    %85 = arith.select %79, %77, %84 : vector<2x64x128xi1>, vector<2x64x128xf32>
    %86 = vector.shape_cast %85 : vector<2x64x128xf32> to vector<128x128xf32>
    %87 = arith.truncf %86 : vector<128x128xf32> to vector<128x128xbf16>
    %c0_31 = arith.constant 0 : index
    %c0_32 = arith.constant 0 : index
    %88 = vector.load %arg6[%c0_31, %c0_32] : memref<128x128xbf16, #tpu.memory_space<vmem>>, vector<128x128xbf16>
    %cst_33 = arith.constant dense<0.000000e+00> : vector<128x128xf32>
    %89 = tpu.matmul %87, %88, %cst_33 {dimension_numbers = #tpu.dot_dimension_numbers<[1], [0], [0], [1], [0, 0, 1, 1], [], []>} : vector<128x128xbf16>, vector<128x128xbf16>, vector<128x128xf32> -> vector<128x128xf32>
    %90 = vector.shape_cast %89 : vector<128x128xf32> to vector<2x64x128xf32>
    %c0_34 = arith.constant 0 : index
    %c0_35 = arith.constant 0 : index
    %91 = vector.load %arg7[%c0_34, %c0_35] : memref<128x2xf32, #tpu.memory_space<vmem>>, vector<128x2xf32>
    %cst_36 = arith.constant dense<0.000000e+00> : vector<128x2xf32>
    %92 = tpu.matmul %86, %91, %cst_36 {dimension_numbers = #tpu.dot_dimension_numbers<[1], [0], [0], [1], [0, 0, 1, 1], [], []>} : vector<128x128xf32>, vector<128x2xf32>, vector<128x2xf32> -> vector<128x2xf32>
    %93 = vector.shape_cast %92 : vector<128x2xf32> to vector<2x64x2xf32>
    %94 = vector.extract_strided_slice %93 {offsets = [0, 0, 0], sizes = [2, 64, 1], strides = [1, 1, 1]} : vector<2x64x2xf32> to vector<2x64x1xf32>
    %95 = vector.extract_strided_slice %93 {offsets = [0, 0, 1], sizes = [2, 64, 1], strides = [1, 1, 1]} : vector<2x64x2xf32> to vector<2x64x1xf32>
    %96 = tpu.transpose %95, [0, 2, 1] : vector<2x64x1xf32> -> vector<2x1x64xf32>
    %97 = vector.broadcast %94 : vector<2x64x1xf32> to vector<2x64x64xf32>
    %98 = vector.broadcast %96 : vector<2x1x64xf32> to vector<2x64x64xf32>
    %99 = arith.addf %97, %98 : vector<2x64x64xf32>
    %cst_37 = arith.constant 0.000000e+00 : f32
    %100 = vector.broadcast %cst_37 : f32 to vector<2x64x64xf32>
    %101 = arith.cmpf ogt, %99, %100 : vector<2x64x64xf32>
    %cst_38 = arith.constant 3.000000e-01 : f32
    %102 = vector.broadcast %cst_38 : f32 to vector<2x64x64xf32>
    %103 = arith.mulf %102, %99 : vector<2x64x64xf32>
    %104 = arith.select %101, %99, %103 : vector<2x64x64xi1>, vector<2x64x64xf32>
    %cst_39 = arith.constant -1.000000e+30 : f32
    %105 = vector.shape_cast %2 : vector<1x1x64xi1> to vector<1x1x64xi1>
    %106 = vector.broadcast %105 : vector<1x1x64xi1> to vector<2x64x64xi1>
    %107 = vector.broadcast %cst_39 : f32 to vector<2x64x64xf32>
    %108 = arith.select %106, %104, %107 : vector<2x64x64xi1>, vector<2x64x64xf32>
    %cst_40 = arith.constant dense<0xFF800000> : vector<2x64xf32>
    %109 = vector.multi_reduction <maximumf>, %108, %cst_40 [2] : vector<2x64x64xf32> to vector<2x64xf32>
    %110 = vector.shape_cast %109 : vector<2x64xf32> to vector<2x64x1xf32>
    %111 = vector.broadcast %110 : vector<2x64x1xf32> to vector<2x64x64xf32>
    %112 = arith.subf %108, %111 : vector<2x64x64xf32>
    %113 = math.exp %112 : vector<2x64x64xf32>
    %cst_41 = arith.constant dense<0.000000e+00> : vector<2x64xf32>
    %114 = vector.multi_reduction <add>, %113, %cst_41 [2] : vector<2x64x64xf32> to vector<2x64xf32>
    %115 = vector.shape_cast %114 : vector<2x64xf32> to vector<2x64x1xf32>
    %116 = vector.broadcast %115 : vector<2x64x1xf32> to vector<2x64x64xf32>
    %117 = arith.divf %113, %116 : vector<2x64x64xf32>
    "tpu.trace_start"() <{level = 10 : i32, message = "bqk,bkd->bqd"}> : () -> ()
    %cst_42 = arith.constant dense<0.000000e+00> : vector<2x64x128xf32>
    %118 = tpu.matmul %117, %90, %cst_42 {dimension_numbers = #tpu.dot_dimension_numbers<[2], [1], [1], [2], [0, 0, 0, 1, 1, 2], [0], [0]>} : vector<2x64x64xf32>, vector<2x64x128xf32>, vector<2x64x128xf32> -> vector<2x64x128xf32>
    "tpu.trace_stop"() : () -> ()
    %119 = vector.extract_strided_slice %118 {offsets = [0, 0, 0], sizes = [2, 50, 10], strides = [1, 1, 1]} : vector<2x64x128xf32> to vector<2x50x10xf32>
    %c0_43 = arith.constant 0 : index
    %c0_44 = arith.constant 0 : index
    %c0_45 = arith.constant 0 : index
    %120 = vector.load %arg8[%c0_43, %c0_44, %c0_45] : memref<2x50x10xf32, #tpu.memory_space<vmem>>, vector<2x50x10xf32>
    tpu.vector_store %arg8[%c0_43, %c0_44, %c0_45], %119 {strides = array<i32>} : memref<2x50x10xf32, #tpu.memory_space<vmem>>, vector<2x50x10xf32>,
    return
  }
  func.func @transform_0(%arg0: i32) -> (i32, i32, i32) {
    %c0_i32 = arith.constant 0 : i32
    %c0_i32_0 = arith.constant 0 : i32
    %c0_i32_1 = arith.constant 0 : i32
    return %arg0, %c0_i32, %c0_i32_0 : i32, i32, i32
  }
  func.func @transform_1(%arg0: i32) -> (i32, i32) {
    %c0_i32 = arith.constant 0 : i32
    %c0_i32_0 = arith.constant 0 : i32
    %c0_i32_1 = arith.constant 0 : i32
    return %c0_i32, %c0_i32_0 : i32, i32
  }
  func.func @transform_2(%arg0: i32) -> (i32, i32) {
    %c0_i32 = arith.constant 0 : i32
    %c0_i32_0 = arith.constant 0 : i32
    %c0_i32_1 = arith.constant 0 : i32
    return %c0_i32, %c0_i32_0 : i32, i32
  }
  func.func @transform_3(%arg0: i32) -> (i32, i32) {
    %c0_i32 = arith.constant 0 : i32
    %c0_i32_0 = arith.constant 0 : i32
    %c0_i32_1 = arith.constant 0 : i32
    return %c0_i32, %c0_i32_0 : i32, i32
  }
  func.func @transform_4(%arg0: i32) -> (i32, i32) {
    %c0_i32 = arith.constant 0 : i32
    %c0_i32_0 = arith.constant 0 : i32
    %c0_i32_1 = arith.constant 0 : i32
    return %c0_i32, %c0_i32_0 : i32, i32
  }
  func.func @transform_5(%arg0: i32) -> (i32, i32) {
    %c0_i32 = arith.constant 0 : i32
    %c0_i32_0 = arith.constant 0 : i32
    %c0_i32_1 = arith.constant 0 : i32
    return %c0_i32, %c0_i32_0 : i32, i32
  }
  func.func @transform_6(%arg0: i32) -> (i32, i32) {
    %c0_i32 = arith.constant 0 : i32
    %c0_i32_0 = arith.constant 0 : i32
    %c0_i32_1 = arith.constant 0 : i32
    return %c0_i32, %c0_i32_0 : i32, i32
  }
  func.func @transform_7(%arg0: i32) -> (i32, i32, i32) {
    %c0_i32 = arith.constant 0 : i32
    %c0_i32_0 = arith.constant 0 : i32
    %c0_i32_1 = arith.constant 0 : i32
    return %arg0, %c0_i32, %c0_i32_0 : i32, i32, i32
  }
}

module attributes {stable_mosaic.version = 11 : i64} {
  func.func @mlp_head_kernel(%arg0: i32, %arg1: memref<2x512xf32, #tpu.memory_space<vmem>>, %arg2: memref<1x512xf32, #tpu.memory_space<vmem>>, %arg3: memref<1x512xf32, #tpu.memory_space<vmem>>, %arg4: memref<512x512xbf16, #tpu.memory_space<vmem>>, %arg5: memref<1x512xf32, #tpu.memory_space<vmem>>, %arg6: memref<1x512xf32, #tpu.memory_space<vmem>>, %arg7: memref<1x512xf32, #tpu.memory_space<vmem>>, %arg8: memref<512x64xbf16, #tpu.memory_space<vmem>>, %arg9: memref<1x64xf32, #tpu.memory_space<vmem>>, %arg10: memref<1x64xf32, #tpu.memory_space<vmem>>, %arg11: memref<1x64xf32, #tpu.memory_space<vmem>>, %arg12: memref<64x2xf32, #tpu.memory_space<vmem>>, %arg13: memref<1x2xf32, #tpu.memory_space<vmem>>, %arg14: memref<2x512xf32, #tpu.memory_space<vmem>>, %arg15: memref<2x2xf32, #tpu.memory_space<vmem>>) attributes {dimension_semantics = [#tpu.dimension_semantics<arbitrary>], iteration_bounds = array<i64: 1>, scalar_prefetch = 0 : i64, scratch_operands = 0 : i64, tpu.core_type = #tpu.core_type<tc>, window_params = [{pipeline_mode = #tpu.pipeline_mode<synchronous>, transform_indices = @transform_0, window_bounds = array<i64: 2, 512>}, {pipeline_mode = #tpu.pipeline_mode<synchronous>, transform_indices = @transform_1, window_bounds = array<i64: 1, 512>}, {pipeline_mode = #tpu.pipeline_mode<synchronous>, transform_indices = @transform_2, window_bounds = array<i64: 1, 512>}, {pipeline_mode = #tpu.pipeline_mode<synchronous>, transform_indices = @transform_3, window_bounds = array<i64: 512, 512>}, {pipeline_mode = #tpu.pipeline_mode<synchronous>, transform_indices = @transform_4, window_bounds = array<i64: 1, 512>}, {pipeline_mode = #tpu.pipeline_mode<synchronous>, transform_indices = @transform_5, window_bounds = array<i64: 1, 512>}, {pipeline_mode = #tpu.pipeline_mode<synchronous>, transform_indices = @transform_6, window_bounds = array<i64: 1, 512>}, {pipeline_mode = #tpu.pipeline_mode<synchronous>, transform_indices = @transform_7, window_bounds = array<i64: 512, 64>}, {pipeline_mode = #tpu.pipeline_mode<synchronous>, transform_indices = @transform_8, window_bounds = array<i64: 1, 64>}, {pipeline_mode = #tpu.pipeline_mode<synchronous>, transform_indices = @transform_9, window_bounds = array<i64: 1, 64>}, {pipeline_mode = #tpu.pipeline_mode<synchronous>, transform_indices = @transform_10, window_bounds = array<i64: 1, 64>}, {pipeline_mode = #tpu.pipeline_mode<synchronous>, transform_indices = @transform_11, window_bounds = array<i64: 64, 2>}, {pipeline_mode = #tpu.pipeline_mode<synchronous>, transform_indices = @transform_12, window_bounds = array<i64: 1, 2>}, {pipeline_mode = #tpu.pipeline_mode<synchronous>, transform_indices = @transform_13, window_bounds = array<i64: 2, 512>}, {pipeline_mode = #tpu.pipeline_mode<synchronous>, transform_indices = @transform_14, window_bounds = array<i64: 2, 2>}]} {
    %c0 = arith.constant 0 : index
    %c0_0 = arith.constant 0 : index
    %0 = vector.load %arg1[%c0, %c0_0] : memref<2x512xf32, #tpu.memory_space<vmem>>, vector<2x512xf32>
    %cst = arith.constant dense<0.000000e+00> : vector<512xf32>
    %1 = vector.multi_reduction <add>, %0, %cst [0] : vector<2x512xf32> to vector<512xf32>
    %2 = vector.shape_cast %1 : vector<512xf32> to vector<1x512xf32>
    %cst_1 = arith.constant 2.000000e+00 : f32
    %3 = vector.broadcast %cst_1 : f32 to vector<1x512xf32>
    %4 = arith.divf %2, %3 : vector<1x512xf32>
    %5 = vector.broadcast %4 : vector<1x512xf32> to vector<2x512xf32>
    %6 = arith.subf %0, %5 : vector<2x512xf32>
    %7 = vector.broadcast %4 : vector<1x512xf32> to vector<2x512xf32>
    %8 = arith.subf %0, %7 : vector<2x512xf32>
    %9 = arith.mulf %6, %8 : vector<2x512xf32>
    %cst_2 = arith.constant dense<0.000000e+00> : vector<512xf32>
    %10 = vector.multi_reduction <add>, %9, %cst_2 [0] : vector<2x512xf32> to vector<512xf32>
    %11 = vector.shape_cast %10 : vector<512xf32> to vector<1x512xf32>
    %cst_3 = arith.constant 2.000000e+00 : f32
    %12 = vector.broadcast %cst_3 : f32 to vector<1x512xf32>
    %13 = arith.divf %11, %12 : vector<1x512xf32>
    %c0_4 = arith.constant 0 : index
    %c0_5 = arith.constant 0 : index
    %14 = vector.load %arg2[%c0_4, %c0_5] : memref<1x512xf32, #tpu.memory_space<vmem>>, vector<1x512xf32>
    %15 = vector.broadcast %4 : vector<1x512xf32> to vector<2x512xf32>
    %16 = arith.subf %0, %15 : vector<2x512xf32>
    %17 = vector.broadcast %14 : vector<1x512xf32> to vector<2x512xf32>
    %18 = arith.mulf %17, %16 : vector<2x512xf32>
    %cst_6 = arith.constant 9.99999974E-6 : f32
    %19 = vector.broadcast %cst_6 : f32 to vector<1x512xf32>
    %20 = arith.addf %13, %19 : vector<1x512xf32>
    %21 = math.rsqrt %20 : vector<1x512xf32>
    %22 = vector.broadcast %21 : vector<1x512xf32> to vector<2x512xf32>
    %23 = arith.mulf %18, %22 : vector<2x512xf32>
    %c0_7 = arith.constant 0 : index
    %c0_8 = arith.constant 0 : index
    %24 = vector.load %arg3[%c0_7, %c0_8] : memref<1x512xf32, #tpu.memory_space<vmem>>, vector<1x512xf32>
    %25 = vector.broadcast %24 : vector<1x512xf32> to vector<2x512xf32>
    %26 = arith.addf %23, %25 : vector<2x512xf32>
    %cst_9 = arith.constant 0.000000e+00 : f32
    %27 = vector.broadcast %cst_9 : f32 to vector<2x512xf32>
    %28 = arith.maximumf %26, %27 : vector<2x512xf32>
    %29 = arith.truncf %28 : vector<2x512xf32> to vector<2x512xbf16>
    %c0_10 = arith.constant 0 : index
    %c0_11 = arith.constant 0 : index
    %30 = vector.load %arg4[%c0_10, %c0_11] : memref<512x512xbf16, #tpu.memory_space<vmem>>, vector<512x512xbf16>
    %cst_12 = arith.constant dense<0.000000e+00> : vector<2x512xf32>
    %31 = tpu.matmul %29, %30, %cst_12 {dimension_numbers = #tpu.dot_dimension_numbers<[1], [0], [0], [1], [0, 0, 1, 1], [], []>} : vector<2x512xbf16>, vector<512x512xbf16>, vector<2x512xf32> -> vector<2x512xf32>
    %c0_13 = arith.constant 0 : index
    %c0_14 = arith.constant 0 : index
    %32 = vector.load %arg5[%c0_13, %c0_14] : memref<1x512xf32, #tpu.memory_space<vmem>>, vector<1x512xf32>
    %33 = vector.broadcast %32 : vector<1x512xf32> to vector<2x512xf32>
    %34 = arith.addf %31, %33 : vector<2x512xf32>
    %cst_15 = arith.constant dense<0.000000e+00> : vector<512xf32>
    %35 = vector.multi_reduction <add>, %34, %cst_15 [0] : vector<2x512xf32> to vector<512xf32>
    %36 = vector.shape_cast %35 : vector<512xf32> to vector<1x512xf32>
    %cst_16 = arith.constant 2.000000e+00 : f32
    %37 = vector.broadcast %cst_16 : f32 to vector<1x512xf32>
    %38 = arith.divf %36, %37 : vector<1x512xf32>
    %39 = vector.broadcast %38 : vector<1x512xf32> to vector<2x512xf32>
    %40 = arith.subf %34, %39 : vector<2x512xf32>
    %41 = vector.broadcast %38 : vector<1x512xf32> to vector<2x512xf32>
    %42 = arith.subf %34, %41 : vector<2x512xf32>
    %43 = arith.mulf %40, %42 : vector<2x512xf32>
    %cst_17 = arith.constant dense<0.000000e+00> : vector<512xf32>
    %44 = vector.multi_reduction <add>, %43, %cst_17 [0] : vector<2x512xf32> to vector<512xf32>
    %45 = vector.shape_cast %44 : vector<512xf32> to vector<1x512xf32>
    %cst_18 = arith.constant 2.000000e+00 : f32
    %46 = vector.broadcast %cst_18 : f32 to vector<1x512xf32>
    %47 = arith.divf %45, %46 : vector<1x512xf32>
    %c0_19 = arith.constant 0 : index
    %c0_20 = arith.constant 0 : index
    %48 = vector.load %arg6[%c0_19, %c0_20] : memref<1x512xf32, #tpu.memory_space<vmem>>, vector<1x512xf32>
    %49 = vector.broadcast %38 : vector<1x512xf32> to vector<2x512xf32>
    %50 = arith.subf %34, %49 : vector<2x512xf32>
    %51 = vector.broadcast %48 : vector<1x512xf32> to vector<2x512xf32>
    %52 = arith.mulf %51, %50 : vector<2x512xf32>
    %cst_21 = arith.constant 9.99999974E-6 : f32
    %53 = vector.broadcast %cst_21 : f32 to vector<1x512xf32>
    %54 = arith.addf %47, %53 : vector<1x512xf32>
    %55 = math.rsqrt %54 : vector<1x512xf32>
    %56 = vector.broadcast %55 : vector<1x512xf32> to vector<2x512xf32>
    %57 = arith.mulf %52, %56 : vector<2x512xf32>
    %c0_22 = arith.constant 0 : index
    %c0_23 = arith.constant 0 : index
    %58 = vector.load %arg7[%c0_22, %c0_23] : memref<1x512xf32, #tpu.memory_space<vmem>>, vector<1x512xf32>
    %59 = vector.broadcast %58 : vector<1x512xf32> to vector<2x512xf32>
    %60 = arith.addf %57, %59 : vector<2x512xf32>
    %cst_24 = arith.constant 0.000000e+00 : f32
    %61 = vector.broadcast %cst_24 : f32 to vector<2x512xf32>
    %62 = arith.maximumf %60, %61 : vector<2x512xf32>
    %c0_25 = arith.constant 0 : index
    %c0_26 = arith.constant 0 : index
    %63 = vector.load %arg14[%c0_25, %c0_26] : memref<2x512xf32, #tpu.memory_space<vmem>>, vector<2x512xf32>
    tpu.vector_store %arg14[%c0_25, %c0_26], %62 {strides = array<i32>} : memref<2x512xf32, #tpu.memory_space<vmem>>, vector<2x512xf32>,
    %64 = arith.truncf %62 : vector<2x512xf32> to vector<2x512xbf16>
    %c0_27 = arith.constant 0 : index
    %c0_28 = arith.constant 0 : index
    %65 = vector.load %arg8[%c0_27, %c0_28] : memref<512x64xbf16, #tpu.memory_space<vmem>>, vector<512x64xbf16>
    %cst_29 = arith.constant dense<0.000000e+00> : vector<2x64xf32>
    %66 = tpu.matmul %64, %65, %cst_29 {dimension_numbers = #tpu.dot_dimension_numbers<[1], [0], [0], [1], [0, 0, 1, 1], [], []>} : vector<2x512xbf16>, vector<512x64xbf16>, vector<2x64xf32> -> vector<2x64xf32>
    %c0_30 = arith.constant 0 : index
    %c0_31 = arith.constant 0 : index
    %67 = vector.load %arg9[%c0_30, %c0_31] : memref<1x64xf32, #tpu.memory_space<vmem>>, vector<1x64xf32>
    %68 = vector.broadcast %67 : vector<1x64xf32> to vector<2x64xf32>
    %69 = arith.addf %66, %68 : vector<2x64xf32>
    %cst_32 = arith.constant dense<0.000000e+00> : vector<64xf32>
    %70 = vector.multi_reduction <add>, %69, %cst_32 [0] : vector<2x64xf32> to vector<64xf32>
    %71 = vector.shape_cast %70 : vector<64xf32> to vector<1x64xf32>
    %cst_33 = arith.constant 2.000000e+00 : f32
    %72 = vector.broadcast %cst_33 : f32 to vector<1x64xf32>
    %73 = arith.divf %71, %72 : vector<1x64xf32>
    %74 = vector.broadcast %73 : vector<1x64xf32> to vector<2x64xf32>
    %75 = arith.subf %69, %74 : vector<2x64xf32>
    %76 = vector.broadcast %73 : vector<1x64xf32> to vector<2x64xf32>
    %77 = arith.subf %69, %76 : vector<2x64xf32>
    %78 = arith.mulf %75, %77 : vector<2x64xf32>
    %cst_34 = arith.constant dense<0.000000e+00> : vector<64xf32>
    %79 = vector.multi_reduction <add>, %78, %cst_34 [0] : vector<2x64xf32> to vector<64xf32>
    %80 = vector.shape_cast %79 : vector<64xf32> to vector<1x64xf32>
    %cst_35 = arith.constant 2.000000e+00 : f32
    %81 = vector.broadcast %cst_35 : f32 to vector<1x64xf32>
    %82 = arith.divf %80, %81 : vector<1x64xf32>
    %c0_36 = arith.constant 0 : index
    %c0_37 = arith.constant 0 : index
    %83 = vector.load %arg10[%c0_36, %c0_37] : memref<1x64xf32, #tpu.memory_space<vmem>>, vector<1x64xf32>
    %84 = vector.broadcast %73 : vector<1x64xf32> to vector<2x64xf32>
    %85 = arith.subf %69, %84 : vector<2x64xf32>
    %86 = vector.broadcast %83 : vector<1x64xf32> to vector<2x64xf32>
    %87 = arith.mulf %86, %85 : vector<2x64xf32>
    %cst_38 = arith.constant 9.99999974E-6 : f32
    %88 = vector.broadcast %cst_38 : f32 to vector<1x64xf32>
    %89 = arith.addf %82, %88 : vector<1x64xf32>
    %90 = math.rsqrt %89 : vector<1x64xf32>
    %91 = vector.broadcast %90 : vector<1x64xf32> to vector<2x64xf32>
    %92 = arith.mulf %87, %91 : vector<2x64xf32>
    %c0_39 = arith.constant 0 : index
    %c0_40 = arith.constant 0 : index
    %93 = vector.load %arg11[%c0_39, %c0_40] : memref<1x64xf32, #tpu.memory_space<vmem>>, vector<1x64xf32>
    %94 = vector.broadcast %93 : vector<1x64xf32> to vector<2x64xf32>
    %95 = arith.addf %92, %94 : vector<2x64xf32>
    %cst_41 = arith.constant 0.000000e+00 : f32
    %96 = vector.broadcast %cst_41 : f32 to vector<2x64xf32>
    %97 = arith.maximumf %95, %96 : vector<2x64xf32>
    %c0_42 = arith.constant 0 : index
    %c0_43 = arith.constant 0 : index
    %98 = vector.load %arg12[%c0_42, %c0_43] : memref<64x2xf32, #tpu.memory_space<vmem>>, vector<64x2xf32>
    %cst_44 = arith.constant dense<0.000000e+00> : vector<2x2xf32>
    %99 = tpu.matmul %97, %98, %cst_44 {dimension_numbers = #tpu.dot_dimension_numbers<[1], [0], [0], [1], [0, 0, 1, 1], [], []>} : vector<2x64xf32>, vector<64x2xf32>, vector<2x2xf32> -> vector<2x2xf32>
    %c0_45 = arith.constant 0 : index
    %c0_46 = arith.constant 0 : index
    %100 = vector.load %arg13[%c0_45, %c0_46] : memref<1x2xf32, #tpu.memory_space<vmem>>, vector<1x2xf32>
    %101 = vector.broadcast %100 : vector<1x2xf32> to vector<2x2xf32>
    %102 = arith.addf %99, %101 : vector<2x2xf32>
    %c0_47 = arith.constant 0 : index
    %c0_48 = arith.constant 0 : index
    %103 = vector.load %arg15[%c0_47, %c0_48] : memref<2x2xf32, #tpu.memory_space<vmem>>, vector<2x2xf32>
    tpu.vector_store %arg15[%c0_47, %c0_48], %102 {strides = array<i32>} : memref<2x2xf32, #tpu.memory_space<vmem>>, vector<2x2xf32>,
    return
  }
  func.func @transform_0(%arg0: i32) -> (i32, i32) {
    %c0_i32 = arith.constant 0 : i32
    %c0_i32_0 = arith.constant 0 : i32
    %c0_i32_1 = arith.constant 0 : i32
    return %c0_i32, %c0_i32_0 : i32, i32
  }
  func.func @transform_1(%arg0: i32) -> (i32, i32) {
    %c0_i32 = arith.constant 0 : i32
    %c0_i32_0 = arith.constant 0 : i32
    %c0_i32_1 = arith.constant 0 : i32
    return %c0_i32, %c0_i32_0 : i32, i32
  }
  func.func @transform_2(%arg0: i32) -> (i32, i32) {
    %c0_i32 = arith.constant 0 : i32
    %c0_i32_0 = arith.constant 0 : i32
    %c0_i32_1 = arith.constant 0 : i32
    return %c0_i32, %c0_i32_0 : i32, i32
  }
  func.func @transform_3(%arg0: i32) -> (i32, i32) {
    %c0_i32 = arith.constant 0 : i32
    %c0_i32_0 = arith.constant 0 : i32
    %c0_i32_1 = arith.constant 0 : i32
    return %c0_i32, %c0_i32_0 : i32, i32
  }
  func.func @transform_4(%arg0: i32) -> (i32, i32) {
    %c0_i32 = arith.constant 0 : i32
    %c0_i32_0 = arith.constant 0 : i32
    %c0_i32_1 = arith.constant 0 : i32
    return %c0_i32, %c0_i32_0 : i32, i32
  }
  func.func @transform_5(%arg0: i32) -> (i32, i32) {
    %c0_i32 = arith.constant 0 : i32
    %c0_i32_0 = arith.constant 0 : i32
    %c0_i32_1 = arith.constant 0 : i32
    return %c0_i32, %c0_i32_0 : i32, i32
  }
  func.func @transform_6(%arg0: i32) -> (i32, i32) {
    %c0_i32 = arith.constant 0 : i32
    %c0_i32_0 = arith.constant 0 : i32
    %c0_i32_1 = arith.constant 0 : i32
    return %c0_i32, %c0_i32_0 : i32, i32
  }
  func.func @transform_7(%arg0: i32) -> (i32, i32) {
    %c0_i32 = arith.constant 0 : i32
    %c0_i32_0 = arith.constant 0 : i32
    %c0_i32_1 = arith.constant 0 : i32
    return %c0_i32, %c0_i32_0 : i32, i32
  }
  func.func @transform_8(%arg0: i32) -> (i32, i32) {
    %c0_i32 = arith.constant 0 : i32
    %c0_i32_0 = arith.constant 0 : i32
    %c0_i32_1 = arith.constant 0 : i32
    return %c0_i32, %c0_i32_0 : i32, i32
  }
  func.func @transform_9(%arg0: i32) -> (i32, i32) {
    %c0_i32 = arith.constant 0 : i32
    %c0_i32_0 = arith.constant 0 : i32
    %c0_i32_1 = arith.constant 0 : i32
    return %c0_i32, %c0_i32_0 : i32, i32
  }
  func.func @transform_10(%arg0: i32) -> (i32, i32) {
    %c0_i32 = arith.constant 0 : i32
    %c0_i32_0 = arith.constant 0 : i32
    %c0_i32_1 = arith.constant 0 : i32
    return %c0_i32, %c0_i32_0 : i32, i32
  }
  func.func @transform_11(%arg0: i32) -> (i32, i32) {
    %c0_i32 = arith.constant 0 : i32
    %c0_i32_0 = arith.constant 0 : i32
    %c0_i32_1 = arith.constant 0 : i32
    return %c0_i32, %c0_i32_0 : i32, i32
  }
  func.func @transform_12(%arg0: i32) -> (i32, i32) {
    %c0_i32 = arith.constant 0 : i32
    %c0_i32_0 = arith.constant 0 : i32
    %c0_i32_1 = arith.constant 0 : i32
    return %c0_i32, %c0_i32_0 : i32, i32
  }
  func.func @transform_13(%arg0: i32) -> (i32, i32) {
    %c0_i32 = arith.constant 0 : i32
    %c0_i32_0 = arith.constant 0 : i32
    %c0_i32_1 = arith.constant 0 : i32
    return %c0_i32, %c0_i32_0 : i32, i32
  }
  func.func @transform_14(%arg0: i32) -> (i32, i32) {
    %c0_i32 = arith.constant 0 : i32
    %c0_i32_0 = arith.constant 0 : i32
    %c0_i32_1 = arith.constant 0 : i32
    return %c0_i32, %c0_i32_0 : i32, i32
  }
}

</mosaic_0001>

<bundles_post_ra>
// kernel: gatnet_forward.3
= control target key start
LH: loop header
LB: loop body
LE: loop exit
PB: predicated region body
PF: predicated region fallthrough
CT: control target
= control target key end

     0   :  { %20 = vsyncpa [#allocation3], 0  ;;  %v2458_v36 = vmov 1983009808   ;;  %v55_v38 = vlaneseq  ;;  %vm72_vm0 = vcmask 1041408   ;;  %s3183_s0 = inlined_call_operand.vmem [shape: f32[2,512], index: 0, kind: input, shape index: {}]   ;;  %s3184_s1 = inlined_call_operand.vmem [shape: f32[1,512], index: 1, kind: input, shape index: {}]   ;;  %s3185_s2 = inlined_call_operand.vmem [shape: f32[1,512], index: 2, kind: input, shape index: {}]   ;;  %s3186_s3 = inlined_call_operand.vmem [shape: bf16[512,512], index: 3, kind: input, shape index: {}]   ;;  %s3187_s4 = inlined_call_operand.vmem [shape: f32[1,512], index: 4, kind: input, shape index: {}]   ;;  %s3188_s5 = inlined_call_operand.vmem [shape: f32[1,512], index: 5, kind: input, shape index: {}]   ;;  %s3189_s6 = inlined_call_operand.vmem [shape: f32[1,512], index: 6, kind: input, shape index: {}]   ;;  %s3190_s7 = inlined_call_operand.vmem [shape: bf16[512,64], index: 7, kind: input, shape index: {}]   ;;  %s3191_s8 = inlined_call_operand.vmem [shape: f32[1,64], index: 8, kind: input, shape index: {}]   ;;  %s3192_s9 = inlined_call_operand.vmem [shape: f32[1,64], index: 9, kind: input, shape index: {}]   ;;  %s3193_s10 = inlined_call_operand.vmem [shape: f32[1,64], index: 10, kind: input, shape index: {}]   ;;  %s3194_s11 = inlined_call_operand.vmem [shape: f32[64,2], index: 11, kind: input, shape index: {}]   ;;  %s3195_s12 = inlined_call_operand.vmem [shape: f32[1,2], index: 12, kind: input, shape index: {}]   ;;  %s3196_s13 = inlined_call_operand.hbm [shape: f32[2,512], index: 13, kind: output, shape index: {0}]   ;;  %s3197_s14 = inlined_call_operand.hbm [shape: f32[2,2], index: 14, kind: output, shape index: {1}]  }
   0x1   :  { %v2167_v0 = vld [vmem:[%s3186_s3 + $0x4] ss:$16 sps:$4 sm:$0xff]   ;;  %v2169_v1 = vld [vmem:[%s3186_s3 + $0xc] ss:$16 sps:$4 sm:$0xff]   ;;  %v2171_v2 = vld [vmem:[%s3186_s3] ss:$16 sps:$4 sm:$0xff]   ;;  %v53_v37 = vunpack.c.l.s4 %v2458_v36 }
   0x2   :  { %1068 = vmatprep.subr.bf16.mxu0 %v2167_v0  ;;  %v2172_v3 = vld [vmem:[%s3186_s3 + $0x8] ss:$16 sps:$4 sm:$0xff]   ;;  %1150 = vmatprep.subr.bf16.mxu1 %v2169_v1  ;;  %v2173_v4 = vld [vmem:[%s3186_s3 + $0x24] ss:$16 sps:$4 sm:$0xff]   ;;  %v2175_v5 = vld [vmem:[%s3186_s3 + $0x2c] ss:$16 sps:$4 sm:$0xff]  }
   0x3   :  { %1069 = vmatpush1.bf16.msra.mxu0 %v2171_v2  ;;  %1151 = vmatpush1.bf16.msra.mxu1 %v2172_v3  ;;  %v2177_v6 = vld [vmem:[%s3186_s3 + $0x20] ss:$16 sps:$4 sm:$0xff]   ;;  %v2178_v7 = vld [vmem:[%s3186_s3 + $0x28] ss:$16 sps:$4 sm:$0xff]   ;;  %v2179_v8 = vld [vmem:[%s3186_s3 + $0x44] ss:$16 sps:$4 sm:$0xff]   ;;  %v54_v42 = vunpack.c.0.s8 %v53_v37 }
   0x4   :  { %1070 = vmatprep.subr.bf16.mxu0 %v2173_v4  ;;  %1152 = vmatprep.subr.bf16.mxu1 %v2175_v5  ;;  %v2181_v9 = vld [vmem:[%s3186_s3 + $0x4c] ss:$16 sps:$4 sm:$0xff]   ;;  %v2183_v10 = vld [vmem:[%s3186_s3 + $0x40] ss:$16 sps:$4 sm:$0xff]   ;;  %v2184_v11 = vld [vmem:[%s3186_s3 + $0x48] ss:$16 sps:$4 sm:$0xff]  }
   0x5   :  { %v2185_v12 = vld [vmem:[%s3186_s3 + $0x64] ss:$16 sps:$4 sm:$0xff]   ;;  %v2187_v13 = vld [vmem:[%s3186_s3 + $0x6c] ss:$16 sps:$4 sm:$0xff]   ;;  %v2189_v14 = vld [vmem:[%s3186_s3 + $0x60] ss:$16 sps:$4 sm:$0xff]  }
   0x6   :  { %v2190_v15 = vld [vmem:[%s3186_s3 + $0x68] ss:$16 sps:$4 sm:$0xff]   ;;  %v2191_v16 = vld [vmem:[%s3186_s3 + $0x84] ss:$16 sps:$4 sm:$0xff]   ;;  %v2193_v17 = vld [vmem:[%s3186_s3 + $0x8c] ss:$16 sps:$4 sm:$0xff]  }
   0x7   :  { %1071 = vmatpush1.bf16.msra.mxu0 %v2177_v6  ;;  %1153 = vmatpush1.bf16.msra.mxu1 %v2178_v7  ;;  %v2195_v18 = vld [vmem:[%s3186_s3 + $0x80] ss:$16 sps:$4 sm:$0xff]   ;;  %v2196_v19 = vld [vmem:[%s3186_s3 + $0x88] ss:$16 sps:$4 sm:$0xff]   ;;  %v2197_v20 = vld [vmem:[%s3186_s3 + $0xa4] ss:$16 sps:$4 sm:$0xff]  }
   0x8   :  { %1072 = vmatprep.subr.bf16.mxu0 %v2179_v8  ;;  %1154 = vmatprep.subr.bf16.mxu1 %v2181_v9  ;;  %v2199_v21 = vld [vmem:[%s3186_s3 + $0xac] ss:$16 sps:$4 sm:$0xff]   ;;  %v2201_v22 = vld [vmem:[%s3186_s3 + $0xa0] ss:$16 sps:$4 sm:$0xff]   ;;  %v2202_v23 = vld [vmem:[%s3186_s3 + $0xa8] ss:$16 sps:$4 sm:$0xff]  }
   0x9   :  { %v2203_v24 = vld [vmem:[%s3186_s3 + $0xc4] ss:$16 sps:$4 sm:$0xff]   ;;  %v2205_v25 = vld [vmem:[%s3186_s3 + $0xcc] ss:$16 sps:$4 sm:$0xff]   ;;  %v2207_v26 = vld [vmem:[%s3186_s3 + $0xc0] ss:$16 sps:$4 sm:$0xff]  }
   0xa   :  { %v2208_v27 = vld [vmem:[%s3186_s3 + $0xc8] ss:$16 sps:$4 sm:$0xff]   ;;  %v2209_v28 = vld [vmem:[%s3186_s3 + $0xe4] ss:$16 sps:$4 sm:$0xff]   ;;  %v2211_v29 = vld [vmem:[%s3186_s3 + $0xec] ss:$16 sps:$4 sm:$0xff]  }
   0xb   :  { %1073 = vmatpush1.bf16.msra.mxu0 %v2183_v10  ;;  %1155 = vmatpush1.bf16.msra.mxu1 %v2184_v11  ;;  %v2213_v30 = vld [vmem:[%s3186_s3 + $0xe0] ss:$16 sps:$4 sm:$0xff]   ;;  %v2214_v31 = vld [vmem:[%s3186_s3 + $0xe8] ss:$16 sps:$4 sm:$0xff]   ;;  %v2215_v32 = vld [vmem:[%s3186_s3 + $0x104] ss:$16 sps:$4 sm:$0xff]  }
   0xc   :  { %1074 = vmatprep.subr.bf16.mxu0 %v2185_v12  ;;  %1156 = vmatprep.subr.bf16.mxu1 %v2187_v13  ;;  %v2217_v33 = vld [vmem:[%s3186_s3 + $0x10c] ss:$16 sps:$4 sm:$0xff]   ;;  %v2219_v34 = vld [vmem:[%s3186_s3 + $0x100] ss:$16 sps:$4 sm:$0xff]   ;;  %v2220_v35 = vld [vmem:[%s3186_s3 + $0x108] ss:$16 sps:$4 sm:$0xff]  }
   0xd   :  { %v2221_v39 = vld [vmem:[%s3186_s3 + $0x124] ss:$16 sps:$4 sm:$0xff]   ;;  %v2223_v40 = vld [vmem:[%s3186_s3 + $0x12c] ss:$16 sps:$4 sm:$0xff]   ;;  %v2225_v41 = vld [vmem:[%s3186_s3 + $0x120] ss:$16 sps:$4 sm:$0xff]  }
   0xe   :  { %v2656_v43 = vshrl.u32 %v55_v38, 7  ;;  %v2226_v44 = vld [vmem:[%s3186_s3 + $0x128] ss:$16 sps:$4 sm:$0xff]   ;;  %v2227_v45 = vld [vmem:[%s3186_s3 + $0x144] ss:$16 sps:$4 sm:$0xff]  }
   0xf   :  { %1075 = vmatpush1.bf16.msra.mxu0 %v2189_v14  ;;  %1157 = vmatpush1.bf16.msra.mxu1 %v2190_v15  ;;  %v2229_v46 = vld [vmem:[%s3186_s3 + $0x14c] ss:$16 sps:$4 sm:$0xff]   ;;  %v2231_v47 = vld [vmem:[%s3186_s3 + $0x140] ss:$16 sps:$4 sm:$0xff]   ;;  %v2232_v48 = vld [vmem:[%s3186_s3 + $0x148] ss:$16 sps:$4 sm:$0xff]  }
  0x10   :  { %1076 = vmatprep.subr.bf16.mxu0 %v2191_v16  ;;  %1158 = vmatprep.subr.bf16.mxu1 %v2193_v17  ;;  %v2674_v49 = vsub.s32 %v54_v42, %v2656_v43  ;;  %v2233_v50 = vld [vmem:[%s3186_s3 + $0x164] ss:$16 sps:$4 sm:$0xff]   ;;  %v2235_v51 = vld [vmem:[%s3186_s3 + $0x16c] ss:$16 sps:$4 sm:$0xff]   ;;  %v2237_v53 = vld [vmem:[%s3186_s3 + $0x160] ss:$16 sps:$4 sm:$0xff]  }
  0x11   :  { %v2685_v52 = vld [vmem:[%s3183_s0] sm:$0xff]  ;;  %v2238_v56 = vld [vmem:[%s3186_s3 + $0x168] ss:$16 sps:$4 sm:$0xff]   ;;  %v2241_v58 = vld [vmem:[%s3186_s3 + $0x18c] ss:$16 sps:$4 sm:$0xff]  }
  0x12   :  { %v51_v54 = vcombine.high %v2685_v52, %v2685_v52  ;;  %v58_v55 = vrot.slane %v2685_v52, %v2674_v49  ;;  %v2239_v57 = vld [vmem:[%s3186_s3 + $0x184] ss:$16 sps:$4 sm:$0xff]   ;;  %v2243_v63 = vld [vmem:[%s3186_s3 + $0x180] ss:$16 sps:$4 sm:$0xff]   ;;  %v2244_v0 = vld [vmem:[%s3186_s3 + $0x188] ss:$16 sps:$4 sm:$0xff]  }
  0x13   :  { %1077 = vmatpush1.bf16.msra.mxu0 %v2195_v18  ;;  %1159 = vmatpush1.bf16.msra.mxu1 %v2196_v19  ;;  %v2245_v4 = vld [vmem:[%s3186_s3 + $0x1a4] ss:$16 sps:$4 sm:$0xff]   ;;  %v2247_v8 = vld [vmem:[%s3186_s3 + $0x1ac] ss:$16 sps:$4 sm:$0xff]   ;;  %v2249_v14 = vld [vmem:[%s3186_s3 + $0x1a0] ss:$16 sps:$4 sm:$0xff]  }
  0x14   :  { %1078 = vmatprep.subr.bf16.mxu0 %v2197_v20  ;;  %1160 = vmatprep.subr.bf16.mxu1 %v2199_v21  ;;  %v65_v59 = vrot.slane %v51_v54, %v2674_v49  ;;  %v66_v60 = vcombine.high %v58_v55, %v58_v55  ;;  %v73_v61 = vsel %vm72_vm0, %v58_v55, 0.0  ;;  %v2250_v15 = vld [vmem:[%s3186_s3 + $0x1a8] ss:$16 sps:$4 sm:$0xff]   ;;  %v2251_v20 = vld [vmem:[%s3186_s3 + $0x1c4] ss:$16 sps:$4 sm:$0xff]   ;;  %v2759_v54 = vsub.s32 2, %v2656_v43 }
  0x15   :  { %v74_v62 = vrot.slane %v73_v61, 4  ;;  %v2253_v21 = vld [vmem:[%s3186_s3 + $0x1cc] ss:$16 sps:$4 sm:$0xff]   ;;  %v2261_v38 = vld [vmem:[%s3186_s3 + $0x1e0] ss:$16 sps:$4 sm:$0xff]  }
  0x16   :  { %v67_v1 = vcombine.high %v65_v59, %v65_v59  ;;  %v80_v2 = vsel %vm72_vm0, %v66_v60, 0.0  ;;  %v87_v3 = vsel %vm72_vm0, %v65_v59, 0.0 }
  0x17   :  { %1079 = vmatpush1.bf16.msra.mxu0 %v2201_v22  ;;  %1161 = vmatpush1.bf16.msra.mxu1 %v2202_v23  ;;  %v75_v5 = vadd.f32 %v74_v62, %v73_v61  ;;  %v81_v6 = vrot.slane %v80_v2, 4  ;;  %v88_v7 = vrot.slane %v87_v3, 4 }
  0x18   :  { %1080 = vmatprep.subr.bf16.mxu0 %v2203_v24  ;;  %1162 = vmatprep.subr.bf16.mxu1 %v2205_v25  ;;  %v94_v9 = vsel %vm72_vm0, %v67_v1, 0.0 }
  0x19   :  { %v76_v10 = vrot.slane %v75_v5, 2  ;;  %v82_v11 = vadd.f32 %v81_v6, %v80_v2  ;;  %v89_v12 = vadd.f32 %v88_v7, %v87_v3  ;;  %v95_v13 = vrot.slane %v94_v9, 4 }
  0x1b   :  { %1081 = vmatpush1.bf16.msra.mxu0 %v2207_v26  ;;  %1163 = vmatpush1.bf16.msra.mxu1 %v2208_v27  ;;  %v77_v16 = vadd.f32 %v76_v10, %v75_v5  ;;  %v83_v17 = vrot.slane %v82_v11, 2  ;;  %v90_v18 = vrot.slane %v89_v12, 2  ;;  %v96_v19 = vadd.f32 %v95_v13, %v94_v9  ;;  %v2255_v26 = vld [vmem:[%s3186_s3 + $0x1c0] ss:$16 sps:$4 sm:$0xff]   ;;  %v2256_v27 = vld [vmem:[%s3186_s3 + $0x1c8] ss:$16 sps:$4 sm:$0xff]  }
  0x1c   :  { %1082 = vmatprep.subr.bf16.mxu0 %v2209_v28  ;;  %1164 = vmatprep.subr.bf16.mxu1 %v2211_v29 }
  0x1d   :  { %v78_v22 = vrot.slane %v77_v16, 1  ;;  %v84_v23 = vadd.f32 %v83_v17, %v82_v11  ;;  %v91_v24 = vadd.f32 %v90_v18, %v89_v12  ;;  %v97_v25 = vrot.slane %v96_v19, 2 }
  0x1f   :  { %1083 = vmatpush1.bf16.msra.mxu0 %v2213_v30  ;;  %1165 = vmatpush1.bf16.msra.mxu1 %v2214_v31  ;;  %v79_v28 = vadd.f32 %v78_v22, %v77_v16  ;;  %v85_v29 = vrot.slane %v84_v23, 1  ;;  %v92_v30 = vrot.slane %v91_v24, 1  ;;  %v98_v31 = vadd.f32 %v97_v25, %v96_v19 }
  0x20   :  { %1084 = vmatprep.subr.bf16.mxu0 %v2215_v32  ;;  %1166 = vmatprep.subr.bf16.mxu1 %v2217_v33  ;;  %v2257_v32 = vld [vmem:[%s3186_s3 + $0x1e4] ss:$16 sps:$4 sm:$0xff]   ;;  %v2259_v33 = vld [vmem:[%s3186_s3 + $0x1ec] ss:$16 sps:$4 sm:$0xff]  }
  0x21   :  { %v99_v36 = vrot.slane %v98_v31, 1  ;;  %v102_v37 = vmul.f32 0.5, %v79_v28 }
  0x23   :  { %1085 = vmatpush1.bf16.msra.mxu0 %v2219_v34  ;;  %1167 = vmatpush1.bf16.msra.mxu1 %v2220_v35  ;;  %v86_v34 = vadd.f32 %v85_v29, %v84_v23  ;;  %v93_v35 = vadd.f32 %v92_v30, %v91_v24  ;;  %v2785_v30 = vsub.s32 0, %v2656_v43 }
  0x24   :  { %1086 = vmatprep.subr.bf16.mxu0 %v2221_v39  ;;  %1168 = vmatprep.subr.bf16.mxu1 %v2223_v40  ;;  %v2262_v39 = vld [vmem:[%s3186_s3 + $0x1e8] ss:$16 sps:$4 sm:$0xff]   ;;  %v100_v40 = vadd.f32 %v99_v36, %v98_v31 }
  0x25   :  { %v104_v42 = vmul.f32 0.5, %v93_v35 }
  0x27   :  { %1087 = vmatpush1.bf16.msra.mxu0 %v2225_v41  ;;  %1169 = vmatpush1.bf16.msra.mxu1 %v2226_v44  ;;  %v103_v41 = vmul.f32 0.5, %v86_v34  ;;  %v2266_v44 = vld [vmem:[%s3186_s3 + $0x204] ss:$16 sps:$4 sm:$0xff]  }
  0x28   :  { %1088 = vmatprep.subr.bf16.mxu0 %v2227_v45  ;;  %1170 = vmatprep.subr.bf16.mxu1 %v2229_v46  ;;  %v2269_v45 = vld [vmem:[%s3186_s3 + $0x20c] ss:$16 sps:$4 sm:$0xff]   ;;  %v105_v46 = vmul.f32 0.5, %v100_v40  ;;  %v2789_v40 = vsub.s32 3, %v2656_v43 }
  0x2b   :  { %1089 = vmatpush1.bf16.msra.mxu0 %v2231_v47  ;;  %1171 = vmatpush1.bf16.msra.mxu1 %v2232_v48  ;;  %v110_v47 = vcombine.low %v102_v37, %v103_v41  ;;  %v111_v48 = vcombine.low %v104_v42, %v105_v46 }
  0x2c   :  { %1090 = vmatprep.subr.bf16.mxu0 %v2233_v50  ;;  %1172 = vmatprep.subr.bf16.mxu1 %v2235_v51 }
  0x2d   :  { %v118_v50 = vrot.slane %v110_v47, %v2674_v49  ;;  %v125_v51 = vrot.slane %v111_v48, %v2674_v49 }
  0x2f   :  { %1091 = vmatpush1.bf16.msra.mxu0 %v2237_v53  ;;  %1173 = vmatpush1.bf16.msra.mxu1 %v2238_v56  ;;  %v126_v53 = vcombine.low %v118_v50, %v125_v51 }
  0x30   :  { %1092 = vmatprep.subr.bf16.mxu0 %v2239_v57  ;;  %1174 = vmatprep.subr.bf16.mxu1 %v2241_v58  ;;  %v2765_v57 = vld [vmem:[%s3184_s1] sm:$0xf] }
  0x31   :  { %v128_v55 = vsub.f32 %v2685_v52, %v126_v53  ;;  %v197_v59 = vrot.slane %v2765_v57, %v2759_v54  ;;  %v189_v41 = vrot.slane %v2765_v57, %v2785_v30 }
  0x33   :  { %1093 = vmatpush1.bf16.msra.mxu0 %v2243_v63  ;;  %1175 = vmatpush1.bf16.msra.mxu1 %v2244_v0  ;;  %v129_v56 = vmul.f32 %v128_v55, %v128_v55  ;;  %v207_v58 = vcombine.high %v128_v55, %v128_v55 }
  0x34   :  { %1094 = vmatprep.subr.bf16.mxu0 %v2245_v4  ;;  %1176 = vmatprep.subr.bf16.mxu1 %v2247_v8 }
  0x35   :  { %v131_v60 = vcombine.high %v129_v56, %v129_v56  ;;  %v138_v61 = vrot.slane %v129_v56, %v2674_v49  ;;  %v2771_v62 = vrot.slane %v207_v58, %v2674_v49 }
  0x37   :  { %1095 = vmatpush1.bf16.msra.mxu0 %v2249_v14  ;;  %1177 = vmatpush1.bf16.msra.mxu1 %v2250_v15  ;;  %v145_v63 = vrot.slane %v131_v60, %v2674_v49  ;;  %v146_v0 = vcombine.high %v138_v61, %v138_v61  ;;  %v152_v52 = vsel %vm72_vm0, %v138_v61, 0.0  ;;  %v2776_v2 = vmul.f32 %v2771_v62, %v197_v59 }
  0x38   :  { %1096 = vmatprep.subr.bf16.mxu0 %v2251_v20  ;;  %1178 = vmatprep.subr.bf16.mxu1 %v2253_v21  ;;  %v153_v1 = vrot.slane %v152_v52, 4  ;;  %v223_v48 = vcombine.high %v2771_v62, %v2771_v62 }
  0x39   :  { %v147_v3 = vcombine.high %v145_v63, %v145_v63  ;;  %v159_v4 = vsel %vm72_vm0, %v146_v0, 0.0  ;;  %v166_v5 = vsel %vm72_vm0, %v145_v63, 0.0 }
  0x3a   :  { %v160_v6 = vrot.slane %v159_v4, 4  ;;  %v167_v7 = vrot.slane %v166_v5, 4  ;;  %v154_v8 = vadd.f32 %v153_v1, %v152_v52 }
  0x3b   :  { %1097 = vmatpush1.bf16.msra.mxu0 %v2255_v26  ;;  %1179 = vmatpush1.bf16.msra.mxu1 %v2256_v27  ;;  %v173_v9 = vsel %vm72_vm0, %v147_v3, 0.0  ;;  %v2782_v27 = vsub.s32 1, %v2656_v43  ;;  %v201_v43 = vrot.slane %v2765_v57, %v2789_v40 }
  0x3c   :  { %1098 = vmatprep.subr.bf16.mxu0 %v2257_v32  ;;  %1180 = vmatprep.subr.bf16.mxu1 %v2259_v33  ;;  %v161_v10 = vadd.f32 %v160_v6, %v159_v4  ;;  %v168_v11 = vadd.f32 %v167_v7, %v166_v5  ;;  %v155_v12 = vrot.slane %v154_v8, 2  ;;  %v174_v13 = vrot.slane %v173_v9, 4  ;;  %v2264_v7 = vld [vmem:[%s3186_s3 + $0x200] ss:$16 sps:$4 sm:$0xff]  }
  0x3d   :  { %v231_v59 = vmul.f32 %v223_v48, %v201_v43 }
  0x3e   :  { %v162_v14 = vrot.slane %v161_v10, 2  ;;  %v156_v15 = vadd.f32 %v155_v12, %v154_v8  ;;  %v169_v16 = vrot.slane %v168_v11, 2  ;;  %v175_v17 = vadd.f32 %v174_v13, %v173_v9  ;;  %v2267_v8 = vld [vmem:[%s3186_s3 + $0x208] ss:$16 sps:$4 sm:$0xff]  }
  0x3f   :  { %1099 = vmatpush1.bf16.msra.mxu0 %v2261_v38  ;;  %1181 = vmatpush1.bf16.msra.mxu1 %v2262_v39  ;;  %v214_v38 = vrot.slane %v128_v55, %v2674_v49 }
  0x40   :  { %1109 = vmatprep.subr.bf16.mxu0 %v2266_v44  ;;  %1191 = vmatprep.subr.bf16.mxu1 %v2269_v45  ;;  %v163_v18 = vadd.f32 %v162_v14, %v161_v10  ;;  %v157_v19 = vrot.slane %v156_v15, 1  ;;  %v170_v20 = vadd.f32 %v169_v16, %v168_v11  ;;  %v176_v21 = vrot.slane %v175_v17, 2  ;;  %v244_v44 = vld [vmem:[%s3185_s2] sm:$0xf] }
  0x41   :  { %v193_v45 = vrot.slane %v2765_v57, %v2782_v27  ;;  %v222_v46 = vcombine.high %v214_v38, %v214_v38  ;;  %v228_v47 = vmul.f32 %v214_v38, %v189_v41  ;;  %v249_v51 = vrot.slane %v244_v44, %v2785_v30 }
  0x42   :  { %v164_v22 = vrot.slane %v163_v18, 1  ;;  %v158_v23 = vadd.f32 %v157_v19, %v156_v15  ;;  %v171_v24 = vrot.slane %v170_v20, 1  ;;  %v177_v25 = vadd.f32 %v176_v21, %v175_v17 }
  0x43   :  { %v229_v50 = vmul.f32 %v222_v46, %v193_v45  ;;  %v253_v55 = vrot.slane %v244_v44, %v2782_v27  ;;  %v257_v60 = vrot.slane %v244_v44, %v2759_v54  ;;  %v261_v52 = vrot.slane %v244_v44, %v2789_v40 }
  0x44   :  { %v165_v26 = vadd.f32 %v164_v22, %v163_v18  ;;  %v180_v28 = vmul.f32 0.5, %v158_v23  ;;  %v172_v29 = vadd.f32 %v171_v24, %v170_v20  ;;  %v178_v31 = vrot.slane %v177_v25, 1 }
  0x46   :  { %v181_v32 = vmul.f32 0.5, %v165_v26  ;;  %v232_v33 = vadd.f32 1e-05, %v180_v28  ;;  %v182_v34 = vmul.f32 0.5, %v172_v29  ;;  %v179_v35 = vadd.f32 %v178_v31, %v177_v25 }
  0x48   :  { %v233_v36 = vadd.f32 1e-05, %v181_v32  ;;  %2392 = vrsqrt.f32 %v232_v33  ;;  %v234_v37 = vadd.f32 1e-05, %v182_v34  ;;  %v183_v39 = vmul.f32 0.5, %v179_v35 }
  0x4a   :  { %2394 = vrsqrt.f32 %v233_v36  ;;  %v235_v42 = vadd.f32 1e-05, %v183_v39 }
  0x4b   :  { %2396 = vrsqrt.f32 %v234_v37 }
  0x4c   :  { %2398 = vrsqrt.f32 %v235_v42 }
  0x52   :  { %v2393_v53 = vpop.eup %2392 }
  0x53   :  { %v240_v56 = vmul.f32 %v2393_v53, %v228_v47 }
  0x54   :  { %v2395_v58 = vpop.eup %2394 }
  0x55   :  { %v2397_v61 = vpop.eup %2396  ;;  %v241_v63 = vmul.f32 %v2395_v58, %v229_v50  ;;  %v266_v0 = vadd.f32 %v249_v51, %v240_v56 }
  0x56   :  { %v242_v57 = vmul.f32 %v2397_v61, %v2776_v2  ;;  %v2399_v1 = vpop.eup %2398 }
  0x57   :  { %v267_v62 = vadd.f32 %v253_v55, %v241_v63  ;;  %v270_v3 = vmax.f32 %v266_v0, 0.0  ;;  %v243_v4 = vmul.f32 %v2399_v1, %v231_v59 }
  0x58   :  { %v2807_v5 = vadd.f32 %v257_v60, %v242_v57 }
  0x59   :  { %v271_v6 = vmax.f32 %v267_v62, 0.0  ;;  %v274_v9 = vpack.c.bf16 %v270_v3, %v270_v3  ;;  %v269_v10 = vadd.f32 %v261_v52, %v243_v4 }
  0x5b   :  { %v275_v11 = vpack.c.bf16 %v271_v6, %v271_v6 }
  0x5c   :  { %21 = vsyncpa [#allocation5], 0  ;;  %v2272_v2 = vld [vmem:[%s3186_s3 + $0x224] ss:$16 sps:$4 sm:$0xff]   ;;  %v2275_v12 = vld [vmem:[%s3186_s3 + $0x22c] ss:$16 sps:$4 sm:$0xff]  }
  0x5d   :  { %v273_v13 = vmax.f32 %v269_v10, 0.0  ;;  %1100 = vmatprep.mubr.bf16.mxu0 %v275_v11  ;;  %1182 = vmatprep.mubr.bf16.mxu1 %v275_v11  ;;  %v2270_v15 = vld [vmem:[%s3186_s3 + $0x220] ss:$16 sps:$4 sm:$0xff]   ;;  %v2273_v16 = vld [vmem:[%s3186_s3 + $0x228] ss:$16 sps:$4 sm:$0xff]   ;;  %vm2460_vm1 = vmmov 0  }
  0x5e   :  { %1101 = vmatmul.mubr.bf16.vlgmr.msra.gmra.mrb[0].mxu0 %v274_v9  ;;  %1183 = vmatmul.mubr.bf16.vlgmr.msra.gmra.mrb[0].mxu1 %v274_v9  ;;  %v2278_v17 = vld [vmem:[%s3186_s3 + $0x244] ss:$16 sps:$4 sm:$0xff]   ;;  %v2281_v18 = vld [vmem:[%s3186_s3 + $0x24c] ss:$16 sps:$4 sm:$0xff]   ;;  %v2276_v19 = vld [vmem:[%s3186_s3 + $0x240] ss:$16 sps:$4 sm:$0xff]  }
  0x5f   :  { %v277_v14 = vpack.c.bf16 %v273_v13, %v273_v13  ;;  %1110 = vmatpush1.bf16.msra.mxu0 %v2264_v7  ;;  %1192 = vmatpush1.bf16.msra.mxu1 %v2267_v8  ;;  %v2279_v20 = vld [vmem:[%s3186_s3 + $0x248] ss:$16 sps:$4 sm:$0xff]   ;;  %v2284_v21 = vld [vmem:[%s3186_s3 + $0x264] ss:$16 sps:$4 sm:$0xff]   ;;  %v2287_v22 = vld [vmem:[%s3186_s3 + $0x26c] ss:$16 sps:$4 sm:$0xff]  }
  0x60   :  { %1111 = vmatprep.subr.bf16.mxu0 %v2272_v2  ;;  %1193 = vmatprep.subr.bf16.mxu1 %v2275_v12  ;;  %v2282_v23 = vld [vmem:[%s3186_s3 + $0x260] ss:$16 sps:$4 sm:$0xff]   ;;  %v2285_v24 = vld [vmem:[%s3186_s3 + $0x268] ss:$16 sps:$4 sm:$0xff]   ;;  %v2290_v25 = vld [vmem:[%s3186_s3 + $0x284] ss:$16 sps:$4 sm:$0xff]  }
  0x61   :  { %1141 = vmatprep.mubr.bf16.mxu0 %v277_v14  ;;  %1223 = vmatprep.mubr.bf16.mxu1 %v277_v14  ;;  %v2293_v26 = vld [vmem:[%s3186_s3 + $0x28c] ss:$16 sps:$4 sm:$0xff]   ;;  %v2288_v28 = vld [vmem:[%s3186_s3 + $0x280] ss:$16 sps:$4 sm:$0xff]   ;;  %v2291_v29 = vld [vmem:[%s3186_s3 + $0x288] ss:$16 sps:$4 sm:$0xff]  }
  0x62   :  { %v2296_v31 = vld [vmem:[%s3186_s3 + $0x2a4] ss:$16 sps:$4 sm:$0xff]   ;;  %v2299_v32 = vld [vmem:[%s3186_s3 + $0x2ac] ss:$16 sps:$4 sm:$0xff]   ;;  %v2294_v33 = vld [vmem:[%s3186_s3 + $0x2a0] ss:$16 sps:$4 sm:$0xff]  }
  0x63   :  { %1112 = vmatpush1.bf16.msra.mxu0 %v2270_v15  ;;  %1194 = vmatpush1.bf16.msra.mxu1 %v2273_v16  ;;  %v2297_v34 = vld [vmem:[%s3186_s3 + $0x2a8] ss:$16 sps:$4 sm:$0xff]   ;;  %v2302_v35 = vld [vmem:[%s3186_s3 + $0x2c4] ss:$16 sps:$4 sm:$0xff]   ;;  %v2305_v36 = vld [vmem:[%s3186_s3 + $0x2cc] ss:$16 sps:$4 sm:$0xff]  }
  0x64   :  { %1113 = vmatprep.subr.bf16.mxu0 %v2278_v17  ;;  %1195 = vmatprep.subr.bf16.mxu1 %v2281_v18  ;;  %v2300_v37 = vld [vmem:[%s3186_s3 + $0x2c0] ss:$16 sps:$4 sm:$0xff]   ;;  %v2303_v38 = vld [vmem:[%s3186_s3 + $0x2c8] ss:$16 sps:$4 sm:$0xff]   ;;  %v2308_v39 = vld [vmem:[%s3186_s3 + $0x2e4] ss:$16 sps:$4 sm:$0xff]  }
  0x65   :  { %v2311_v41 = vld [vmem:[%s3186_s3 + $0x2ec] ss:$16 sps:$4 sm:$0xff]   ;;  %v2306_v42 = vld [vmem:[%s3186_s3 + $0x2e0] ss:$16 sps:$4 sm:$0xff]   ;;  %v2309_v44 = vld [vmem:[%s3186_s3 + $0x2e8] ss:$16 sps:$4 sm:$0xff]  }
  0x66   :  { %v2314_v45 = vld [vmem:[%s3186_s3 + $0x304] ss:$16 sps:$4 sm:$0xff]   ;;  %v2317_v46 = vld [vmem:[%s3186_s3 + $0x30c] ss:$16 sps:$4 sm:$0xff]   ;;  %v2312_v47 = vld [vmem:[%s3186_s3 + $0x300] ss:$16 sps:$4 sm:$0xff]  }
  0x67   :  { %1114 = vmatpush1.bf16.msra.mxu0 %v2276_v19  ;;  %1196 = vmatpush1.bf16.msra.mxu1 %v2279_v20  ;;  %v2315_v43 = vld [vmem:[%s3186_s3 + $0x308] ss:$16 sps:$4 sm:$0xff]   ;;  %v2320_v48 = vld [vmem:[%s3186_s3 + $0x324] ss:$16 sps:$4 sm:$0xff]   ;;  %v2323_v50 = vld [vmem:[%s3186_s3 + $0x32c] ss:$16 sps:$4 sm:$0xff]  }
  0x68   :  { %1115 = vmatprep.subr.bf16.mxu0 %v2284_v21  ;;  %1197 = vmatprep.subr.bf16.mxu1 %v2287_v22  ;;  %v2318_v51 = vld [vmem:[%s3186_s3 + $0x320] ss:$16 sps:$4 sm:$0xff]   ;;  %v2321_v53 = vld [vmem:[%s3186_s3 + $0x328] ss:$16 sps:$4 sm:$0xff]   ;;  %v2326_v55 = vld [vmem:[%s3186_s3 + $0x344] ss:$16 sps:$4 sm:$0xff]  }
  0x69   :  { %v2329_v56 = vld [vmem:[%s3186_s3 + $0x34c] ss:$16 sps:$4 sm:$0xff]   ;;  %v2324_v58 = vld [vmem:[%s3186_s3 + $0x340] ss:$16 sps:$4 sm:$0xff]   ;;  %v2327_v59 = vld [vmem:[%s3186_s3 + $0x348] ss:$16 sps:$4 sm:$0xff]  }
  0x6a   :  { %v2332_v60 = vld [vmem:[%s3186_s3 + $0x364] ss:$16 sps:$4 sm:$0xff]   ;;  %v2335_v61 = vld [vmem:[%s3186_s3 + $0x36c] ss:$16 sps:$4 sm:$0xff]   ;;  %v2330_v63 = vld [vmem:[%s3186_s3 + $0x360] ss:$16 sps:$4 sm:$0xff]  }
  0x6b   :  { %1116 = vmatpush1.bf16.msra.mxu0 %v2282_v23  ;;  %1198 = vmatpush1.bf16.msra.mxu1 %v2285_v24  ;;  %v2333_v0 = vld [vmem:[%s3186_s3 + $0x368] ss:$16 sps:$4 sm:$0xff]   ;;  %v2338_v52 = vld [vmem:[%s3186_s3 + $0x384] ss:$16 sps:$4 sm:$0xff]   ;;  %v2341_v57 = vld [vmem:[%s3186_s3 + $0x38c] ss:$16 sps:$4 sm:$0xff]  }
  0x6c   :  { %1117 = vmatprep.subr.bf16.mxu0 %v2290_v25  ;;  %1199 = vmatprep.subr.bf16.mxu1 %v2293_v26  ;;  %v2336_v1 = vld [vmem:[%s3186_s3 + $0x380] ss:$16 sps:$4 sm:$0xff]   ;;  %v2339_v62 = vld [vmem:[%s3186_s3 + $0x388] ss:$16 sps:$4 sm:$0xff]   ;;  %v2344_v3 = vld [vmem:[%s3186_s3 + $0x3a4] ss:$16 sps:$4 sm:$0xff]  }
  0x6d   :  { %v2347_v4 = vld [vmem:[%s3186_s3 + $0x3ac] ss:$16 sps:$4 sm:$0xff]   ;;  %v2342_v6 = vld [vmem:[%s3186_s3 + $0x3a0] ss:$16 sps:$4 sm:$0xff]   ;;  %v2345_v7 = vld [vmem:[%s3186_s3 + $0x3a8] ss:$16 sps:$4 sm:$0xff]  }
  0x6e   :  { %v2350_v8 = vld [vmem:[%s3186_s3 + $0x3c4] ss:$16 sps:$4 sm:$0xff]   ;;  %v2353_v9 = vld [vmem:[%s3186_s3 + $0x3cc] ss:$16 sps:$4 sm:$0xff]   ;;  %v2348_v10 = vld [vmem:[%s3186_s3 + $0x3c0] ss:$16 sps:$4 sm:$0xff]  }
  0x6f   :  { %1118 = vmatpush1.bf16.msra.mxu0 %v2288_v28  ;;  %1200 = vmatpush1.bf16.msra.mxu1 %v2291_v29  ;;  %v2351_v11 = vld [vmem:[%s3186_s3 + $0x3c8] ss:$16 sps:$4 sm:$0xff]   ;;  %v2356_v2 = vld [vmem:[%s3186_s3 + $0x3e4] ss:$16 sps:$4 sm:$0xff]   ;;  %v2359_v12 = vld [vmem:[%s3186_s3 + $0x3ec] ss:$16 sps:$4 sm:$0xff]  }
  0x70   :  { %1119 = vmatprep.subr.bf16.mxu0 %v2296_v31  ;;  %1201 = vmatprep.subr.bf16.mxu1 %v2299_v32  ;;  %v272_v13 = vmax.f32 %v2807_v5, 0.0  ;;  %v2354_v14 = vld [vmem:[%s3186_s3 + $0x3e0] ss:$16 sps:$4 sm:$0xff]   ;;  %v2357_v15 = vld [vmem:[%s3186_s3 + $0x3e8] ss:$16 sps:$4 sm:$0xff]   ;;  %vm1742_vm2 = vcmask 517120  }
  0x71   :  { %v2360_v5 = vld [vmem:[%s3190_s7 + $0x40] sm:$0xff]   ;;  %v2364_v20 = vld [vmem:[%s3190_s7 + $0x48] sm:$0xff]   ;;  %v2368_v24 = vld [vmem:[%s3190_s7 + $0x50] sm:$0xff]   ;;  %vm1796_vm3 = vcmask 523264  }
  0x72   :  { %v276_v16 = vpack.c.bf16 %v272_v13, %v272_v13  ;;  %v2361_v17 = vld [vmem:[%s3190_s7 + $0xc0] sm:$0xff]   ;;  %v2365_v21 = vld [vmem:[%s3190_s7 + $0xc8] sm:$0xff]   ;;  %v2369_v25 = vld [vmem:[%s3190_s7 + $0xd0] sm:$0xff]  }
  0x73   :  { %1120 = vmatpush1.bf16.msra.mxu0 %v2294_v33  ;;  %1202 = vmatpush1.bf16.msra.mxu1 %v2297_v34  ;;  %v2362_v18 = vld [vmem:[%s3190_s7] sm:$0xff]   ;;  %v2366_v22 = vld [vmem:[%s3190_s7 + $0x8] sm:$0xff]   ;;  %v2370_v26 = vld [vmem:[%s3190_s7 + $0x10] sm:$0xff]  }
  0x74   :  { %1121 = vmatprep.subr.bf16.mxu0 %v2302_v35  ;;  %1203 = vmatprep.subr.bf16.mxu1 %v2305_v36  ;;  %v2363_v19 = vld [vmem:[%s3190_s7 + $0x80] sm:$0xff]   ;;  %v2367_v23 = vld [vmem:[%s3190_s7 + $0x88] sm:$0xff]   ;;  %v2371_v28 = vld [vmem:[%s3190_s7 + $0x90] sm:$0xff]  }
  0x75   :  { %v2372_v29 = vld [vmem:[%s3190_s7 + $0x58] sm:$0xff]   ;;  %v2376_v34 = vld [vmem:[%s3190_s7 + $0x60] sm:$0xff]  }
  0x76   :  { %v2373_v31 = vld [vmem:[%s3190_s7 + $0xd8] sm:$0xff]   ;;  %v2377_v35 = vld [vmem:[%s3190_s7 + $0xe0] sm:$0xff]  }
  0x77   :  { %1122 = vmatpush1.bf16.msra.mxu0 %v2300_v37  ;;  %1204 = vmatpush1.bf16.msra.mxu1 %v2303_v38  ;;  %v2374_v32 = vld [vmem:[%s3190_s7 + $0x18] sm:$0xff]   ;;  %v2378_v36 = vld [vmem:[%s3190_s7 + $0x20] sm:$0xff]   ;;  %v2380_v38 = vld [vmem:[%s3190_s7 + $0x68] sm:$0xff]  }
  0x78   :  { %1123 = vmatprep.subr.bf16.mxu0 %v2308_v39  ;;  %1205 = vmatprep.subr.bf16.mxu1 %v2311_v41  ;;  %v2375_v33 = vld [vmem:[%s3190_s7 + $0x98] sm:$0xff]   ;;  %v2379_v37 = vld [vmem:[%s3190_s7 + $0xa0] sm:$0xff]   ;;  %v2381_v39 = vld [vmem:[%s3190_s7 + $0xe8] sm:$0xff]  }
  0x79   :  { %v2382_v41 = vld [vmem:[%s3190_s7 + $0x28] sm:$0xff]  }
  0x7b   :  { %1124 = vmatpush1.bf16.msra.mxu0 %v2306_v42  ;;  %1206 = vmatpush1.bf16.msra.mxu1 %v2309_v44  ;;  %v2383_v42 = vld [vmem:[%s3190_s7 + $0xa8] sm:$0xff]   ;;  %v2384_v44 = vld [vmem:[%s3190_s7 + $0x70] sm:$0xff]  }
  0x7c   :  { %1125 = vmatprep.subr.bf16.mxu0 %v2314_v45  ;;  %1207 = vmatprep.subr.bf16.mxu1 %v2317_v46  ;;  %v2385_v45 = vld [vmem:[%s3190_s7 + $0xf0] sm:$0xff]  }
  0x7d   :  { %v2386_v46 = vld [vmem:[%s3190_s7 + $0x30] sm:$0xff]  }
  0x7f   :  { %1126 = vmatpush1.bf16.msra.mxu0 %v2312_v47  ;;  %1208 = vmatpush1.bf16.msra.mxu1 %v2315_v43  ;;  %v2387_v47 = vld [vmem:[%s3190_s7 + $0xb0] sm:$0xff]   ;;  %v2388_v43 = vld [vmem:[%s3190_s7 + $0x78] sm:$0xff]  }
  0x80   :  { %1127 = vmatprep.subr.bf16.mxu0 %v2320_v48  ;;  %1209 = vmatprep.subr.bf16.mxu1 %v2323_v50  ;;  %v2389_v48 = vld [vmem:[%s3190_s7 + $0xf8] sm:$0xff]  }
  0x81   :  { %v2390_v50 = vld [vmem:[%s3190_s7 + $0x38] sm:$0xff]  }
  0x83   :  { %1128 = vmatpush1.bf16.msra.mxu0 %v2318_v51  ;;  %1210 = vmatpush1.bf16.msra.mxu1 %v2321_v53  ;;  %v2391_v51 = vld [vmem:[%s3190_s7 + $0xb8] sm:$0xff]   ;;  %v406_v53 = vld [vmem:[%s3187_s4] sm:$0xf]  ;;  %s2462_s4 = smov [#allocation2]  }
  0x84   :  { %1129 = vmatprep.subr.bf16.mxu0 %v2326_v55  ;;  %1211 = vmatprep.subr.bf16.mxu1 %v2329_v56  ;;  %v411_v55 = vrot.slane %v406_v53, %v2785_v30  ;;  %v419_v56 = vrot.slane %v406_v53, %v2759_v54  ;;  %s1878_s7 = sshll.u32 %s2462_s4, 4  ;;  %s1879_s7 = int_to_ptr.vmem [resolvable:$true] %s1878_s7 }
  0x85   :  { %s2410_s3 = scalar_lea.vmem %s1879_s7, 128  ;;  %p2415_p1 = scmp.lt.s32.totalorder %s1879_s7, %s1879_s7 }
  0x86   :  { %p2411_p0 = scmp.ne.s32.totalorder %s1879_s7, %s2410_s3  ;;  %p2416_p2 = scmp.lt.s32.totalorder %s2410_s3, %s2410_s3 }
  0x87   :  { %1130 = vmatpush1.bf16.msra.mxu0 %v2324_v58  ;;  %1212 = vmatpush1.bf16.msra.mxu1 %v2327_v59  ;;  %v415_v58 = vrot.slane %v406_v53, %v2782_v27  ;;  %v423_v59 = vrot.slane %v406_v53, %v2789_v40 }
  0x88   :  { %1131 = vmatprep.subr.bf16.mxu0 %v2332_v60  ;;  %1213 = vmatprep.subr.bf16.mxu1 %v2335_v61  ;;  %p2417_p3 = por %p2416_p2, %p2415_p1 }
  0x8a   :  { %p2418_p4 = pnand %p2417_p3, %p2411_p0 }
  0x8b   :  { %1132 = vmatpush1.bf16.msra.mxu0 %v2330_v63  ;;  %1214 = vmatpush1.bf16.msra.mxu1 %v2333_v0 }
  0x8c   :  { %1133 = vmatprep.subr.bf16.mxu0 %v2338_v52  ;;  %1215 = vmatprep.subr.bf16.mxu1 %v2341_v57 }
  0x8f   :  { %1134 = vmatpush1.bf16.msra.mxu0 %v2336_v1  ;;  %1216 = vmatpush1.bf16.msra.mxu1 %v2339_v62 }
  0x90   :  { %1135 = vmatprep.subr.bf16.mxu0 %v2344_v3  ;;  %1217 = vmatprep.subr.bf16.mxu1 %v2347_v4 }
  0x93   :  { %1136 = vmatpush1.bf16.msra.mxu0 %v2342_v6  ;;  %1218 = vmatpush1.bf16.msra.mxu1 %v2345_v7 }
  0x94   :  { %1137 = vmatprep.subr.bf16.mxu0 %v2350_v8  ;;  %1219 = vmatprep.subr.bf16.mxu1 %v2353_v9 }
  0x97   :  { %1138 = vmatpush1.bf16.msra.mxu0 %v2348_v10  ;;  %1220 = vmatpush1.bf16.msra.mxu1 %v2351_v11 }
  0x98   :  { %1139 = vmatprep.subr.bf16.mxu0 %v2356_v2  ;;  %1221 = vmatprep.subr.bf16.mxu1 %v2359_v12 }
  0x9b   :  { %1140 = vmatpush1.bf16.msra.mxu0 %v2354_v14  ;;  %1222 = vmatpush1.bf16.msra.mxu1 %v2357_v15 }
  0x9c   :  { %2065 = vmatprep.subr.bf16.mxu0 %v2360_v5  ;;  %2087 = vmatprep.subr.bf16.mxu1 %v2361_v17 }
  0x9e   :  { %1142 = vmatmul.mubr.bf16.vlgmr.msra.gmra.mrb[0].mxu0 %v276_v16  ;;  %1224 = vmatmul.mubr.bf16.vlgmr.msra.gmra.mrb[0].mxu1 %v276_v16 }
  0x9f   :  { %2066 = vmatpush3.bf16.msra.mxu0 %v2362_v18  ;;  %2088 = vmatpush3.bf16.msra.mxu1 %v2363_v19 }
  0xa0   :  { %2067 = vmatprep.subr.bf16.mxu0 %v2364_v20  ;;  %2089 = vmatprep.subr.bf16.mxu1 %v2365_v21 }
  0xa3   :  { %2068 = vmatpush3.bf16.msra.mxu0 %v2366_v22  ;;  %2090 = vmatpush3.bf16.msra.mxu1 %v2367_v23 }
  0xa4   :  { %2069 = vmatprep.subr.bf16.mxu0 %v2368_v24  ;;  %2091 = vmatprep.subr.bf16.mxu1 %v2369_v25 }
  0xa7   :  { %2070 = vmatpush3.bf16.msra.mxu0 %v2370_v26  ;;  %2092 = vmatpush3.bf16.msra.mxu1 %v2371_v28 }
  0xa8   :  { %2071 = vmatprep.subr.bf16.mxu0 %v2372_v29  ;;  %2093 = vmatprep.subr.bf16.mxu1 %v2373_v31 }
  0xab   :  { %2072 = vmatpush3.bf16.msra.mxu0 %v2374_v32  ;;  %2094 = vmatpush3.bf16.msra.mxu1 %v2375_v33 }
  0xac   :  { %2073 = vmatprep.subr.bf16.mxu0 %v2376_v34  ;;  %2095 = vmatprep.subr.bf16.mxu1 %v2377_v35 }
  0xaf   :  { %2074 = vmatpush3.bf16.msra.mxu0 %v2378_v36  ;;  %2096 = vmatpush3.bf16.msra.mxu1 %v2379_v37 }
  0xb0   :  { %2075 = vmatprep.subr.bf16.mxu0 %v2380_v38  ;;  %2097 = vmatprep.subr.bf16.mxu1 %v2381_v39 }
  0xb3   :  { %2076 = vmatpush3.bf16.msra.mxu0 %v2382_v41  ;;  %2098 = vmatpush3.bf16.msra.mxu1 %v2383_v42 }
  0xb4   :  { %2077 = vmatprep.subr.bf16.mxu0 %v2384_v44  ;;  %2099 = vmatprep.subr.bf16.mxu1 %v2385_v45 }
  0xb7   :  { %2078 = vmatpush3.bf16.msra.mxu0 %v2386_v46  ;;  %2100 = vmatpush3.bf16.msra.mxu1 %v2387_v47 }
  0xb8   :  { %2079 = vmatprep.subr.bf16.mxu0 %v2388_v43  ;;  %2101 = vmatprep.subr.bf16.mxu1 %v2389_v48 }
  0xbb   :  { %2080 = vmatpush3.bf16.msra.mxu0 %v2390_v50  ;;  %2102 = vmatpush3.bf16.msra.mxu1 %v2391_v51 }
 0x171   :  { %v1143_v60 = vpop.f32.mrb[0].mxu0  ;;  %v1225_v61 = vpop.f32.mrb[0].mxu1 }
 0x172   :  { %v2149_v63 = vadd.f32 %v1143_v60, %v411_v55  ;;  %v2151_v0 = vadd.f32 %v1225_v61, %v419_v56  ;;  %v1145_v52 = vpop.f32.mrb[1].mxu0  ;;  %v1227_v57 = vpop.f32.mrb[1].mxu1 }
 0x173   :  { %v2150_v1 = vadd.f32 %v1145_v52, %v415_v58  ;;  %v2152_v62 = vadd.f32 %v1227_v57, %v423_v59  ;;  %v1147_v3 = vpop.f32.mrb[2].mxu0  ;;  %v1229_v4 = vpop.f32.mrb[2].mxu1 }
 0x174   :  { %v1232_v6 = vsel %vm72_vm0, %v2149_v63, 0.0  ;;  %v1246_v7 = vsel %vm72_vm0, %v2151_v0, 0.0  ;;  %v1148_v8 = vpop.f32.mrb[3].mxu0  ;;  %v1230_v9 = vpop.f32.mrb[3].mxu1 }
 0x175   :  { %v1233_v10 = vrot.slane %v1232_v6, 4  ;;  %v1247_v11 = vrot.slane %v1246_v7, 4  ;;  %v1239_v2 = vsel %vm72_vm0, %v2150_v1, 0.0  ;;  %v1253_v12 = vsel %vm72_vm0, %v2152_v62, 0.0 }
 0x176   :  { %v1240_v13 = vrot.slane %v1239_v2, 4  ;;  %v1254_v14 = vrot.slane %v1253_v12, 4 }
 0x177   :  { %v1234_v15 = vadd.f32 %v1233_v10, %v1232_v6  ;;  %v1248_v16 = vadd.f32 %v1247_v11, %v1246_v7 }
 0x178   :  { %v1241_v5 = vadd.f32 %v1240_v13, %v1239_v2  ;;  %v1255_v17 = vadd.f32 %v1254_v14, %v1253_v12 }
 0x179   :  { %v1235_v18 = vrot.slane %v1234_v15, 2  ;;  %v1249_v19 = vrot.slane %v1248_v16, 2 }
 0x17a   :  { %v1242_v20 = vrot.slane %v1241_v5, 2  ;;  %v1256_v21 = vrot.slane %v1255_v17, 2 }
 0x17b   :  { %v1236_v22 = vadd.f32 %v1235_v18, %v1234_v15  ;;  %v1250_v23 = vadd.f32 %v1249_v19, %v1248_v16 }
 0x17c   :  { %v1243_v24 = vadd.f32 %v1242_v20, %v1241_v5  ;;  %v1257_v25 = vadd.f32 %v1256_v21, %v1255_v17 }
 0x17d   :  { %v1237_v26 = vrot.slane %v1236_v22, 1  ;;  %v1251_v28 = vrot.slane %v1250_v23, 1 }
 0x17e   :  { %v1244_v29 = vrot.slane %v1243_v24, 1  ;;  %v1258_v31 = vrot.slane %v1257_v25, 1 }
 0x17f   :  { %v1238_v32 = vadd.f32 %v1237_v26, %v1236_v22  ;;  %v1252_v33 = vadd.f32 %v1251_v28, %v1250_v23  ;;  %v1304_v23 = vld [vmem:[%s3188_s5] sm:$0xf] }
 0x180   :  { %v1245_v34 = vadd.f32 %v1244_v29, %v1243_v24  ;;  %v1259_v35 = vadd.f32 %v1258_v31, %v1257_v25  ;;  %v1309_v24 = vrot.slane %v1304_v23, %v2785_v30  ;;  %v1342_v25 = vld [vmem:[%s3189_s6] sm:$0xf]  ;;  %v1317_v26 = vrot.slane %v1304_v23, %v2759_v54 }
 0x181   :  { %v1260_v36 = vmul.f32 0.5, %v1238_v32  ;;  %v1262_v37 = vmul.f32 0.5, %v1252_v33  ;;  %v1313_v28 = vrot.slane %v1304_v23, %v2782_v27  ;;  %v1321_v29 = vrot.slane %v1304_v23, %v2789_v40 }
 0x182   :  { %v1261_v38 = vmul.f32 0.5, %v1245_v34  ;;  %v1263_v39 = vmul.f32 0.5, %v1259_v35  ;;  %v1347_v32 = vrot.slane %v1342_v25, %v2785_v30  ;;  %v1355_v35 = vrot.slane %v1342_v25, %v2759_v54 }
 0x183   :  { %v1264_v41 = vsub.f32 %v2149_v63, %v1260_v36  ;;  %v1266_v42 = vsub.f32 %v2151_v0, %v1262_v37 }
 0x184   :  { %v1265_v44 = vsub.f32 %v2150_v1, %v1261_v38  ;;  %v1267_v45 = vsub.f32 %v2152_v62, %v1263_v39  ;;  %v1351_v39 = vrot.slane %v1342_v25, %v2782_v27 }
 0x185   :  { %v1268_v46 = vmul.f32 %v1264_v41, %v1264_v41  ;;  %v1270_v47 = vmul.f32 %v1266_v42, %v1266_v42  ;;  %v1326_v31 = vmul.f32 %v1309_v24, %v1264_v41  ;;  %v1328_v34 = vmul.f32 %v1317_v26, %v1266_v42 }
 0x186   :  { %v1269_v43 = vmul.f32 %v1265_v44, %v1265_v44  ;;  %v1271_v48 = vmul.f32 %v1267_v45, %v1267_v45  ;;  %v1327_v38 = vmul.f32 %v1313_v28, %v1265_v44 }
 0x187   :  { %v1272_v50 = vsel %vm72_vm0, %v1268_v46, 0.0  ;;  %v1286_v51 = vsel %vm72_vm0, %v1270_v47, 0.0 }
 0x188   :  { %v1273_v53 = vrot.slane %v1272_v50, 4  ;;  %v1287_v55 = vrot.slane %v1286_v51, 4  ;;  %v1279_v56 = vsel %vm72_vm0, %v1269_v43, 0.0  ;;  %v1293_v58 = vsel %vm72_vm0, %v1271_v48, 0.0 }
 0x189   :  { %v1280_v59 = vrot.slane %v1279_v56, 4  ;;  %v1294_v60 = vrot.slane %v1293_v58, 4  ;;  %v1329_v43 = vmul.f32 %v1321_v29, %v1267_v45  ;;  %v1359_v48 = vrot.slane %v1342_v25, %v2789_v40 }
 0x18a   :  { %v1274_v61 = vadd.f32 %v1273_v53, %v1272_v50  ;;  %v1288_v63 = vadd.f32 %v1287_v55, %v1286_v51 }
 0x18b   :  { %v1281_v0 = vadd.f32 %v1280_v59, %v1279_v56  ;;  %v1295_v52 = vadd.f32 %v1294_v60, %v1293_v58 }
 0x18c   :  { %v1275_v57 = vrot.slane %v1274_v61, 2  ;;  %v1289_v1 = vrot.slane %v1288_v63, 2 }
 0x18d   :  { %v1282_v62 = vrot.slane %v1281_v0, 2  ;;  %v1296_v3 = vrot.slane %v1295_v52, 2 }
 0x18e   :  { %v1276_v4 = vadd.f32 %v1275_v57, %v1274_v61  ;;  %v1290_v6 = vadd.f32 %v1289_v1, %v1288_v63  ;;  %v1781_v57 = vld [vmem:[%s3194_s11] sm:$0xff]  ;;  %v1782_v1 = vld [vmem:[%s3194_s11 + $0x8] sm:$0xff] }
 0x18f   :  { %v1283_v7 = vadd.f32 %v1282_v62, %v1281_v0  ;;  %v1297_v8 = vadd.f32 %v1296_v3, %v1295_v52  ;;  %v2138_v62 = vpack.c.bf16 %v1782_v1, %v1781_v57  ;;  %v2459_v3 = vmov 0.0|0.0  }
 0x190   :  { %v1277_v9 = vrot.slane %v1276_v4, 1  ;;  %v1291_v10 = vrot.slane %v1290_v6, 1  ;;  %2137 = vmatprep.subr.bf16.mxu0 %v2459_v3 }
 0x191   :  { %v1284_v11 = vrot.slane %v1283_v7, 1  ;;  %v1298_v2 = vrot.slane %v1297_v8, 1 }
 0x192   :  { %v1278_v12 = vadd.f32 %v1277_v9, %v1276_v4  ;;  %v1292_v13 = vadd.f32 %v1291_v10, %v1290_v6  ;;  %v1784_v4 = vld [vmem:[%s3194_s11 + $0x18] sm:$0xff]  ;;  %v1787_v10 = vld [vmem:[%s3194_s11 + $0x30] sm:$0xff] }
 0x193   :  { %v1285_v14 = vadd.f32 %v1284_v11, %v1283_v7  ;;  %v1299_v15 = vadd.f32 %v1298_v2, %v1297_v8  ;;  %v1785_v7 = vld [vmem:[%s3194_s11 + $0x20] sm:$0xff]  ;;  %v1786_v8 = vld [vmem:[%s3194_s11 + $0x28] sm:$0xff]  ;;  %v1788_v11 = vld [vmem:[%s3194_s11 + $0x38] sm:$0xff] }
 0x194   :  { %v1300_v16 = vmul.f32 0.5, %v1278_v12  ;;  %v1302_v5 = vmul.f32 0.5, %v1292_v13  ;;  %v2144_v9 = vpack.c.bf16 %v1786_v8, %v1785_v7  ;;  %v2147_v2 = vpack.c.bf16 %v1788_v11, %v1787_v10 }
 0x195   :  { %v1301_v17 = vmul.f32 0.5, %v1285_v14  ;;  %v1303_v18 = vmul.f32 0.5, %v1299_v15  ;;  %v2461_v12 = vmov 0.0   ;;  %v2028_v15 = vld [vmem:[%s3191_s8] ss:$0 sm:$0xff] }
 0x196   :  { %v1330_v19 = vadd.f32 1e-05, %v1300_v16  ;;  %v1332_v20 = vadd.f32 1e-05, %v1302_v5 }
 0x197   :  { %v1331_v21 = vadd.f32 1e-05, %v1301_v17  ;;  %v1333_v22 = vadd.f32 1e-05, %v1303_v18 }
 0x198   :  { %2400 = vrsqrt.f32 %v1330_v19 }
 0x199   :  { %2402 = vrsqrt.f32 %v1332_v20 }
 0x19a   :  { %2404 = vrsqrt.f32 %v1331_v21 }
 0x19b   :  { %2406 = vrsqrt.f32 %v1333_v22 }
 0x1a2   :  { %v2401_v33 = vpop.eup %2400 }
 0x1a3   :  { %v2403_v36 = vpop.eup %2402  ;;  %v1338_v37 = vmul.f32 %v2401_v33, %v1326_v31 }
 0x1a4   :  { %v2405_v46 = vpop.eup %2404  ;;  %v1340_v47 = vmul.f32 %v2403_v36, %v1328_v34 }
 0x1a5   :  { %v2407_v50 = vpop.eup %2406  ;;  %v1364_v51 = vadd.f32 %v1347_v32, %v1338_v37  ;;  %v1339_v53 = vmul.f32 %v2405_v46, %v1327_v38 }
 0x1a6   :  { %v1366_v41 = vadd.f32 %v1355_v35, %v1340_v47  ;;  %v1341_v55 = vmul.f32 %v2407_v50, %v1329_v43 }
 0x1a7   :  { %v1368_v30 = vmax.f32 %v1364_v51, 0.0  ;;  %v1365_v56 = vadd.f32 %v1351_v39, %v1339_v53  ;;  %v2061_v53 = vld [vmem:[%s3192_s9] ss:$0 sm:$0xff] }
 0x1a8   :  { %v1370_v42 = vmax.f32 %v1366_v41, 0.0  ;;  %v1367_v58 = vadd.f32 %v1359_v48, %v1341_v55 }
 0x1a9   :  { %v1369_v54 = vmax.f32 %v1365_v56, 0.0  ;;  %v1395_v27 = vpack.c.bf16 %v1368_v30, %v1368_v30 }
 0x1aa   :  { %v1371_v59 = vmax.f32 %v1367_v58, 0.0  ;;  %v1397_v45 = vpack.c.bf16 %v1370_v42, %v1370_v42 }
 0x1ab   :  { %v1396_v60 = vpack.c.bf16 %v1369_v54, %v1369_v54  ;;  %v1376_v44 = vcombine.low %v1368_v30, %v1369_v54  ;;  %v2062_v30 = vld [vmem:[%s3193_s10] ss:$0 sm:$0xff] }
 0x1ac   :  { %v1398_v61 = vpack.c.bf16 %v1371_v59, %v1371_v59  ;;  %v1377_v63 = vcombine.low %v1370_v42, %v1371_v59 }
 0x1ad   :  { %1694 = vmatprep.mubr.bf16.mxu0 %v1396_v60  ;;  %v1384_v40 = vrot.slane %v1376_v44, %v2674_v49 }
 0x1ae   :  { %1734 = vmatprep.mubr.bf16.mxu1 %v1398_v61  ;;  %1695 = vmatmul.mubr.bf16.vlgmr.msra.gmra.mrb[4].mxu0 %v1395_v27  ;;  %v1391_v0 = vrot.slane %v1377_v63, %v2674_v49  ;;  %v1783_v49 = vld [vmem:[%s3194_s11 + $0x10] sm:$0xff] }
 0x1af   :  { %1735 = vmatmul.mubr.bf16.vlgmr.msra.gmra.mrb[4].mxu1 %v1397_v45  ;;  %2139 = vmatpush3.bf16.msra.mxu0 %v2138_v62  ;;  %v2141_v6 = vpack.c.bf16 %v1784_v4, %v1783_v49 }
 0x1b0   :  { %v1392_v52 = vcombine.low %v1384_v40, %v1391_v0  ;;  %2140 = vmatprep.subr.bf16.mxu0 %v2459_v3  ;;  %2134 = vmatprep.mubr.msk.f32.mxu0 %vm2460_vm1, %v2461_v12 }
 0x1b2   :  { %1394 = vst [vmem:[#allocation2] sm:$0xff] %v1392_v52 }
 0x1b3   :  { %2142 = vmatpush3.bf16.msra.mxu0 %v2141_v6 }
 0x1b4   :  { %2143 = vmatprep.subr.bf16.mxu0 %v2459_v3 }
 0x1b7   :  { %2145 = vmatpush3.bf16.msra.mxu0 %v2144_v9 }
 0x1b8   :  { %2146 = vmatprep.subr.bf16.mxu0 %v2459_v3 }
 0x1bb   :  { %2148 = vmatpush3.bf16.msra.mxu0 %v2147_v2 }
 0x281   :  { %v2081_v13 = vpop.f32.mrb[4].mxu0 }
 0x282   :  { %v2103_v14 = vpop.f32.mrb[4].mxu1  ;;  %v2082_v16 = vpop.f32.mrb[5].mxu0 }
 0x283   :  { %v2083_v5 = vadd.f32 %v2082_v16, %v2081_v13  ;;  %v2104_v17 = vpop.f32.mrb[5].mxu1  ;;  %v2084_v18 = vpop.f32.mrb[6].mxu0 }
 0x284   :  { %v2105_v19 = vadd.f32 %v2104_v17, %v2103_v14  ;;  %v2106_v20 = vpop.f32.mrb[6].mxu1  ;;  %v2085_v21 = vpop.f32.mrb[7].mxu0 }
 0x285   :  { %v1697_v22 = vadd.f32 %v2083_v5, %v2028_v15  ;;  %v2107_v23 = vpop.f32.mrb[7].mxu1 }
 0x287   :  { %v1737_v24 = vadd.f32 %v2105_v19, %v1697_v22 }
 0x289   :  { %v1743_v25 = vsel %vm1742_vm2, %v1737_v24, 0.0 }
 0x28a   :  { %v1744_v26 = vrot.slane %v1743_v25, 4 }
 0x28c   :  { %v1745_v28 = vadd.f32 %v1744_v26, %v1743_v25 }
 0x28e   :  { %v1746_v29 = vrot.slane %v1745_v28, 2 }
 0x290   :  { %v1747_v31 = vadd.f32 %v1746_v29, %v1745_v28 }
 0x292   :  { %v1748_v32 = vrot.slane %v1747_v31, 1 }
 0x294   :  { %v1749_v33 = vadd.f32 %v1748_v32, %v1747_v31 }
 0x296   :  { %v1750_v34 = vmul.f32 0.5, %v1749_v33 }
 0x298   :  { %v1751_v35 = vsub.f32 %v1737_v24, %v1750_v34 }
 0x29a   :  { %v1752_v36 = vmul.f32 %v1751_v35, %v1751_v35  ;;  %v1768_v41 = vmul.f32 %v2061_v53, %v1751_v35 }
 0x29c   :  { %v1753_v37 = vsel %vm1742_vm2, %v1752_v36, 0.0 }
 0x29d   :  { %v1754_v38 = vrot.slane %v1753_v37, 4 }
 0x29f   :  { %v1755_v39 = vadd.f32 %v1754_v38, %v1753_v37 }
 0x2a1   :  { %v1756_v46 = vrot.slane %v1755_v39, 2 }
 0x2a3   :  { %v1757_v47 = vadd.f32 %v1756_v46, %v1755_v39 }
 0x2a5   :  { %v1758_v43 = vrot.slane %v1757_v47, 1 }
 0x2a7   :  { %v1759_v48 = vadd.f32 %v1758_v43, %v1757_v47 }
 0x2a9   :  { %v1760_v50 = vmul.f32 0.5, %v1759_v48 }
 0x2ab   :  { %v1769_v51 = vadd.f32 1e-05, %v1760_v50 }
 0x2ad   :  { %2408 = vrsqrt.f32 %v1769_v51 }
 0x2b7   :  { %v2409_v55 = vpop.eup %2408 }
 0x2b8   :  { %v1771_v56 = vmul.f32 %v2409_v55, %v1768_v41 }
 0x2ba   :  { %v1779_v42 = vadd.f32 %v2062_v30, %v1771_v56 }
 0x2bc   :  { %v1780_v58 = vmax.f32 %v1779_v42, 0.0 }
 0x2be   :  { %2135 = vmatmul.mubr.msk.f32.vlgmr.msra.gmra.mrb[8].mxu0 %vm1796_vm3, %v1780_v58 }
 0x2bf   :  { %2421 = shalt.err (!%p2418_p4)
}
 0x2c0   :  { %s2422_s5 = scalar_lea.hbm %s3196_s13, 128 }
 0x2c1   :  { %p2423_p5 = scmp.ne.s32.totalorder %s3196_s13, %s2422_s5  ;;  %p2426_p6 = scmp.lt.u32.totalorder %s2422_s5, %s3196_s13 }
 0x2c3   :  { %p2428_p7 = pnand %p2426_p6, %p2423_p5 }
 0x2c5   :  { %2431 = shalt.err (!%p2428_p7)
}
 0x2c6   :  { %1881 = dma.vmem_to_hbm [thread:$0]  %s1879_s7, 128, %s3196_s13, [#allocation3]   ;;  %v2063_v54 = vld [vmem:[%s3195_s12] ss:$0 sm:$0xff]  ;;  %vm1870_vm4 = vcmask 9216  }
 0x2c7   :  { %s2463_s22 = smov [#allocation4]  }
 0x2c8   :  { %s1888_s23 = sshll.u32 %s2463_s22, 4  ;;  %s1889_s23 = int_to_ptr.vmem [resolvable:$true] %s1888_s23 }
 0x2c9   :  { %s2432_s24 = scalar_lea.vmem %s1889_s23, 32  ;;  %p2437_p9 = scmp.lt.s32.totalorder %s1889_s23, %s1889_s23 }
 0x2ca   :  { %p2433_p8 = scmp.ne.s32.totalorder %s1889_s23, %s2432_s24  ;;  %p2438_p10 = scmp.lt.s32.totalorder %s2432_s24, %s2432_s24 }
 0x2cc   :  { %p2439_p11 = por %p2438_p10, %p2437_p9 }
 0x2ce   :  { %p2440_p12 = pnand %p2439_p11, %p2433_p8 }
 0x391   :  { %v1866_v59 = vpop.f32.mrb[8].mxu0 }
 0x392   :  { %v1867_v60 = vadd.f32 %v2063_v54, %v1866_v59  ;;  %v2136_v44 = vpop.f32.mrb[9].mxu0 }
 0x394   :  { %1871 = vst.msk [vmem:[#allocation4] sm:$0x3] %vm1870_vm4, %v1867_v60 }
 0x395   :  { %2443 = shalt.err (!%p2440_p12)
}
 0x396   :  { %s2444_s26 = scalar_lea.hbm %s3197_s14, 32 }
 0x397   :  { %p2445_p13 = scmp.ne.s32.totalorder %s3197_s14, %s2444_s26  ;;  %p2448_p0 = scmp.lt.u32.totalorder %s2444_s26, %s3197_s14 }
 0x399   :  { %p2450_p1 = pnand %p2448_p0, %p2445_p13 }
 0x39b   :  { %2453 = shalt.err (!%p2450_p1)
}
 0x39c   :  { %1891 = dma.vmem_to_hbm [thread:$0]  %s1889_s23, 32, %s3197_s14, [#allocation5]  }
 0x39d   :  { %2454 = dma.done.wait [#allocation3], 128  }
 0x39e   :  { %2455 = vsyncadd [#allocation3], 4294967168 }
 0x39f   :  { %2456 = dma.done.wait [#allocation5], 32  }
 0x3a0   :  { %2457 = vsyncadd [#allocation5], 4294967264 }
 0x3a1   :  { %1898 = vsyncpa [#allocation3], 1 }
 0x3a2   :  { %1899 = vsyncpa [#allocation5], 1 }

// kernel: gatnet_forward.2
= control target key start
LH: loop header
LB: loop body
LE: loop exit
PB: predicated region body
PF: predicated region fallthrough
CT: control target
= control target key end

     0   :  { %vm94_vm0 = vcmask 130048   ;;  %v4638_v3 = vmov 0   ;;  %vm709_vm2 = vcmask 523264   ;;  %s5728_s2 = inlined_call_operand.vmem [shape: f32[16,2], index: 2, kind: input, shape index: {}]   ;;  %s5729_s0 = inlined_call_operand.vmem [shape: bf16[2,64,16], index: 0, kind: input, shape index: {}]   ;;  %s5730_s1 = inlined_call_operand.vmem [shape: bf16[16,128], index: 1, kind: input, shape index: {}]   ;;  %s5731_s4 = inlined_call_operand.vmem [shape: f32[128,2], index: 4, kind: input, shape index: {}]   ;;  %s5732_s3 = inlined_call_operand.vmem [shape: bf16[128,128], index: 3, kind: input, shape index: {}]   ;;  %s5733_s6 = inlined_call_operand.vmem [shape: f32[128,2], index: 6, kind: input, shape index: {}]   ;;  %s5734_s5 = inlined_call_operand.vmem [shape: bf16[128,128], index: 5, kind: input, shape index: {}]   ;;  %s5735_s7 = inlined_call_operand.vmem [shape: f32[2,50,10], index: 7, kind: output, shape index: {}]  }
   0x1   :  { %v232_v0 = vld [vmem:[%s5728_s2] sm:$0xff]  ;;  %v233_v1 = vld [vmem:[%s5728_s2 + $0x8] sm:$0xff]  ;;  %4347 = vset.pattern.permute.xlu1 %v4638_v3  ;;  %4348 = vset.pattern.permute.xlu0 %v4638_v3  ;;  %v4703_v9 = vld [vmem:[%s5729_s0 + $0x10] sm:$0xff]  }
   0x2   :  { %v4689_v2 = vld [vmem:[%s5729_s0] sm:$0xff]   ;;  %v4180_v4 = vpack.c.bf16 %v233_v1, %v232_v0  ;;  %v4695_v6 = vld [vmem:[%s5729_s0 + $0x8] sm:$0xff]   ;;  %v220_v11 = vunpack.c.l.bf16 %v4703_v9  ;;  %v4712_v12 = vld [vmem:[%s5729_s0 + $0x18] sm:$0xff]   ;;  %v221_v13 = vunpack.c.h.bf16 %v4703_v9 }
   0x3   :  { %v216_v5 = vunpack.c.l.bf16 %v4689_v2  ;;  %v217_v7 = vunpack.c.h.bf16 %v4689_v2  ;;  %v218_v8 = vunpack.c.l.bf16 %v4695_v6  ;;  %v219_v10 = vunpack.c.h.bf16 %v4695_v6  ;;  %v4721_v15 = vld [vmem:[%s5729_s0 + $0x20] sm:$0xff]   ;;  %v4730_v18 = vld [vmem:[%s5729_s0 + $0x28] sm:$0xff]   ;;  %v4739_v21 = vld [vmem:[%s5729_s0 + $0x30] sm:$0xff]   ;;  %3792 = vmatprep.mubr.msk.bf16.mxu0 %vm94_vm0, %v4689_v2 }
   0x4   :  { %4181 = vmatprep.subr.bf16.mxu1 %v4180_v4  ;;  %v222_v14 = vunpack.c.l.bf16 %v4712_v12  ;;  %v223_v16 = vunpack.c.h.bf16 %v4712_v12  ;;  %v224_v17 = vunpack.c.l.bf16 %v4721_v15  ;;  %v225_v19 = vunpack.c.h.bf16 %v4721_v15  ;;  %v4748_v24 = vld [vmem:[%s5729_s0 + $0x38] sm:$0xff]   ;;  %s4639_s0 = smov 127  }
   0x5   :  { %3812 = vmatprep.mubr.msk.f32.mxu1 %vm94_vm0, %v216_v5  ;;  %4183 = vmatpush3.bf16.msra.mxu1 %v4180_v4  ;;  %v226_v20 = vunpack.c.l.bf16 %v4730_v18  ;;  %v227_v22 = vunpack.c.h.bf16 %v4730_v18  ;;  %v228_v23 = vunpack.c.l.bf16 %v4739_v21  ;;  %v229_v25 = vunpack.c.h.bf16 %v4739_v21 }
   0x6   :  { %v230_v26 = vunpack.c.l.bf16 %v4748_v24  ;;  %v231_v27 = vunpack.c.h.bf16 %v4748_v24  ;;  %v27_v2 = vlaneseq }
   0x8   :  { %3813 = vmatmul.mubr.msk.f32.vlgmr.msra.gmra.mrb[0].mxu1 %vm94_vm0, %v217_v7 }
   0x9   :  { %3815 = vmatprep.mubr.msk.f32.mxu1 %vm94_vm0, %v218_v8 }
   0xc   :  { %3816 = vmatmul.mubr.msk.f32.gmra.mrb[2].mxu1 %vm94_vm0, %v219_v10 }
   0xd   :  { %3818 = vmatprep.mubr.msk.f32.mxu1 %vm94_vm0, %v220_v11 }
  0x10   :  { %3819 = vmatmul.mubr.msk.f32.gmra.mrb[4].mxu1 %vm94_vm0, %v221_v13  ;;  %v4349_v13 = vld [vmem:[%s5730_s1] sm:$0xff]  }
  0x11   :  { %3821 = vmatprep.mubr.msk.f32.mxu1 %vm94_vm0, %v222_v14  ;;  %3790 = vmatprep.subr.bf16.mxu0 %v4349_v13 }
  0x12   :  { %3791 = vmatpush3.bf16.msra.mxu0 %v4349_v13 }
  0x14   :  { %3822 = vmatmul.mubr.msk.f32.gmra.mrb[6].mxu1 %vm94_vm0, %v223_v16 }
  0x15   :  { %3824 = vmatprep.mubr.msk.f32.mxu1 %vm94_vm0, %v224_v17  ;;  %3793 = vmatmul.mubr.msk.bf16.vlgmr.msra.gmra.mrb[0].mxu0 %vm94_vm0, %v4695_v6  ;;  %v620_v6 = vshrl.u32 %v27_v2, 7 }
  0x16   :  { %3796 = vmatprep.mubr.msk.bf16.mxu0 %vm94_vm0, %v4703_v9  ;;  %v4809_v9 = vand.u32 127, %v27_v2 }
  0x17   :  { %v4807_v16 = vsub.s32 0, %v620_v6 }
  0x18   :  { %3825 = vmatmul.mubr.msk.f32.gmra.mrb[8].mxu1 %vm94_vm0, %v225_v19  ;;  %vm29_vm1 = vcmp.lt.s32.totalorder %v4809_v9, 50 }
  0x19   :  { %3827 = vmatprep.mubr.msk.f32.mxu1 %vm94_vm0, %v226_v20 }
  0x1c   :  { %3828 = vmatmul.mubr.msk.f32.gmra.mrb[10].mxu1 %vm94_vm0, %v227_v22 }
  0x1d   :  { %3830 = vmatprep.mubr.msk.f32.mxu1 %vm94_vm0, %v228_v23  ;;  %3797 = vmatmul.mubr.msk.bf16.gmra.mrb[4].mxu0 %vm94_vm0, %v4712_v12 }
  0x1e   :  { %3800 = vmatprep.mubr.msk.bf16.mxu0 %vm94_vm0, %v4721_v15 }
  0x20   :  { %3831 = vmatmul.mubr.msk.f32.gmra.mrb[12].mxu1 %vm94_vm0, %v229_v25 }
  0x21   :  { %3833 = vmatprep.mubr.msk.f32.mxu1 %vm94_vm0, %v230_v26 }
  0x24   :  { %3834 = vmatmul.mubr.msk.f32.gmra.mrb[14].mxu1 %vm94_vm0, %v231_v27 }
  0x25   :  { %3801 = vmatmul.mubr.msk.bf16.gmra.mrb[8].mxu0 %vm94_vm0, %v4730_v18 }
  0x26   :  { %3804 = vmatprep.mubr.msk.bf16.mxu0 %vm94_vm0, %v4739_v21 }
  0x2d   :  { %3805 = vmatmul.mubr.msk.bf16.gmra.mrb[12].mxu0 %vm94_vm0, %v4748_v24 }
  0xdb   :  { %v3814_v28 = vpop.f32.mrb[0].mxu1 }
  0xdc   :  { %560 = vperm.xlu1 %4347, %v3814_v28   ;;  %445 = vrot.lane.b32.xlu0 %v3814_v28, %s4639_s0  ;;  %v348_v29 = vpop.f32.mrb[1].mxu1 }
  0xdf   :  { %v3817_v30 = vpop.f32.mrb[2].mxu1 }
  0xe0   :  { %443 = vrot.lane.b32.xlu0 %v348_v29, %s4639_s0  ;;  %449 = vrot.lane.b32.xlu1 %v3817_v30, %s4639_s0  ;;  %v358_v31 = vpop.f32.mrb[3].mxu1 }
  0xe3   :  { %v3820_v32 = vpop.f32.mrb[4].mxu1 }
  0xe4   :  { %556 = vperm.xlu0 %4348, %v348_v29   ;;  %447 = vrot.lane.b32.xlu1 %v358_v31, %s4639_s0  ;;  %v368_v33 = vpop.f32.mrb[5].mxu1 }
  0xe7   :  { %v3823_v34 = vpop.f32.mrb[6].mxu1 }
  0xe8   :  { %568 = vperm.xlu0 %4348, %v3817_v30   ;;  %564 = vperm.xlu1 %4347, %v358_v31   ;;  %v378_v35 = vpop.f32.mrb[7].mxu1 }
  0xeb   :  { %v3826_v36 = vpop.f32.mrb[8].mxu1 }
  0xec   :  { %576 = vperm.xlu0 %4348, %v3820_v32   ;;  %453 = vrot.lane.b32.xlu1 %v3820_v32, %s4639_s0  ;;  %v388_v37 = vpop.f32.mrb[9].mxu1 }
  0xef   :  { %v3829_v38 = vpop.f32.mrb[10].mxu1 }
  0xf0   :  { %572 = vperm.xlu1 %4347, %v368_v33   ;;  %451 = vrot.lane.b32.xlu0 %v368_v33, %s4639_s0  ;;  %v398_v39 = vpop.f32.mrb[11].mxu1 }
  0xf3   :  { %v3832_v40 = vpop.f32.mrb[12].mxu1 }
  0xf4   :  { %584 = vperm.xlu0 %4348, %v3823_v34   ;;  %457 = vrot.lane.b32.xlu1 %v3823_v34, %s4639_s0  ;;  %v408_v41 = vpop.f32.mrb[13].mxu1 }
  0xf7   :  { %v3835_v42 = vpop.f32.mrb[14].mxu1 }
  0xf8   :  { %580 = vperm.xlu1 %4347, %v378_v35   ;;  %455 = vrot.lane.b32.xlu0 %v378_v35, %s4639_s0  ;;  %v418_v43 = vpop.f32.mrb[15].mxu1 }
  0xfc   :  { %592 = vperm.xlu0 %4348, %v3826_v36   ;;  %461 = vrot.lane.b32.xlu1 %v3826_v36, %s4639_s0 }
 0x100   :  { %588 = vperm.xlu1 %4347, %v388_v37   ;;  %459 = vrot.lane.b32.xlu0 %v388_v37, %s4639_s0 }
 0x104   :  { %600 = vperm.xlu0 %4348, %v3829_v38   ;;  %465 = vrot.lane.b32.xlu1 %v3829_v38, %s4639_s0 }
 0x108   :  { %596 = vperm.xlu1 %4347, %v398_v39   ;;  %463 = vrot.lane.b32.xlu0 %v398_v39, %s4639_s0 }
 0x10c   :  { %608 = vperm.xlu0 %4348, %v3832_v40   ;;  %469 = vrot.lane.b32.xlu1 %v3832_v40, %s4639_s0 }
 0x110   :  { %604 = vperm.xlu1 %4347, %v408_v41   ;;  %467 = vrot.lane.b32.xlu0 %v408_v41, %s4639_s0 }
 0x114   :  { %471 = vrot.lane.b32.xlu0 %v418_v43, %s4639_s0  ;;  %473 = vrot.lane.b32.xlu1 %v3835_v42, %s4639_s0 }
 0x118   :  { %612 = vperm.xlu0 %4348, %v418_v43  }
 0x11c   :  { %616 = vperm.xlu0 %4348, %v3835_v42  }
 0x14e   :  { %v446_v44 = vpop.permute.xlu0 %445 }
 0x152   :  { %v444_v45 = vpop.permute.xlu0 %443 }
 0x153   :  { %491 = vxpose.xlu1.b32.start [1/8] (short) (narrow) %v444_v45, 8 }
 0x157   :  { %492 = vxpose.xlu1.b32.cont [2/8] (short) (narrow) %v446_v44, 8 }
 0x15b   :  { %v561_v46 = vpop.permute.xlu1 %560 }
 0x15f   :  { %v450_v47 = vpop.permute.xlu1 %449 }
 0x163   :  { %v557_v48 = vpop.permute.xlu0 %556  ;;  %v448_v49 = vpop.permute.xlu1 %447 }
 0x164   :  { %493 = vxpose.xlu1.b32.cont [3/8] (short) (narrow) %v448_v49, 8 }
 0x167   :  { %v569_v50 = vpop.permute.xlu0 %568  ;;  %v565_v51 = vpop.permute.xlu1 %564 }
 0x168   :  { %494 = vxpose.xlu1.b32.cont [4/8] (short) (narrow) %v450_v47, 8 }
 0x16b   :  { %v577_v52 = vpop.permute.xlu0 %576  ;;  %v454_v53 = vpop.permute.xlu1 %453 }
 0x16f   :  { %v573_v54 = vpop.permute.xlu1 %572  ;;  %v452_v55 = vpop.permute.xlu0 %451 }
 0x170   :  { %495 = vxpose.xlu1.b32.cont [5/8] (short) (narrow) %v452_v55, 8 }
 0x173   :  { %v4774_v56 = vpop.permute.xlu0 %584  ;;  %v458_v57 = vpop.permute.xlu1 %457 }
 0x174   :  { %496 = vxpose.xlu1.b32.cont [6/8] (short) (narrow) %v454_v53, 8 }
 0x177   :  { %v581_v58 = vpop.permute.xlu1 %580  ;;  %v456_v59 = vpop.permute.xlu0 %455 }
 0x178   :  { %497 = vxpose.xlu1.b32.cont [7/8] (short) (narrow) %v456_v59, 8 }
 0x17b   :  { %v4776_v60 = vpop.permute.xlu0 %592  ;;  %v462_v61 = vpop.permute.xlu1 %461 }
 0x17c   :  { %498 = vxpose.xlu1.b32.end [8/8] (short) (narrow) %v458_v57, 8 }
 0x17f   :  { %v4778_v62 = vpop.permute.xlu1 %588  ;;  %v460_v63 = vpop.permute.xlu0 %459 }
 0x180   :  { %523 = vxpose.xlu0.b32.start [1/8] (short) (narrow) %v460_v63, 8 }
 0x183   :  { %v4780_v0 = vpop.permute.xlu0 %600  ;;  %v466_v1 = vpop.permute.xlu1 %465 }
 0x184   :  { %524 = vxpose.xlu0.b32.cont [2/8] (short) (narrow) %v462_v61, 8 }
 0x187   :  { %v464_v3 = vpop.permute.xlu0 %463  ;;  %v4782_v4 = vpop.permute.xlu1 %596 }
 0x188   :  { %525 = vxpose.xlu0.b32.cont [3/8] (short) (narrow) %v464_v3, 8 }
 0x18b   :  { %v4784_v5 = vpop.permute.xlu0 %608  ;;  %v470_v8 = vpop.permute.xlu1 %469 }
 0x18c   :  { %526 = vxpose.xlu0.b32.cont [4/8] (short) (narrow) %v466_v1, 8 }
 0x18f   :  { %v468_v7 = vpop.permute.xlu0 %467  ;;  %v4786_v10 = vpop.permute.xlu1 %604 }
 0x190   :  { %527 = vxpose.xlu0.b32.cont [5/8] (short) (narrow) %v468_v7, 8 }
 0x193   :  { %v472_v11 = vpop.permute.xlu0 %471  ;;  %v474_v14 = vpop.permute.xlu1 %473 }
 0x194   :  { %528 = vxpose.xlu0.b32.cont [6/8] (short) (narrow) %v470_v8, 8 }
 0x197   :  { %v613_v55 = vpop.permute.xlu0 %612 }
 0x198   :  { %529 = vxpose.xlu0.b32.cont [7/8] (short) (narrow) %v472_v11, 8 }
 0x19c   :  { %530 = vxpose.xlu0.b32.end [8/8] (short) (narrow) %v474_v14, 8 }
 0x1e0   :  { %v507_v17 = vpop.trf.xlu1 }
 0x1e1   :  { %v622_v12 = vrot.slane %v507_v17, %v4807_v16 }
 0x1e3   :  { %v627_v15 = vadd.f32 %v622_v12, %v557_v48  ;;  %v628_v19 = vadd.f32 %v622_v12, %v561_v46  ;;  %v629_v18 = vadd.f32 %v622_v12, %v565_v51  ;;  %v631_v20 = vadd.f32 %v622_v12, %v573_v54 }
 0x1e4   :  { %v630_v21 = vadd.f32 %v622_v12, %v569_v50  ;;  %v633_v22 = vadd.f32 %v622_v12, %v581_v58  ;;  %v632_v23 = vadd.f32 %v622_v12, %v577_v52  ;;  %v634_v41 = vadd.f32 %v622_v12, %v4774_v56  ;;  %v617_v58 = vpop.permute.xlu0 %616 }
 0x1e5   :  { %vm643_vm3 = vcmp.gt.f32.partialorder %v627_v15, 0.0  ;;  %v659_v24 = vmul.f32 0.3, %v627_v15  ;;  %vm644_vm4 = vcmp.gt.f32.partialorder %v628_v19, 0.0  ;;  %v660_v25 = vmul.f32 0.3, %v628_v19 }
 0x1e6   :  { %vm645_vm5 = vcmp.gt.f32.partialorder %v629_v18, 0.0  ;;  %v661_v26 = vmul.f32 0.3, %v629_v18  ;;  %vm647_vm6 = vcmp.gt.f32.partialorder %v631_v20, 0.0  ;;  %v663_v27 = vmul.f32 0.3, %v631_v20 }
 0x1e7   :  { %v675_v28 = vsel %vm643_vm3, %v627_v15, %v659_v24  ;;  %v676_v29 = vsel %vm644_vm4, %v628_v19, %v660_v25  ;;  %vm646_vm7 = vcmp.gt.f32.partialorder %v630_v21, 0.0  ;;  %v662_v30 = vmul.f32 0.3, %v630_v21 }
 0x1e8   :  { %v4815_v31 = vsel %vm29_vm1, %v675_v28, -1e+30  ;;  %v4819_v32 = vsel %vm29_vm1, %v676_v29, -1e+30  ;;  %v677_v33 = vsel %vm645_vm5, %v629_v18, %v661_v26  ;;  %v679_v34 = vsel %vm647_vm6, %v631_v20, %v663_v27 }
 0x1e9   :  { %v710_v35 = vsel %vm709_vm2, %v4815_v31, -inf  ;;  %v713_v36 = vsel %vm709_vm2, %v4819_v32, -inf  ;;  %v4827_v37 = vsel %vm29_vm1, %v677_v33, -1e+30  ;;  %v4831_v38 = vsel %vm29_vm1, %v679_v34, -1e+30 }
 0x1ea   :  { %711 = vmax.xlane.f32.xlu1 %v710_v35  ;;  %714 = vmax.xlane.f32.xlu0 %v713_v36  ;;  %vm649_vm8 = vcmp.gt.f32.partialorder %v633_v22, 0.0  ;;  %v678_v39 = vsel %vm646_vm7, %v630_v21, %v662_v30  ;;  %v665_v40 = vmul.f32 0.3, %v633_v22  ;;  %vm648_vm9 = vcmp.gt.f32.partialorder %v632_v23, 0.0 }
 0x1eb   :  { %v664_v42 = vmul.f32 0.3, %v632_v23  ;;  %v716_v43 = vsel %vm709_vm2, %v4827_v37, -inf  ;;  %v722_v44 = vsel %vm709_vm2, %v4831_v38, -inf  ;;  %v4840_v46 = vsel %vm29_vm1, %v678_v39, -1e+30 }
 0x1ec   :  { %v681_v45 = vsel %vm649_vm8, %v633_v22, %v665_v40  ;;  %v666_v49 = vmul.f32 0.3, %v634_v41  ;;  %vm650_vm10 = vcmp.gt.f32.partialorder %v634_v41, 0.0  ;;  %v719_v50 = vsel %vm709_vm2, %v4840_v46, -inf }
 0x1ed   :  { %v4844_v47 = vsel %vm29_vm1, %v681_v45, -1e+30  ;;  %v680_v48 = vsel %vm648_vm9, %v632_v23, %v664_v42 }
 0x1ee   :  { %717 = vmax.xlane.f32.xlu1 %v716_v43  ;;  %723 = vmax.xlane.f32.xlu0 %v722_v44  ;;  %v728_v51 = vsel %vm709_vm2, %v4844_v47, -inf  ;;  %v4852_v52 = vsel %vm29_vm1, %v680_v48, -1e+30  ;;  %v682_v53 = vsel %vm650_vm10, %v634_v41, %v666_v49  ;;  %v3794_v43 = vpop.f32.mrb[0].mxu0 }
 0x1ef   :  { %v725_v54 = vsel %vm709_vm2, %v4852_v52, -inf  ;;  %v4858_v56 = vsel %vm29_vm1, %v682_v53, -1e+30  ;;  %v153_v44 = vpop.f32.mrb[1].mxu0 }
 0x1f0   :  { %v731_v57 = vsel %vm709_vm2, %v4858_v56, -inf  ;;  %v3795_v45 = vpop.f32.mrb[2].mxu0 }
 0x1f1   :  { %v4188_v48 = vpack.c.bf16 %v3795_v45, %v3794_v43  ;;  %v156_v49 = vpop.f32.mrb[3].mxu0 }
 0x1f2   :  { %720 = vmax.xlane.f32.xlu1 %v719_v50  ;;  %729 = vmax.xlane.f32.xlu0 %v728_v51  ;;  %v4184_v50 = vpack.c.bf16 %v156_v49, %v153_v44 }
 0x1f4   :  { %4185 = vmatprep.subr.bf16.mxu0 %v4184_v50 }
 0x1f5   :  { %4187 = vmatpush3.bf16.msra.mxu0 %v4184_v50 }
 0x1f6   :  { %726 = vmax.xlane.f32.xlu1 %v725_v54  ;;  %4189 = vmatprep.subr.bf16.mxu0 %v4188_v48 }
 0x1f9   :  { %4191 = vmatpush3.bf16.msra.mxu0 %v4188_v48 }
 0x1fa   :  { %732 = vmax.xlane.f32.xlu1 %v731_v57  ;;  %v3798_v57 = vpop.f32.mrb[4].mxu0 }
 0x200   :  { %v539_v59 = vpop.trf.xlu0 }
 0x201   :  { %v626_v61 = vrot.slane %v539_v59, %v4807_v16 }
 0x203   :  { %v636_v63 = vadd.f32 %v626_v61, %v4776_v60  ;;  %v635_v1 = vadd.f32 %v626_v61, %v4778_v62  ;;  %v638_v3 = vadd.f32 %v626_v61, %v4780_v0  ;;  %v637_v7 = vadd.f32 %v626_v61, %v4782_v4 }
 0x204   :  { %v640_v8 = vadd.f32 %v626_v61, %v4784_v5  ;;  %v639_v11 = vadd.f32 %v626_v61, %v4786_v10  ;;  %v642_v13 = vadd.f32 %v626_v61, %v617_v58  ;;  %v641_v14 = vadd.f32 %v626_v61, %v613_v55  ;;  %v169_v58 = vpop.f32.mrb[5].mxu0 }
 0x205   :  { %vm652_vm11 = vcmp.gt.f32.partialorder %v636_v63, 0.0  ;;  %v668_v2 = vmul.f32 0.3, %v636_v63  ;;  %vm651_vm12 = vcmp.gt.f32.partialorder %v635_v1, 0.0  ;;  %v667_v6 = vmul.f32 0.3, %v635_v1 }
 0x206   :  { %vm654_vm13 = vcmp.gt.f32.partialorder %v638_v3, 0.0  ;;  %v670_v17 = vmul.f32 0.3, %v638_v3  ;;  %vm653_vm14 = vcmp.gt.f32.partialorder %v637_v7, 0.0  ;;  %v669_v60 = vmul.f32 0.3, %v637_v7 }
 0x207   :  { %v684_v12 = vsel %vm652_vm11, %v636_v63, %v668_v2  ;;  %v683_v62 = vsel %vm651_vm12, %v635_v1, %v667_v6  ;;  %vm656_vm15 = vcmp.gt.f32.partialorder %v640_v8, 0.0  ;;  %v672_v0 = vmul.f32 0.3, %v640_v8  ;;  %v3799_v63 = vpop.f32.mrb[6].mxu0 }
 0x208   :  { %v4871_v4 = vsel %vm29_vm1, %v684_v12, -1e+30  ;;  %v4875_v5 = vsel %vm29_vm1, %v683_v62, -1e+30  ;;  %v686_v10 = vsel %vm654_vm13, %v638_v3, %v670_v17  ;;  %v685_v15 = vsel %vm653_vm14, %v637_v7, %v669_v60 }
 0x209   :  { %v737_v19 = vsel %vm709_vm2, %v4871_v4, -inf  ;;  %v734_v18 = vsel %vm709_vm2, %v4875_v5, -inf  ;;  %v4883_v20 = vsel %vm29_vm1, %v686_v10, -1e+30  ;;  %v4887_v21 = vsel %vm29_vm1, %v685_v15, -1e+30 }
 0x20a   :  { %738 = vmax.xlane.f32.xlu1 %v737_v19  ;;  %735 = vmax.xlane.f32.xlu0 %v734_v18  ;;  %vm655_vm0 = vcmp.gt.f32.partialorder %v639_v11, 0.0  ;;  %v688_v22 = vsel %vm656_vm15, %v640_v8, %v672_v0  ;;  %v671_v23 = vmul.f32 0.3, %v639_v11  ;;  %vm658_vm3 = vcmp.gt.f32.partialorder %v642_v13, 0.0 }
 0x20b   :  { %v674_v24 = vmul.f32 0.3, %v642_v13  ;;  %vm657_vm4 = vcmp.gt.f32.partialorder %v641_v14, 0.0  ;;  %v673_v25 = vmul.f32 0.3, %v641_v14  ;;  %v743_v26 = vsel %vm709_vm2, %v4883_v20, -inf }
 0x20c   :  { %v740_v27 = vsel %vm709_vm2, %v4887_v21, -inf  ;;  %v687_v28 = vsel %vm655_vm0, %v639_v11, %v671_v23  ;;  %v4895_v29 = vsel %vm29_vm1, %v688_v22, -1e+30  ;;  %v4196_v7 = vpack.c.bf16 %v3799_v63, %v3798_v57 }
 0x20d   :  { %v4899_v30 = vsel %vm29_vm1, %v687_v28, -1e+30  ;;  %v690_v33 = vsel %vm658_vm3, %v642_v13, %v674_v24  ;;  %v689_v34 = vsel %vm657_vm4, %v641_v14, %v673_v25  ;;  %v749_v35 = vsel %vm709_vm2, %v4895_v29, -inf  ;;  %v172_v13 = vpop.f32.mrb[7].mxu0 }
 0x20e   :  { %744 = vmax.xlane.f32.xlu1 %v743_v26  ;;  %741 = vmax.xlane.f32.xlu0 %v740_v27  ;;  %v746_v36 = vsel %vm709_vm2, %v4899_v30, -inf  ;;  %v4907_v39 = vsel %vm29_vm1, %v690_v33, -1e+30  ;;  %v4911_v40 = vsel %vm29_vm1, %v689_v34, -1e+30  ;;  %v3802_v63 = vpop.f32.mrb[8].mxu0 }
 0x20f   :  { %v755_v41 = vsel %vm709_vm2, %v4907_v39, -inf  ;;  %v752_v42 = vsel %vm709_vm2, %v4911_v40, -inf }
 0x212   :  { %750 = vmax.xlane.f32.xlu1 %v749_v35  ;;  %747 = vmax.xlane.f32.xlu0 %v746_v36 }
 0x216   :  { %756 = vmax.xlane.f32.xlu1 %v755_v41  ;;  %753 = vmax.xlane.f32.xlu0 %v752_v42 }
 0x277   :  { %v712_v51 = vpop.xlane.xlu1 %711  ;;  %v715_v53 = vpop.xlane.xlu0 %714 }
 0x278   :  { %v758_v54 = vsub.f32 %v4815_v31, %v712_v51  ;;  %v759_v55 = vsub.f32 %v4819_v32, %v715_v53  ;;  %v4192_v31 = vpack.c.bf16 %v172_v13, %v169_v58 }
 0x27a   :  { %v774_v59 = vmul.f32 1.442695, %v758_v54  ;;  %v776_v61 = vmul.f32 1.442695, %v759_v55  ;;  %4193 = vmatprep.subr.bf16.mxu0 %v4192_v31 }
 0x27b   :  { %v718_v1 = vpop.xlane.xlu1 %717  ;;  %v724_v3 = vpop.xlane.xlu0 %723  ;;  %4195 = vmatpush3.bf16.msra.mxu0 %v4192_v31 }
 0x27c   :  { %4382 = vpow2.f32 %v774_v59  ;;  %v760_v8 = vsub.f32 %v4827_v37, %v718_v1  ;;  %v762_v11 = vsub.f32 %v4831_v38, %v724_v3  ;;  %4197 = vmatprep.subr.bf16.mxu0 %v4196_v7 }
 0x27d   :  { %4384 = vpow2.f32 %v776_v61 }
 0x27e   :  { %v778_v14 = vmul.f32 1.442695, %v760_v8  ;;  %v782_v32 = vmul.f32 1.442695, %v762_v11 }
 0x27f   :  { %v721_v2 = vpop.xlane.xlu1 %720  ;;  %v730_v6 = vpop.xlane.xlu0 %729  ;;  %4199 = vmatpush3.bf16.msra.mxu0 %v4196_v7 }
 0x280   :  { %4386 = vpow2.f32 %v778_v14  ;;  %v761_v17 = vsub.f32 %v4840_v46, %v721_v2  ;;  %v764_v60 = vsub.f32 %v4844_v47, %v730_v6  ;;  %v185_v7 = vpop.f32.mrb[9].mxu0 }
 0x281   :  { %4388 = vpow2.f32 %v782_v32  ;;  %v3803_v8 = vpop.f32.mrb[10].mxu0 }
 0x282   :  { %v780_v12 = vmul.f32 1.442695, %v761_v17  ;;  %v786_v37 = vmul.f32 1.442695, %v764_v60  ;;  %v4204_v31 = vpack.c.bf16 %v3803_v8, %v3802_v63 }
 0x283   :  { %v727_v62 = vpop.xlane.xlu1 %726 }
 0x284   :  { %4390 = vpow2.f32 %v780_v12  ;;  %v763_v38 = vsub.f32 %v4852_v52, %v727_v62 }
 0x285   :  { %4392 = vpow2.f32 %v786_v37 }
 0x286   :  { %v4924_v0 = vpop.eup %4382  ;;  %v784_v10 = vmul.f32 1.442695, %v763_v38 }
 0x287   :  { %v4926_v15 = vpop.eup %4384  ;;  %v733_v19 = vpop.xlane.xlu1 %732  ;;  %v806_v46 = vsel %vm709_vm2, %v4924_v0, 0.0 }
 0x288   :  { %4394 = vpow2.f32 %v784_v10  ;;  %v765_v47 = vsub.f32 %v4858_v56, %v733_v19  ;;  %807 = vadd.xlane.f32.xlu0 %v806_v46  ;;  %v809_v18 = vsel %vm709_vm2, %v4926_v15, 0.0 }
 0x289   :  { %810 = vadd.xlane.f32.xlu1 %v809_v18 }
 0x28a   :  { %v4933_v52 = vpop.eup %4386  ;;  %v788_v22 = vmul.f32 1.442695, %v765_v47 }
 0x28b   :  { %v812_v23 = vsel %vm709_vm2, %v4933_v52, 0.0  ;;  %v4937_v24 = vpop.eup %4388 }
 0x28c   :  { %4396 = vpow2.f32 %v788_v22  ;;  %813 = vadd.xlane.f32.xlu0 %v812_v23  ;;  %v818_v26 = vsel %vm709_vm2, %v4937_v24, 0.0 }
 0x28e   :  { %v4939_v25 = vpop.eup %4390 }
 0x28f   :  { %v815_v56 = vsel %vm709_vm2, %v4939_v25, 0.0  ;;  %v4945_v27 = vpop.eup %4392 }
 0x290   :  { %816 = vadd.xlane.f32.xlu1 %v815_v56  ;;  %819 = vadd.xlane.f32.xlu0 %v818_v26  ;;  %v824_v34 = vsel %vm709_vm2, %v4945_v27, 0.0 }
 0x292   :  { %v4947_v28 = vpop.eup %4394 }
 0x293   :  { %v821_v33 = vsel %vm709_vm2, %v4947_v28, 0.0 }
 0x294   :  { %822 = vadd.xlane.f32.xlu1 %v821_v33  ;;  %825 = vadd.xlane.f32.xlu0 %v824_v34  ;;  %v1409_v34 = vld [vmem:[%s5731_s4] sm:$0xff] }
 0x296   :  { %v4953_v35 = vpop.eup %4396 }
 0x297   :  { %v739_v36 = vpop.xlane.xlu1 %738  ;;  %v736_v41 = vpop.xlane.xlu0 %735  ;;  %v827_v42 = vsel %vm709_vm2, %v4953_v35, 0.0 }
 0x298   :  { %v767_v43 = vsub.f32 %v4871_v4, %v739_v36  ;;  %v766_v44 = vsub.f32 %v4875_v5, %v736_v41  ;;  %828 = vadd.xlane.f32.xlu1 %v827_v42  ;;  %v1410_v36 = vld [vmem:[%s5731_s4 + $0x8] sm:$0xff]  ;;  %v4358_v42 = vld [vmem:[%s5732_s3] sm:$0xff]  }
 0x299   :  { %v5003_v41 = vpack.c.bf16 %v1410_v36, %v1409_v34  ;;  %3892 = vmatprep.subr.bf16.mxu0 %v4358_v42  ;;  %v4359_v34 = vld [vmem:[%s5732_s3 + $0x8] sm:$0xff]  }
 0x29a   :  { %v792_v45 = vmul.f32 1.442695, %v767_v43  ;;  %v790_v48 = vmul.f32 1.442695, %v766_v44  ;;  %v1418_v36 = vld [vmem:[%s5731_s4 + $0x48] sm:$0xff] }
 0x29b   :  { %v745_v49 = vpop.xlane.xlu1 %744  ;;  %v742_v50 = vpop.xlane.xlu0 %741 }
 0x29c   :  { %4398 = vpow2.f32 %v792_v45  ;;  %v769_v51 = vsub.f32 %v4883_v20, %v745_v49  ;;  %v768_v53 = vsub.f32 %v4887_v21, %v742_v50 }
 0x29d   :  { %4400 = vpow2.f32 %v790_v48 }
 0x29e   :  { %v796_v54 = vmul.f32 1.442695, %v769_v51  ;;  %v794_v55 = vmul.f32 1.442695, %v768_v53 }
 0x29f   :  { %v751_v57 = vpop.xlane.xlu1 %750  ;;  %v748_v58 = vpop.xlane.xlu0 %747 }
 0x2a0   :  { %4402 = vpow2.f32 %v796_v54  ;;  %v771_v4 = vsub.f32 %v4895_v29, %v751_v57  ;;  %v770_v5 = vsub.f32 %v4899_v30, %v748_v58  ;;  %v188_v30 = vpop.f32.mrb[11].mxu0 }
 0x2a1   :  { %4404 = vpow2.f32 %v794_v55  ;;  %v4200_v2 = vpack.c.bf16 %v188_v30, %v185_v7  ;;  %v3806_v6 = vpop.f32.mrb[12].mxu0 }
 0x2a2   :  { %v800_v59 = vmul.f32 1.442695, %v771_v4  ;;  %v798_v61 = vmul.f32 1.442695, %v770_v5 }
 0x2a3   :  { %v757_v1 = vpop.xlane.xlu1 %756  ;;  %v754_v3 = vpop.xlane.xlu0 %753  ;;  %4201 = vmatprep.subr.bf16.mxu1 %v4200_v2 }
 0x2a4   :  { %4406 = vpow2.f32 %v800_v59  ;;  %v773_v20 = vsub.f32 %v4907_v39, %v757_v1  ;;  %v772_v21 = vsub.f32 %v4911_v40, %v754_v3  ;;  %v201_v40 = vpop.f32.mrb[13].mxu0  ;;  %4203 = vmatpush3.bf16.msra.mxu1 %v4200_v2 }
 0x2a5   :  { %4408 = vpow2.f32 %v798_v61  ;;  %v3807_v17 = vpop.f32.mrb[14].mxu0  ;;  %4205 = vmatprep.subr.bf16.mxu1 %v4204_v31 }
 0x2a6   :  { %v4965_v11 = vpop.eup %4398  ;;  %v804_v13 = vmul.f32 1.442695, %v773_v20  ;;  %v802_v29 = vmul.f32 1.442695, %v772_v21  ;;  %v4212_v12 = vpack.c.bf16 %v3807_v17, %v3806_v6  ;;  %v204_v37 = vpop.f32.mrb[15].mxu0  ;;  %v1413_v17 = vld [vmem:[%s5731_s4 + $0x20] sm:$0xff] }
 0x2a7   :  { %v4967_v14 = vpop.eup %4400  ;;  %v833_v32 = vsel %vm709_vm2, %v4965_v11, 0.0  ;;  %v4208_v10 = vpack.c.bf16 %v204_v37, %v201_v40 }
 0x2a8   :  { %4410 = vpow2.f32 %v804_v13  ;;  %834 = vadd.xlane.f32.xlu1 %v833_v32  ;;  %v830_v39 = vsel %vm709_vm2, %v4967_v14, 0.0  ;;  %4207 = vmatpush3.bf16.msra.mxu1 %v4204_v31 }
 0x2a9   :  { %4412 = vpow2.f32 %v802_v29  ;;  %831 = vadd.xlane.f32.xlu0 %v830_v39  ;;  %4209 = vmatprep.subr.bf16.mxu1 %v4208_v10  ;;  %v1411_v29 = vld [vmem:[%s5731_s4 + $0x10] sm:$0xff] }
 0x2aa   :  { %v4973_v60 = vpop.eup %4402 }
 0x2ab   :  { %v4975_v62 = vpop.eup %4404  ;;  %v839_v38 = vsel %vm709_vm2, %v4973_v60, 0.0 }
 0x2ac   :  { %840 = vadd.xlane.f32.xlu1 %v839_v38  ;;  %v836_v19 = vsel %vm709_vm2, %v4975_v62, 0.0  ;;  %4211 = vmatpush3.bf16.msra.mxu1 %v4208_v10 }
 0x2ad   :  { %837 = vadd.xlane.f32.xlu0 %v836_v19  ;;  %4213 = vmatprep.subr.bf16.mxu1 %v4212_v12 }
 0x2ae   :  { %v4981_v46 = vpop.eup %4406 }
 0x2af   :  { %v4983_v47 = vpop.eup %4408  ;;  %v845_v18 = vsel %vm709_vm2, %v4981_v46, 0.0 }
 0x2b0   :  { %846 = vadd.xlane.f32.xlu1 %v845_v18  ;;  %v842_v22 = vsel %vm709_vm2, %v4983_v47, 0.0  ;;  %4215 = vmatpush3.bf16.msra.mxu1 %v4212_v12  ;;  %v1414_v12 = vld [vmem:[%s5731_s4 + $0x28] sm:$0xff] }
 0x2b1   :  { %843 = vadd.xlane.f32.xlu0 %v842_v22  ;;  %4217 = vmatprep.subr.bf16.mxu1 %v5003_v41  ;;  %v4224_v38 = vpack.c.bf16 %v1414_v12, %v1413_v17 }
 0x2b2   :  { %v4989_v23 = vpop.eup %4410 }
 0x2b3   :  { %v4991_v56 = vpop.eup %4412  ;;  %v851_v26 = vsel %vm709_vm2, %v4989_v23, 0.0 }
 0x2b4   :  { %852 = vadd.xlane.f32.xlu1 %v851_v26  ;;  %v848_v33 = vsel %vm709_vm2, %v4991_v56, 0.0 }
 0x2b5   :  { %849 = vadd.xlane.f32.xlu0 %v848_v33 }
 0x315   :  { %v808_v43 = vpop.xlane.xlu0 %807 }
 0x316   :  { %v811_v44 = vpop.xlane.xlu1 %810  ;;  %4414 = vrcp.f32 %v808_v43  ;;  %v1419_v43 = vld [vmem:[%s5731_s4 + $0x50] sm:$0xff] }
 0x317   :  { %4416 = vrcp.f32 %v811_v44  ;;  %v1420_v44 = vld [vmem:[%s5731_s4 + $0x58] sm:$0xff] }
 0x319   :  { %v814_v45 = vpop.xlane.xlu0 %813 }
 0x31a   :  { %4418 = vrcp.f32 %v814_v45  ;;  %v4361_v45 = vld [vmem:[%s5732_s3 + $0x18] sm:$0xff]  }
 0x31d   :  { %v817_v48 = vpop.xlane.xlu1 %816  ;;  %v820_v49 = vpop.xlane.xlu0 %819 }
 0x31e   :  { %4420 = vrcp.f32 %v817_v48  ;;  %v4236_v48 = vpack.c.bf16 %v1420_v44, %v1419_v43 }
 0x31f   :  { %4422 = vrcp.f32 %v820_v49  ;;  %v1421_v49 = vld [vmem:[%s5731_s4 + $0x60] sm:$0xff] }
 0x320   :  { %v4415_v50 = vpop.eup %4414 }
 0x321   :  { %v4417_v51 = vpop.eup %4416  ;;  %v823_v53 = vpop.xlane.xlu1 %822  ;;  %v855_v55 = vmul.f32 %v4415_v50, %v4924_v0  ;;  %v1422_v50 = vld [vmem:[%s5731_s4 + $0x68] sm:$0xff] }
 0x322   :  { %v826_v54 = vpop.xlane.xlu0 %825  ;;  %v857_v57 = vmul.f32 %v4417_v51, %v4926_v15  ;;  %4424 = vrcp.f32 %v823_v53  ;;  %v4362_v51 = vld [vmem:[%s5732_s3 + $0x20] sm:$0xff]   ;;  %v4240_v53 = vpack.c.bf16 %v1422_v50, %v1421_v49 }
 0x323   :  { %4426 = vrcp.f32 %v826_v54  ;;  %3852 = vmatprep.mubr.msk.f32.mxu0 %vm709_vm2, %v855_v55  ;;  %v4363_v54 = vld [vmem:[%s5732_s3 + $0x28] sm:$0xff]   ;;  %v1423_v55 = vld [vmem:[%s5731_s4 + $0x70] sm:$0xff] }
 0x324   :  { %v4419_v58 = vpop.eup %4418  ;;  %3853 = vmatmul.mubr.msk.f32.vlgmr.msra.gmra.mrb[16].mxu0 %vm709_vm2, %v857_v57  ;;  %v1424_v57 = vld [vmem:[%s5731_s4 + $0x78] sm:$0xff] }
 0x325   :  { %v829_v4 = vpop.xlane.xlu1 %828  ;;  %v859_v5 = vmul.f32 %v4419_v58, %v4933_v52  ;;  %3893 = vmatpush3.bf16.msra.mxu0 %v4358_v42  ;;  %v4244_v58 = vpack.c.bf16 %v1424_v57, %v1423_v55 }
 0x326   :  { %4428 = vrcp.f32 %v829_v4  ;;  %3894 = vmatprep.subr.bf16.mxu0 %v4359_v34  ;;  %v4364_v4 = vld [vmem:[%s5732_s3 + $0x30] sm:$0xff]  }
 0x327   :  { %3855 = vmatprep.mubr.msk.f32.mxu0 %vm709_vm2, %v859_v5  ;;  %v4365_v5 = vld [vmem:[%s5732_s3 + $0x38] sm:$0xff]  }
 0x328   :  { %v4421_v59 = vpop.eup %4420 }
 0x329   :  { %v4423_v61 = vpop.eup %4422  ;;  %v861_v0 = vmul.f32 %v4421_v59, %v4939_v25  ;;  %3895 = vmatpush3.bf16.msra.mxu0 %v4359_v34 }
 0x32a   :  { %v863_v15 = vmul.f32 %v4423_v61, %v4937_v24 }
 0x32b   :  { %3856 = vmatmul.mubr.msk.f32.gmra.mrb[18].mxu0 %vm709_vm2, %v861_v0 }
 0x32c   :  { %v4425_v63 = vpop.eup %4424  ;;  %3858 = vmatprep.mubr.msk.f32.mxu0 %vm709_vm2, %v863_v15 }
 0x32d   :  { %v4427_v1 = vpop.eup %4426  ;;  %v865_v3 = vmul.f32 %v4425_v63, %v4947_v28 }
 0x32e   :  { %v867_v52 = vmul.f32 %v4427_v1, %v4945_v27 }
 0x32f   :  { %3859 = vmatmul.mubr.msk.f32.gmra.mrb[20].mxu0 %vm709_vm2, %v865_v3 }
 0x330   :  { %v4429_v20 = vpop.eup %4428  ;;  %3861 = vmatprep.mubr.msk.f32.mxu0 %vm709_vm2, %v867_v52 }
 0x331   :  { %v869_v21 = vmul.f32 %v4429_v20, %v4953_v35  ;;  %v1412_v35 = vld [vmem:[%s5731_s4 + $0x18] sm:$0xff] }
 0x332   :  { %v4220_v39 = vpack.c.bf16 %v1412_v35, %v1411_v29 }
 0x333   :  { %3862 = vmatmul.mubr.msk.f32.gmra.mrb[22].mxu0 %vm709_vm2, %v869_v21 }
 0x335   :  { %v835_v24 = vpop.xlane.xlu1 %834 }
 0x336   :  { %4430 = vrcp.f32 %v835_v24  ;;  %v832_v25 = vpop.xlane.xlu0 %831 }
 0x337   :  { %4432 = vrcp.f32 %v832_v25 }
 0x339   :  { %v841_v7 = vpop.xlane.xlu1 %840 }
 0x33a   :  { %4434 = vrcp.f32 %v841_v7  ;;  %v838_v8 = vpop.xlane.xlu0 %837 }
 0x33b   :  { %4436 = vrcp.f32 %v838_v8 }
 0x33d   :  { %v847_v28 = vpop.xlane.xlu1 %846 }
 0x33e   :  { %4438 = vrcp.f32 %v847_v28  ;;  %v844_v27 = vpop.xlane.xlu0 %843 }
 0x33f   :  { %4440 = vrcp.f32 %v844_v27 }
 0x340   :  { %v4431_v13 = vpop.eup %4430 }
 0x341   :  { %v4433_v31 = vpop.eup %4432  ;;  %v873_v30 = vmul.f32 %v4431_v13, %v4965_v11  ;;  %v853_v32 = vpop.xlane.xlu1 %852 }
 0x342   :  { %4442 = vrcp.f32 %v853_v32  ;;  %v850_v2 = vpop.xlane.xlu0 %849  ;;  %v871_v6 = vmul.f32 %v4433_v31, %v4967_v14 }
 0x343   :  { %4444 = vrcp.f32 %v850_v2 }
 0x344   :  { %v4435_v40 = vpop.eup %4434  ;;  %3880 = vmatprep.mubr.msk.f32.mxu1 %vm709_vm2, %v871_v6 }
 0x345   :  { %v4437_v37 = vpop.eup %4436  ;;  %3881 = vmatmul.mubr.msk.f32.vlgmr.msra.gmra.mrb[16].mxu1 %vm709_vm2, %v873_v30  ;;  %v877_v11 = vmul.f32 %v4435_v40, %v4973_v60 }
 0x346   :  { %v875_v14 = vmul.f32 %v4437_v37, %v4975_v62  ;;  %4219 = vmatpush3.bf16.msra.mxu1 %v5003_v41  ;;  %v4360_v41 = vld [vmem:[%s5732_s3 + $0x10] sm:$0xff]  }
 0x347   :  { %4221 = vmatprep.subr.bf16.mxu1 %v4220_v39  ;;  %3896 = vmatprep.subr.bf16.mxu0 %v4360_v41 }
 0x348   :  { %v4439_v10 = vpop.eup %4438  ;;  %3883 = vmatprep.mubr.msk.f32.mxu1 %vm709_vm2, %v875_v14  ;;  %3897 = vmatpush3.bf16.msra.mxu0 %v4360_v41 }
 0x349   :  { %v4441_v19 = vpop.eup %4440  ;;  %3884 = vmatmul.mubr.msk.f32.gmra.mrb[18].mxu1 %vm709_vm2, %v877_v11  ;;  %v881_v18 = vmul.f32 %v4439_v10, %v4981_v46  ;;  %v1415_v46 = vld [vmem:[%s5731_s4 + $0x30] sm:$0xff]  ;;  %3898 = vmatprep.subr.bf16.mxu0 %v4361_v45 }
 0x34a   :  { %v879_v22 = vmul.f32 %v4441_v19, %v4983_v47  ;;  %4223 = vmatpush3.bf16.msra.mxu1 %v4220_v39  ;;  %v1416_v47 = vld [vmem:[%s5731_s4 + $0x38] sm:$0xff] }
 0x34b   :  { %4225 = vmatprep.subr.bf16.mxu1 %v4224_v38 }
 0x34c   :  { %v4443_v26 = vpop.eup %4442  ;;  %3886 = vmatprep.mubr.msk.f32.mxu1 %vm709_vm2, %v879_v22  ;;  %3899 = vmatpush3.bf16.msra.mxu0 %v4361_v45 }
 0x34d   :  { %v4445_v60 = vpop.eup %4444  ;;  %3887 = vmatmul.mubr.msk.f32.gmra.mrb[20].mxu1 %vm709_vm2, %v881_v18  ;;  %v885_v62 = vmul.f32 %v4443_v26, %v4989_v23  ;;  %v4228_v23 = vpack.c.bf16 %v1416_v47, %v1415_v46  ;;  %3900 = vmatprep.subr.bf16.mxu0 %v4362_v51 }
 0x34e   :  { %v883_v33 = vmul.f32 %v4445_v60, %v4991_v56  ;;  %4227 = vmatpush3.bf16.msra.mxu1 %v4224_v38  ;;  %v1417_v56 = vld [vmem:[%s5731_s4 + $0x40] sm:$0xff] }
 0x34f   :  { %4229 = vmatprep.subr.bf16.mxu1 %v4228_v23  ;;  %v4232_v42 = vpack.c.bf16 %v1418_v36, %v1417_v56 }
 0x350   :  { %3889 = vmatprep.mubr.msk.f32.mxu1 %vm709_vm2, %v883_v33  ;;  %3901 = vmatpush3.bf16.msra.mxu0 %v4362_v51 }
 0x351   :  { %3890 = vmatmul.mubr.msk.f32.gmra.mrb[22].mxu1 %vm709_vm2, %v885_v62  ;;  %3902 = vmatprep.subr.bf16.mxu0 %v4363_v54 }
 0x352   :  { %4231 = vmatpush3.bf16.msra.mxu1 %v4228_v23 }
 0x353   :  { %4233 = vmatprep.subr.bf16.mxu1 %v4232_v42 }
 0x354   :  { %3903 = vmatpush3.bf16.msra.mxu0 %v4363_v54 }
 0x355   :  { %3904 = vmatprep.subr.bf16.mxu0 %v4364_v4 }
 0x356   :  { %4235 = vmatpush3.bf16.msra.mxu1 %v4232_v42 }
 0x357   :  { %4237 = vmatprep.subr.bf16.mxu1 %v4236_v48 }
 0x358   :  { %3905 = vmatpush3.bf16.msra.mxu0 %v4364_v4 }
 0x359   :  { %3906 = vmatprep.subr.bf16.mxu0 %v4365_v5 }
 0x35a   :  { %4239 = vmatpush3.bf16.msra.mxu1 %v4236_v48 }
 0x35b   :  { %4241 = vmatprep.subr.bf16.mxu1 %v4240_v53 }
 0x35c   :  { %3907 = vmatpush3.bf16.msra.mxu0 %v4365_v5 }
 0x35e   :  { %4243 = vmatpush3.bf16.msra.mxu1 %v4240_v53 }
 0x35f   :  { %4245 = vmatprep.subr.bf16.mxu1 %v4244_v58 }
 0x362   :  { %4247 = vmatpush3.bf16.msra.mxu1 %v4244_v58 }
 0x3f7   :  { %v3854_v59 = vpop.f32.mrb[16].mxu0 }
 0x3f8   :  { %v1161_v61 = vmin.f32 %v3854_v59, 0.0  ;;  %v976_v0 = vpop.f32.mrb[17].mxu0  ;;  %vm1145_vm5 = vcmp.gt.f32.partialorder %v3854_v59, 0.0 }
 0x3f9   :  { %v1160_v15 = vmin.f32 %v976_v0, 0.0  ;;  %vm1144_vm6 = vcmp.gt.f32.partialorder %v976_v0, 0.0 }
 0x3fa   :  { %v1178_v63 = vmul.f32 1.442695, %v1161_v61 }
 0x3fb   :  { %v1176_v1 = vmul.f32 1.442695, %v1160_v15 }
 0x3fc   :  { %4446 = vpow2.f32 %v1178_v63 }
 0x3fd   :  { %4448 = vpow2.f32 %v1176_v1 }
 0x3fe   :  { %v3857_v3 = vpop.f32.mrb[18].mxu0 }
 0x3ff   :  { %v1163_v52 = vmin.f32 %v3857_v3, 0.0  ;;  %v986_v20 = vpop.f32.mrb[19].mxu0  ;;  %vm1147_vm7 = vcmp.gt.f32.partialorder %v3857_v3, 0.0 }
 0x400   :  { %v1162_v21 = vmin.f32 %v986_v20, 0.0  ;;  %vm1146_vm8 = vcmp.gt.f32.partialorder %v986_v20, 0.0 }
 0x401   :  { %v1182_v24 = vmul.f32 1.442695, %v1163_v52 }
 0x402   :  { %v1180_v25 = vmul.f32 1.442695, %v1162_v21  ;;  %v3860_v7 = vpop.f32.mrb[20].mxu0 }
 0x403   :  { %4450 = vpow2.f32 %v1182_v24  ;;  %v1165_v8 = vmin.f32 %v3860_v7, 0.0  ;;  %v996_v28 = vpop.f32.mrb[21].mxu0  ;;  %vm1149_vm9 = vcmp.gt.f32.partialorder %v3860_v7, 0.0 }
 0x404   :  { %4452 = vpow2.f32 %v1180_v25  ;;  %v1164_v27 = vmin.f32 %v996_v28, 0.0  ;;  %vm1148_vm10 = vcmp.gt.f32.partialorder %v996_v28, 0.0 }
 0x405   :  { %v1186_v13 = vmul.f32 1.442695, %v1165_v8 }
 0x406   :  { %v4447_v29 = vpop.eup %4446  ;;  %v1184_v35 = vmul.f32 1.442695, %v1164_v27  ;;  %v3863_v31 = vpop.f32.mrb[22].mxu0 }
 0x407   :  { %v4449_v30 = vpop.eup %4448  ;;  %v3492_v32 = vadd.f32 -1.0, %v4447_v29  ;;  %4454 = vpow2.f32 %v1186_v13  ;;  %v1167_v2 = vmin.f32 %v3863_v31, 0.0  ;;  %v1006_v6 = vpop.f32.mrb[23].mxu0  ;;  %vm1151_vm11 = vcmp.gt.f32.partialorder %v3863_v31, 0.0 }
 0x408   :  { %4456 = vpow2.f32 %v1184_v35  ;;  %v1166_v39 = vmin.f32 %v1006_v6, 0.0  ;;  %v3491_v40 = vadd.f32 -1.0, %v4449_v30  ;;  %vm1150_vm12 = vcmp.gt.f32.partialorder %v1006_v6, 0.0 }
 0x409   :  { %v1225_v17 = vsel %vm1145_vm5, %v3854_v59, %v3492_v32  ;;  %v1190_v12 = vmul.f32 1.442695, %v1167_v2 }
 0x40a   :  { %v1188_v37 = vmul.f32 1.442695, %v1166_v39  ;;  %v1224_v11 = vsel %vm1144_vm6, %v976_v0, %v3491_v40 }
 0x40b   :  { %4458 = vpow2.f32 %v1190_v12  ;;  %v1240_v14 = vpack.c.bf16 %v1225_v17, %v1224_v11  ;;  %3956 = vmatprep.mubr.f32.mxu1 %v1224_v11 }
 0x40c   :  { %4460 = vpow2.f32 %v1188_v37  ;;  %3957 = vmatmul.mubr.f32.vlgmr.msra.gmra.mrb[24].mxu1 %v1225_v17 }
 0x40d   :  { %v4451_v38 = vpop.eup %4450  ;;  %3908 = vmatprep.mubr.bf16.mxu0 %v1240_v14 }
 0x40e   :  { %v4453_v10 = vpop.eup %4452  ;;  %v3494_v19 = vadd.f32 -1.0, %v4451_v38 }
 0x40f   :  { %v3493_v18 = vadd.f32 -1.0, %v4453_v10 }
 0x410   :  { %v1227_v22 = vsel %vm1147_vm7, %v3857_v3, %v3494_v19 }
 0x411   :  { %v4455_v26 = vpop.eup %4454  ;;  %v1226_v60 = vsel %vm1146_vm8, %v986_v20, %v3493_v18 }
 0x412   :  { %v4457_v62 = vpop.eup %4456  ;;  %3959 = vmatprep.mubr.f32.mxu1 %v1226_v60  ;;  %v1241_v33 = vpack.c.bf16 %v1227_v22, %v1226_v60  ;;  %v3496_v46 = vadd.f32 -1.0, %v4455_v26 }
 0x413   :  { %3960 = vmatmul.mubr.f32.gmra.mrb[26].mxu1 %v1227_v22  ;;  %v3495_v47 = vadd.f32 -1.0, %v4457_v62 }
 0x414   :  { %3909 = vmatmul.mubr.bf16.vlgmr.msra.gmra.mrb[24].mxu0 %v1241_v33  ;;  %v1229_v34 = vsel %vm1149_vm9, %v3860_v7, %v3496_v46 }
 0x415   :  { %v4459_v23 = vpop.eup %4458  ;;  %v1228_v56 = vsel %vm1148_vm10, %v996_v28, %v3495_v47 }
 0x416   :  { %v4461_v36 = vpop.eup %4460  ;;  %3962 = vmatprep.mubr.f32.mxu1 %v1228_v56  ;;  %v1242_v41 = vpack.c.bf16 %v1229_v34, %v1228_v56  ;;  %v3498_v42 = vadd.f32 -1.0, %v4459_v23 }
 0x417   :  { %3963 = vmatmul.mubr.f32.gmra.mrb[28].mxu1 %v1229_v34  ;;  %v3497_v43 = vadd.f32 -1.0, %v4461_v36 }
 0x418   :  { %v3882_v44 = vpop.f32.mrb[16].mxu1  ;;  %3912 = vmatprep.mubr.bf16.mxu0 %v1242_v41  ;;  %v1231_v45 = vsel %vm1151_vm11, %v3863_v31, %v3498_v42 }
 0x419   :  { %v1169_v48 = vmin.f32 %v3882_v44, 0.0  ;;  %v1105_v49 = vpop.f32.mrb[17].mxu1  ;;  %v1230_v50 = vsel %vm1150_vm12, %v1006_v6, %v3497_v43  ;;  %vm1153_vm13 = vcmp.gt.f32.partialorder %v3882_v44, 0.0 }
 0x41a   :  { %v1168_v51 = vmin.f32 %v1105_v49, 0.0  ;;  %3965 = vmatprep.mubr.f32.mxu1 %v1230_v50  ;;  %v1243_v53 = vpack.c.bf16 %v1231_v45, %v1230_v50  ;;  %vm1152_vm14 = vcmp.gt.f32.partialorder %v1105_v49, 0.0 }
 0x41b   :  { %v1194_v54 = vmul.f32 1.442695, %v1169_v48  ;;  %3966 = vmatmul.mubr.f32.gmra.mrb[30].mxu1 %v1231_v45 }
 0x41c   :  { %v1192_v55 = vmul.f32 1.442695, %v1168_v51  ;;  %v3885_v57 = vpop.f32.mrb[18].mxu1  ;;  %3913 = vmatmul.mubr.bf16.gmra.mrb[28].mxu0 %v1243_v53 }
 0x41d   :  { %4462 = vpow2.f32 %v1194_v54  ;;  %v1171_v58 = vmin.f32 %v3885_v57, 0.0  ;;  %v1115_v4 = vpop.f32.mrb[19].mxu1  ;;  %vm1155_vm15 = vcmp.gt.f32.partialorder %v3885_v57, 0.0 }
 0x41e   :  { %4464 = vpow2.f32 %v1192_v55  ;;  %v1170_v5 = vmin.f32 %v1115_v4, 0.0  ;;  %vm1154_vm0 = vcmp.gt.f32.partialorder %v1115_v4, 0.0 }
 0x41f   :  { %v1198_v59 = vmul.f32 1.442695, %v1171_v58 }
 0x420   :  { %v1196_v61 = vmul.f32 1.442695, %v1170_v5  ;;  %v3888_v0 = vpop.f32.mrb[20].mxu1 }
 0x421   :  { %4466 = vpow2.f32 %v1198_v59  ;;  %v1173_v15 = vmin.f32 %v3888_v0, 0.0  ;;  %v1125_v63 = vpop.f32.mrb[21].mxu1  ;;  %vm1157_vm3 = vcmp.gt.f32.partialorder %v3888_v0, 0.0 }
 0x422   :  { %4468 = vpow2.f32 %v1196_v61  ;;  %v1172_v1 = vmin.f32 %v1125_v63, 0.0  ;;  %vm1156_vm4 = vcmp.gt.f32.partialorder %v1125_v63, 0.0 }
 0x423   :  { %v1202_v3 = vmul.f32 1.442695, %v1173_v15 }
 0x424   :  { %v1200_v52 = vmul.f32 1.442695, %v1172_v1  ;;  %v3891_v20 = vpop.f32.mrb[22].mxu1 }
 0x425   :  { %4470 = vpow2.f32 %v1202_v3  ;;  %v1175_v21 = vmin.f32 %v3891_v20, 0.0  ;;  %v1135_v24 = vpop.f32.mrb[23].mxu1  ;;  %vm1159_vm5 = vcmp.gt.f32.partialorder %v3891_v20, 0.0 }
 0x426   :  { %4472 = vpow2.f32 %v1200_v52  ;;  %v1174_v25 = vmin.f32 %v1135_v24, 0.0  ;;  %vm1158_vm6 = vcmp.gt.f32.partialorder %v1135_v24, 0.0 }
 0x427   :  { %v4463_v7 = vpop.eup %4462  ;;  %v1206_v8 = vmul.f32 1.442695, %v1175_v21 }
 0x428   :  { %v4465_v28 = vpop.eup %4464  ;;  %v1204_v27 = vmul.f32 1.442695, %v1174_v25  ;;  %v3500_v13 = vadd.f32 -1.0, %v4463_v7 }
 0x429   :  { %4474 = vpow2.f32 %v1206_v8  ;;  %v3499_v29 = vadd.f32 -1.0, %v4465_v28 }
 0x42a   :  { %4476 = vpow2.f32 %v1204_v27  ;;  %v1233_v35 = vsel %vm1153_vm13, %v3882_v44, %v3500_v13 }
 0x42b   :  { %v4467_v31 = vpop.eup %4466  ;;  %v1232_v30 = vsel %vm1152_vm14, %v1105_v49, %v3499_v29 }
 0x42c   :  { %v4469_v32 = vpop.eup %4468  ;;  %3968 = vmatprep.mubr.f32.mxu1 %v1232_v30  ;;  %v1244_v2 = vpack.c.bf16 %v1233_v35, %v1232_v30  ;;  %v3502_v6 = vadd.f32 -1.0, %v4467_v31 }
 0x42d   :  { %3969 = vmatmul.mubr.f32.gmra.mrb[32].mxu1 %v1233_v35  ;;  %v3501_v39 = vadd.f32 -1.0, %v4469_v32 }
 0x42e   :  { %3916 = vmatprep.mubr.bf16.mxu0 %v1244_v2  ;;  %v1235_v40 = vsel %vm1155_vm15, %v3885_v57, %v3502_v6 }
 0x42f   :  { %v4471_v17 = vpop.eup %4470  ;;  %v1234_v12 = vsel %vm1154_vm0, %v1115_v4, %v3501_v39 }
 0x430   :  { %v4473_v37 = vpop.eup %4472  ;;  %3971 = vmatprep.mubr.f32.mxu1 %v1234_v12  ;;  %v1245_v11 = vpack.c.bf16 %v1235_v40, %v1234_v12  ;;  %v3504_v14 = vadd.f32 -1.0, %v4471_v17 }
 0x431   :  { %3972 = vmatmul.mubr.f32.gmra.mrb[34].mxu1 %v1235_v40  ;;  %v3503_v38 = vadd.f32 -1.0, %v4473_v37 }
 0x432   :  { %3917 = vmatmul.mubr.bf16.gmra.mrb[32].mxu0 %v1245_v11  ;;  %v1237_v10 = vsel %vm1157_vm3, %v3888_v0, %v3504_v14 }
 0x433   :  { %v4475_v19 = vpop.eup %4474  ;;  %v1236_v18 = vsel %vm1156_vm4, %v1125_v63, %v3503_v38 }
 0x434   :  { %v4477_v22 = vpop.eup %4476  ;;  %3974 = vmatprep.mubr.f32.mxu1 %v1236_v18  ;;  %v1246_v26 = vpack.c.bf16 %v1237_v10, %v1236_v18  ;;  %v3506_v60 = vadd.f32 -1.0, %v4475_v19 }
 0x435   :  { %3975 = vmatmul.mubr.f32.gmra.mrb[36].mxu1 %v1237_v10  ;;  %v3505_v62 = vadd.f32 -1.0, %v4477_v22 }
 0x436   :  { %3920 = vmatprep.mubr.bf16.mxu0 %v1246_v26  ;;  %v1239_v33 = vsel %vm1159_vm5, %v3891_v20, %v3506_v60 }
 0x437   :  { %v1238_v46 = vsel %vm1158_vm6, %v1135_v24, %v3505_v62 }
 0x438   :  { %3977 = vmatprep.mubr.f32.mxu1 %v1238_v46  ;;  %v1247_v47 = vpack.c.bf16 %v1239_v33, %v1238_v46 }
 0x439   :  { %3978 = vmatmul.mubr.f32.gmra.mrb[38].mxu1 %v1239_v33 }
 0x43a   :  { %3921 = vmatmul.mubr.bf16.gmra.mrb[36].mxu0 %v1247_v47 }
 0x4df   :  { %v3958_v34 = vpop.f32.mrb[24].mxu1 }
 0x4e0   :  { %1703 = vperm.xlu0 %4348, %v3958_v34   ;;  %1588 = vrot.lane.b32.xlu1 %v3958_v34, %s4639_s0  ;;  %v1491_v23 = vpop.f32.mrb[25].mxu1 }
 0x4e4   :  { %1699 = vperm.xlu1 %4347, %v1491_v23   ;;  %1586 = vrot.lane.b32.xlu0 %v1491_v23, %s4639_s0 }
 0x4e6   :  { %v3961_v56 = vpop.f32.mrb[26].mxu1 }
 0x4e7   :  { %v3910_v36 = vpop.f32.mrb[24].mxu0  ;;  %v1501_v41 = vpop.f32.mrb[27].mxu1 }
 0x4e8   :  { %1592 = vrot.lane.b32.xlu0 %v3961_v56, %s4639_s0  ;;  %1590 = vrot.lane.b32.xlu1 %v1501_v41, %s4639_s0  ;;  %v1346_v42 = vpop.f32.mrb[25].mxu0 }
 0x4e9   :  { %v3911_v43 = vpop.f32.mrb[26].mxu0 }
 0x4ea   :  { %v4252_v44 = vpack.c.bf16 %v3911_v43, %v3910_v36  ;;  %v1349_v45 = vpop.f32.mrb[27].mxu0  ;;  %v3964_v48 = vpop.f32.mrb[28].mxu1 }
 0x4eb   :  { %v4248_v49 = vpack.c.bf16 %v1349_v45, %v1346_v42  ;;  %v1511_v50 = vpop.f32.mrb[29].mxu1 }
 0x4ec   :  { %1711 = vperm.xlu0 %4348, %v3961_v56   ;;  %1707 = vperm.xlu1 %4347, %v1501_v41  }
 0x4ed   :  { %4249 = vmatprep.subr.bf16.mxu0 %v4248_v49 }
 0x4ee   :  { %v3967_v51 = vpop.f32.mrb[30].mxu1  ;;  %4251 = vmatpush3.bf16.msra.mxu0 %v4248_v49 }
 0x4ef   :  { %v3914_v53 = vpop.f32.mrb[28].mxu0  ;;  %v1521_v54 = vpop.f32.mrb[31].mxu1  ;;  %4253 = vmatprep.subr.bf16.mxu0 %v4252_v44 }
 0x4f0   :  { %1596 = vrot.lane.b32.xlu0 %v3964_v48, %s4639_s0  ;;  %1594 = vrot.lane.b32.xlu1 %v1511_v50, %s4639_s0  ;;  %v1362_v55 = vpop.f32.mrb[29].mxu0 }
 0x4f1   :  { %v3915_v57 = vpop.f32.mrb[30].mxu0 }
 0x4f2   :  { %v4260_v58 = vpack.c.bf16 %v3915_v57, %v3914_v53  ;;  %v1365_v4 = vpop.f32.mrb[31].mxu0  ;;  %4255 = vmatpush3.bf16.msra.mxu0 %v4252_v44 }
 0x4f3   :  { %v4256_v5 = vpack.c.bf16 %v1365_v4, %v1362_v55 }
 0x4f4   :  { %1719 = vperm.xlu0 %4348, %v3964_v48   ;;  %1715 = vperm.xlu1 %4347, %v1511_v50  }
 0x4f5   :  { %4257 = vmatprep.subr.bf16.mxu0 %v4256_v5 }
 0x4f6   :  { %4259 = vmatpush3.bf16.msra.mxu0 %v4256_v5 }
 0x4f7   :  { %4261 = vmatprep.subr.bf16.mxu0 %v4260_v58 }
 0x4f8   :  { %1600 = vrot.lane.b32.xlu0 %v3967_v51, %s4639_s0  ;;  %1598 = vrot.lane.b32.xlu1 %v1521_v54, %s4639_s0 }
 0x4fa   :  { %4263 = vmatpush3.bf16.msra.mxu0 %v4260_v58 }
 0x4fc   :  { %1727 = vperm.xlu0 %4348, %v3967_v51   ;;  %1723 = vperm.xlu1 %4347, %v1521_v54  }
 0x500   :  { %v3970_v59 = vpop.f32.mrb[32].mxu1 }
 0x501   :  { %1604 = vrot.lane.b32.xlu0 %v3970_v59, %s4639_s0  ;;  %v1531_v61 = vpop.f32.mrb[33].mxu1 }
 0x502   :  { %1602 = vrot.lane.b32.xlu1 %v1531_v61, %s4639_s0 }
 0x504   :  { %v3973_v0 = vpop.f32.mrb[34].mxu1 }
 0x505   :  { %1735 = vperm.xlu0 %4348, %v3970_v59   ;;  %v3918_v15 = vpop.f32.mrb[32].mxu0  ;;  %v1541_v63 = vpop.f32.mrb[35].mxu1 }
 0x506   :  { %1731 = vperm.xlu1 %4347, %v1531_v61   ;;  %v1378_v1 = vpop.f32.mrb[33].mxu0 }
 0x507   :  { %v3919_v3 = vpop.f32.mrb[34].mxu0 }
 0x508   :  { %v4268_v52 = vpack.c.bf16 %v3919_v3, %v3918_v15  ;;  %v1381_v20 = vpop.f32.mrb[35].mxu0  ;;  %v3976_v21 = vpop.f32.mrb[36].mxu1 }
 0x509   :  { %v4264_v24 = vpack.c.bf16 %v1381_v20, %v1378_v1  ;;  %1608 = vrot.lane.b32.xlu0 %v3973_v0, %s4639_s0  ;;  %v1551_v25 = vpop.f32.mrb[37].mxu1 }
 0x50a   :  { %1606 = vrot.lane.b32.xlu1 %v1541_v63, %s4639_s0 }
 0x50b   :  { %4265 = vmatprep.subr.bf16.mxu1 %v4264_v24 }
 0x50c   :  { %v3979_v7 = vpop.f32.mrb[38].mxu1  ;;  %4267 = vmatpush3.bf16.msra.mxu1 %v4264_v24 }
 0x50d   :  { %1743 = vperm.xlu0 %4348, %v3973_v0   ;;  %v3922_v8 = vpop.f32.mrb[36].mxu0  ;;  %v1561_v28 = vpop.f32.mrb[39].mxu1  ;;  %4269 = vmatprep.subr.bf16.mxu1 %v4268_v52 }
 0x50e   :  { %1739 = vperm.xlu1 %4347, %v1541_v63   ;;  %v1394_v27 = vpop.f32.mrb[37].mxu0 }
 0x50f   :  { %v3923_v13 = vpop.f32.mrb[38].mxu0 }
 0x510   :  { %v4276_v29 = vpack.c.bf16 %v3923_v13, %v3922_v8  ;;  %v1397_v35 = vpop.f32.mrb[39].mxu0  ;;  %4271 = vmatpush3.bf16.msra.mxu1 %v4268_v52 }
 0x511   :  { %v4272_v31 = vpack.c.bf16 %v1397_v35, %v1394_v27  ;;  %1612 = vrot.lane.b32.xlu0 %v3976_v21, %s4639_s0 }
 0x512   :  { %1610 = vrot.lane.b32.xlu1 %v1551_v25, %s4639_s0 }
 0x513   :  { %4273 = vmatprep.subr.bf16.mxu1 %v4272_v31 }
 0x514   :  { %4275 = vmatpush3.bf16.msra.mxu1 %v4272_v31 }
 0x515   :  { %1751 = vperm.xlu0 %4348, %v3976_v21   ;;  %4277 = vmatprep.subr.bf16.mxu1 %v4276_v29 }
 0x516   :  { %1747 = vperm.xlu1 %4347, %v1551_v25  }
 0x518   :  { %4279 = vmatpush3.bf16.msra.mxu1 %v4276_v29 }
 0x519   :  { %1616 = vrot.lane.b32.xlu0 %v3979_v7, %s4639_s0 }
 0x51a   :  { %1614 = vrot.lane.b32.xlu1 %v1561_v28, %s4639_s0 }
 0x51d   :  { %1755 = vperm.xlu0 %4348, %v1561_v28  }
 0x521   :  { %1759 = vperm.xlu0 %4348, %v3979_v7  }
 0x552   :  { %v1589_v30 = vpop.permute.xlu1 %1588 }
 0x55f   :  { %v1704_v32 = vpop.permute.xlu0 %1703 }
 0x563   :  { %v1700_v2 = vpop.permute.xlu1 %1699  ;;  %v1587_v6 = vpop.permute.xlu0 %1586 }
 0x564   :  { %1634 = vxpose.xlu1.b32.start [1/8] (short) (narrow) %v1587_v6, 8 }
 0x567   :  { %v1593_v39 = vpop.permute.xlu0 %1592  ;;  %v1591_v40 = vpop.permute.xlu1 %1590 }
 0x568   :  { %1635 = vxpose.xlu1.b32.cont [2/8] (short) (narrow) %v1589_v30, 8 }
 0x56b   :  { %v1712_v17 = vpop.permute.xlu0 %1711  ;;  %v1708_v12 = vpop.permute.xlu1 %1707 }
 0x56c   :  { %1636 = vxpose.xlu1.b32.cont [3/8] (short) (narrow) %v1591_v40, 8 }
 0x56f   :  { %v1597_v37 = vpop.permute.xlu0 %1596  ;;  %v1595_v11 = vpop.permute.xlu1 %1594 }
 0x570   :  { %1637 = vxpose.xlu1.b32.cont [4/8] (short) (narrow) %v1593_v39, 8 }
 0x573   :  { %v1720_v14 = vpop.permute.xlu0 %1719  ;;  %v1716_v38 = vpop.permute.xlu1 %1715 }
 0x574   :  { %1638 = vxpose.xlu1.b32.cont [5/8] (short) (narrow) %v1595_v11, 8 }
 0x577   :  { %v1601_v10 = vpop.permute.xlu0 %1600  ;;  %v1599_v19 = vpop.permute.xlu1 %1598 }
 0x578   :  { %1639 = vxpose.xlu1.b32.cont [6/8] (short) (narrow) %v1597_v37, 8 }
 0x57b   :  { %v1728_v18 = vpop.permute.xlu0 %1727  ;;  %v1724_v22 = vpop.permute.xlu1 %1723 }
 0x57c   :  { %1640 = vxpose.xlu1.b32.cont [7/8] (short) (narrow) %v1599_v19, 8 }
 0x57f   :  { %v1605_v26 = vpop.permute.xlu0 %1604  ;;  %v1603_v60 = vpop.permute.xlu1 %1602 }
 0x580   :  { %1666 = vxpose.xlu0.b32.start [1/8] (short) (narrow) %v1603_v60, 8  ;;  %1641 = vxpose.xlu1.b32.end [8/8] (short) (narrow) %v1601_v10, 8 }
 0x584   :  { %v5121_v62 = vpop.permute.xlu0 %1735  ;;  %1667 = vxpose.xlu0.b32.cont [2/8] (short) (narrow) %v1605_v26, 8 }
 0x585   :  { %v5123_v33 = vpop.permute.xlu1 %1731 }
 0x588   :  { %v1609_v46 = vpop.permute.xlu0 %1608 }
 0x589   :  { %v1607_v47 = vpop.permute.xlu1 %1606 }
 0x58a   :  { %1668 = vxpose.xlu0.b32.cont [3/8] (short) (narrow) %v1607_v47, 8 }
 0x58c   :  { %v5125_v34 = vpop.permute.xlu0 %1743 }
 0x58d   :  { %v5127_v23 = vpop.permute.xlu1 %1739 }
 0x58e   :  { %1669 = vxpose.xlu0.b32.cont [4/8] (short) (narrow) %v1609_v46, 8 }
 0x590   :  { %v1613_v56 = vpop.permute.xlu0 %1612 }
 0x591   :  { %v1611_v36 = vpop.permute.xlu1 %1610 }
 0x592   :  { %1670 = vxpose.xlu0.b32.cont [5/8] (short) (narrow) %v1611_v36, 8 }
 0x594   :  { %v5131_v42 = vpop.permute.xlu0 %1751 }
 0x595   :  { %v5129_v41 = vpop.permute.xlu1 %1747 }
 0x596   :  { %1671 = vxpose.xlu0.b32.cont [6/8] (short) (narrow) %v1613_v56, 8 }
 0x598   :  { %v1617_v44 = vpop.permute.xlu0 %1616 }
 0x599   :  { %v1615_v43 = vpop.permute.xlu1 %1614 }
 0x59a   :  { %1672 = vxpose.xlu0.b32.cont [7/8] (short) (narrow) %v1615_v43, 8 }
 0x59e   :  { %1673 = vxpose.xlu0.b32.end [8/8] (short) (narrow) %v1617_v44, 8 }
 0x5e4   :  { %v1650_v45 = vpop.trf.xlu1 }
 0x5e5   :  { %v1765_v48 = vrot.slane %v1650_v45, %v4807_v16 }
 0x5e7   :  { %v1771_v49 = vadd.f32 %v1765_v48, %v1704_v32  ;;  %v1770_v50 = vadd.f32 %v1765_v48, %v1700_v2  ;;  %v1774_v51 = vadd.f32 %v1765_v48, %v1716_v38  ;;  %v1772_v53 = vadd.f32 %v1765_v48, %v1708_v12  ;;  %v1756_v12 = vpop.permute.xlu0 %1755 }
 0x5e8   :  { %v1776_v54 = vadd.f32 %v1765_v48, %v1724_v22  ;;  %v1773_v55 = vadd.f32 %v1765_v48, %v1712_v17  ;;  %v1775_v57 = vadd.f32 %v1765_v48, %v1720_v14  ;;  %v1777_v28 = vadd.f32 %v1765_v48, %v1728_v18 }
 0x5e9   :  { %vm1787_vm7 = vcmp.gt.f32.partialorder %v1771_v49, 0.0  ;;  %v1803_v58 = vmul.f32 0.3, %v1771_v49  ;;  %vm1786_vm8 = vcmp.gt.f32.partialorder %v1770_v50, 0.0  ;;  %v1802_v4 = vmul.f32 0.3, %v1770_v50 }
 0x5ea   :  { %vm1790_vm9 = vcmp.gt.f32.partialorder %v1774_v51, 0.0  ;;  %v1806_v5 = vmul.f32 0.3, %v1774_v51  ;;  %vm1788_vm10 = vcmp.gt.f32.partialorder %v1772_v53, 0.0  ;;  %v1804_v59 = vmul.f32 0.3, %v1772_v53 }
 0x5eb   :  { %v1819_v61 = vsel %vm1787_vm7, %v1771_v49, %v1803_v58  ;;  %v1818_v0 = vsel %vm1786_vm8, %v1770_v50, %v1802_v4  ;;  %vm1792_vm11 = vcmp.gt.f32.partialorder %v1776_v54, 0.0  ;;  %v1808_v15 = vmul.f32 0.3, %v1776_v54  ;;  %v1760_v38 = vpop.permute.xlu0 %1759 }
 0x5ec   :  { %v5136_v63 = vsel %vm29_vm1, %v1819_v61, -1e+30  ;;  %v5140_v1 = vsel %vm29_vm1, %v1818_v0, -1e+30  ;;  %v1822_v3 = vsel %vm1790_vm9, %v1774_v51, %v1806_v5  ;;  %v1820_v52 = vsel %vm1788_vm10, %v1772_v53, %v1804_v59 }
 0x5ed   :  { %v1853_v20 = vsel %vm709_vm2, %v5136_v63, -inf  ;;  %v1850_v21 = vsel %vm709_vm2, %v5140_v1, -inf  ;;  %v5148_v24 = vsel %vm29_vm1, %v1822_v3, -1e+30  ;;  %v5152_v25 = vsel %vm29_vm1, %v1820_v52, -1e+30 }
 0x5ee   :  { %1854 = vmax.xlane.f32.xlu0 %v1853_v20  ;;  %1851 = vmax.xlane.f32.xlu1 %v1850_v21  ;;  %vm1789_vm12 = vcmp.gt.f32.partialorder %v1773_v55, 0.0  ;;  %v1824_v7 = vsel %vm1792_vm11, %v1776_v54, %v1808_v15  ;;  %v1805_v8 = vmul.f32 0.3, %v1773_v55  ;;  %vm1791_vm13 = vcmp.gt.f32.partialorder %v1775_v57, 0.0 }
 0x5ef   :  { %v1807_v27 = vmul.f32 0.3, %v1775_v57  ;;  %v1862_v13 = vsel %vm709_vm2, %v5148_v24, -inf  ;;  %v1856_v29 = vsel %vm709_vm2, %v5152_v25, -inf  ;;  %v5160_v31 = vsel %vm29_vm1, %v1824_v7, -1e+30 }
 0x5f0   :  { %v1821_v35 = vsel %vm1789_vm12, %v1773_v55, %v1805_v8  ;;  %v1809_v2 = vmul.f32 0.3, %v1777_v28  ;;  %vm1793_vm14 = vcmp.gt.f32.partialorder %v1777_v28, 0.0  ;;  %v1868_v6 = vsel %vm709_vm2, %v5160_v31, -inf }
 0x5f1   :  { %v5164_v30 = vsel %vm29_vm1, %v1821_v35, -1e+30  ;;  %v1823_v32 = vsel %vm1791_vm13, %v1775_v57, %v1807_v27 }
 0x5f2   :  { %1863 = vmax.xlane.f32.xlu0 %v1862_v13  ;;  %1857 = vmax.xlane.f32.xlu1 %v1856_v29  ;;  %v1859_v39 = vsel %vm709_vm2, %v5164_v30, -inf  ;;  %v5172_v40 = vsel %vm29_vm1, %v1823_v32, -1e+30  ;;  %v1825_v17 = vsel %vm1793_vm14, %v1777_v28, %v1809_v2 }
 0x5f3   :  { %v1865_v37 = vsel %vm709_vm2, %v5172_v40, -inf  ;;  %v5178_v11 = vsel %vm29_vm1, %v1825_v17, -1e+30 }
 0x5f4   :  { %v1871_v14 = vsel %vm709_vm2, %v5178_v11, -inf }
 0x5f6   :  { %1869 = vmax.xlane.f32.xlu0 %v1868_v6  ;;  %1860 = vmax.xlane.f32.xlu1 %v1859_v39 }
 0x5fa   :  { %1866 = vmax.xlane.f32.xlu1 %v1865_v37 }
 0x5fe   :  { %1872 = vmax.xlane.f32.xlu1 %v1871_v14 }
 0x602   :  { %v1682_v10 = vpop.trf.xlu0 }
 0x603   :  { %v1769_v19 = vrot.slane %v1682_v10, %v4807_v16 }
 0x605   :  { %v1778_v18 = vadd.f32 %v1769_v19, %v5123_v33  ;;  %v1779_v22 = vadd.f32 %v1769_v19, %v5121_v62  ;;  %v1780_v26 = vadd.f32 %v1769_v19, %v5127_v23  ;;  %v1781_v60 = vadd.f32 %v1769_v19, %v5125_v34 }
 0x606   :  { %v1782_v46 = vadd.f32 %v1769_v19, %v5129_v41  ;;  %v1783_v47 = vadd.f32 %v1769_v19, %v5131_v42  ;;  %v1784_v56 = vadd.f32 %v1769_v19, %v1756_v12  ;;  %v1785_v36 = vadd.f32 %v1769_v19, %v1760_v38 }
 0x607   :  { %vm1794_vm15 = vcmp.gt.f32.partialorder %v1778_v18, 0.0  ;;  %v1810_v43 = vmul.f32 0.3, %v1778_v18  ;;  %vm1795_vm0 = vcmp.gt.f32.partialorder %v1779_v22, 0.0  ;;  %v1811_v44 = vmul.f32 0.3, %v1779_v22 }
 0x608   :  { %vm1796_vm3 = vcmp.gt.f32.partialorder %v1780_v26, 0.0  ;;  %v1812_v45 = vmul.f32 0.3, %v1780_v26  ;;  %vm1797_vm4 = vcmp.gt.f32.partialorder %v1781_v60, 0.0  ;;  %v1813_v33 = vmul.f32 0.3, %v1781_v60 }
 0x609   :  { %v1826_v48 = vsel %vm1794_vm15, %v1778_v18, %v1810_v43  ;;  %v1827_v62 = vsel %vm1795_vm0, %v1779_v22, %v1811_v44  ;;  %vm1798_vm5 = vcmp.gt.f32.partialorder %v1782_v46, 0.0  ;;  %v1814_v23 = vmul.f32 0.3, %v1782_v46 }
 0x60a   :  { %v5191_v34 = vsel %vm29_vm1, %v1826_v48, -1e+30  ;;  %v5195_v41 = vsel %vm29_vm1, %v1827_v62, -1e+30  ;;  %v1828_v42 = vsel %vm1796_vm3, %v1780_v26, %v1812_v45  ;;  %v1829_v49 = vsel %vm1797_vm4, %v1781_v60, %v1813_v33 }
 0x60b   :  { %v1874_v50 = vsel %vm709_vm2, %v5191_v34, -inf  ;;  %v1877_v51 = vsel %vm709_vm2, %v5195_v41, -inf  ;;  %v5203_v53 = vsel %vm29_vm1, %v1828_v42, -1e+30  ;;  %v5207_v54 = vsel %vm29_vm1, %v1829_v49, -1e+30 }
 0x60c   :  { %1875 = vmax.xlane.f32.xlu0 %v1874_v50  ;;  %1878 = vmax.xlane.f32.xlu1 %v1877_v51  ;;  %vm1799_vm6 = vcmp.gt.f32.partialorder %v1783_v47, 0.0  ;;  %v1830_v55 = vsel %vm1798_vm5, %v1782_v46, %v1814_v23  ;;  %v1815_v57 = vmul.f32 0.3, %v1783_v47  ;;  %vm1800_vm7 = vcmp.gt.f32.partialorder %v1784_v56, 0.0 }
 0x60d   :  { %v1816_v58 = vmul.f32 0.3, %v1784_v56  ;;  %vm1801_vm8 = vcmp.gt.f32.partialorder %v1785_v36, 0.0  ;;  %v1817_v4 = vmul.f32 0.3, %v1785_v36  ;;  %v1880_v5 = vsel %vm709_vm2, %v5203_v53, -inf }
 0x60e   :  { %v1883_v59 = vsel %vm709_vm2, %v5207_v54, -inf  ;;  %v1831_v61 = vsel %vm1799_vm6, %v1783_v47, %v1815_v57  ;;  %v5215_v0 = vsel %vm29_vm1, %v1830_v55, -1e+30 }
 0x60f   :  { %v5219_v15 = vsel %vm29_vm1, %v1831_v61, -1e+30  ;;  %v1832_v3 = vsel %vm1800_vm7, %v1784_v56, %v1816_v58  ;;  %v1833_v52 = vsel %vm1801_vm8, %v1785_v36, %v1817_v4  ;;  %v1886_v20 = vsel %vm709_vm2, %v5215_v0, -inf }
 0x610   :  { %1881 = vmax.xlane.f32.xlu0 %v1880_v5  ;;  %1884 = vmax.xlane.f32.xlu1 %v1883_v59  ;;  %v1889_v21 = vsel %vm709_vm2, %v5219_v15, -inf  ;;  %v5227_v7 = vsel %vm29_vm1, %v1832_v3, -1e+30  ;;  %v5231_v8 = vsel %vm29_vm1, %v1833_v52, -1e+30 }
 0x611   :  { %v1892_v28 = vsel %vm709_vm2, %v5227_v7, -inf  ;;  %v1895_v27 = vsel %vm709_vm2, %v5231_v8, -inf }
 0x614   :  { %1887 = vmax.xlane.f32.xlu0 %v1886_v20  ;;  %1890 = vmax.xlane.f32.xlu1 %v1889_v21 }
 0x618   :  { %1893 = vmax.xlane.f32.xlu0 %v1892_v28  ;;  %1896 = vmax.xlane.f32.xlu1 %v1895_v27 }
 0x67b   :  { %v1855_v13 = vpop.xlane.xlu0 %1854  ;;  %v1852_v29 = vpop.xlane.xlu1 %1851 }
 0x67c   :  { %v1899_v35 = vsub.f32 %v5136_v63, %v1855_v13  ;;  %v1898_v32 = vsub.f32 %v5140_v1, %v1852_v29 }
 0x67e   :  { %v1916_v2 = vmul.f32 1.442695, %v1899_v35  ;;  %v1914_v6 = vmul.f32 1.442695, %v1898_v32 }
 0x67f   :  { %v1864_v39 = vpop.xlane.xlu0 %1863  ;;  %v1858_v17 = vpop.xlane.xlu1 %1857 }
 0x680   :  { %4478 = vpow2.f32 %v1916_v2  ;;  %v1902_v12 = vsub.f32 %v5148_v24, %v1864_v39  ;;  %v1900_v37 = vsub.f32 %v5152_v25, %v1858_v17 }
 0x681   :  { %4480 = vpow2.f32 %v1914_v6 }
 0x682   :  { %v1918_v14 = vmul.f32 1.442695, %v1900_v37  ;;  %v1922_v38 = vmul.f32 1.442695, %v1902_v12 }
 0x683   :  { %v1870_v10 = vpop.xlane.xlu0 %1869  ;;  %v1861_v19 = vpop.xlane.xlu1 %1860 }
 0x684   :  { %v1904_v18 = vsub.f32 %v5160_v31, %v1870_v10  ;;  %v1901_v63 = vsub.f32 %v5164_v30, %v1861_v19  ;;  %4482 = vpow2.f32 %v1918_v14 }
 0x685   :  { %4484 = vpow2.f32 %v1922_v38 }
 0x686   :  { %v1920_v1 = vmul.f32 1.442695, %v1901_v63  ;;  %v1926_v22 = vmul.f32 1.442695, %v1904_v18 }
 0x687   :  { %v1867_v26 = vpop.xlane.xlu1 %1866 }
 0x688   :  { %v1903_v60 = vsub.f32 %v5172_v40, %v1867_v26  ;;  %4486 = vpow2.f32 %v1920_v1  ;;  %v2549_v26 = vld [vmem:[%s5733_s6] sm:$0xff] }
 0x689   :  { %4488 = vpow2.f32 %v1926_v22 }
 0x68a   :  { %v5244_v24 = vpop.eup %4478  ;;  %v1924_v25 = vmul.f32 1.442695, %v1903_v60  ;;  %v2550_v60 = vld [vmem:[%s5733_s6 + $0x8] sm:$0xff] }
 0x68b   :  { %v5246_v46 = vpop.eup %4480  ;;  %v1873_v47 = vpop.xlane.xlu1 %1872  ;;  %v1949_v31 = vsel %vm709_vm2, %v5244_v24, 0.0 }
 0x68c   :  { %4490 = vpow2.f32 %v1924_v25  ;;  %v1905_v30 = vsub.f32 %v5178_v11, %v1873_v47  ;;  %1950 = vadd.xlane.f32.xlu1 %v1949_v31  ;;  %v1946_v56 = vsel %vm709_vm2, %v5246_v46, 0.0  ;;  %v5323_v25 = vpack.c.bf16 %v2550_v60, %v2549_v26  ;;  %v4366_v47 = vld [vmem:[%s5734_s5] sm:$0xff]   ;;  %v4367_v26 = vld [vmem:[%s5734_s5 + $0x8] sm:$0xff]  }
 0x68d   :  { %1947 = vadd.xlane.f32.xlu0 %v1946_v56  ;;  %4036 = vmatprep.subr.bf16.mxu0 %v4366_v47  ;;  %v2558_v60 = vld [vmem:[%s5733_s6 + $0x48] sm:$0xff] }
 0x68e   :  { %v1928_v40 = vmul.f32 1.442695, %v1905_v30  ;;  %v5253_v36 = vpop.eup %4482  ;;  %4281 = vmatprep.subr.bf16.mxu1 %v5323_v25 }
 0x68f   :  { %v1952_v43 = vsel %vm709_vm2, %v5253_v36, 0.0  ;;  %v5257_v44 = vpop.eup %4484 }
 0x690   :  { %4492 = vpow2.f32 %v1928_v40  ;;  %v1958_v11 = vsel %vm709_vm2, %v5257_v44, 0.0 }
 0x691   :  { %1953 = vadd.xlane.f32.xlu0 %v1952_v43 }
 0x692   :  { %v5259_v45 = vpop.eup %4486 }
 0x693   :  { %v1955_v33 = vsel %vm709_vm2, %v5259_v45, 0.0  ;;  %v5265_v48 = vpop.eup %4488 }
 0x694   :  { %1956 = vadd.xlane.f32.xlu1 %v1955_v33  ;;  %v1964_v42 = vsel %vm709_vm2, %v5265_v48, 0.0 }
 0x695   :  { %1959 = vadd.xlane.f32.xlu0 %v1958_v11 }
 0x696   :  { %v5267_v62 = vpop.eup %4490 }
 0x697   :  { %v1961_v23 = vsel %vm709_vm2, %v5267_v62, 0.0 }
 0x698   :  { %1962 = vadd.xlane.f32.xlu1 %v1961_v23 }
 0x699   :  { %v1876_v49 = vpop.xlane.xlu0 %1875  ;;  %1965 = vadd.xlane.f32.xlu0 %v1964_v42  ;;  %v1879_v50 = vpop.xlane.xlu1 %1878 }
 0x69a   :  { %v5273_v51 = vpop.eup %4492  ;;  %v1906_v55 = vsub.f32 %v5191_v34, %v1876_v49  ;;  %v1907_v57 = vsub.f32 %v5195_v41, %v1879_v50 }
 0x69b   :  { %v1967_v58 = vsel %vm709_vm2, %v5273_v51, 0.0 }
 0x69c   :  { %v1930_v4 = vmul.f32 1.442695, %v1906_v55  ;;  %v1932_v5 = vmul.f32 1.442695, %v1907_v57  ;;  %1968 = vadd.xlane.f32.xlu1 %v1967_v58 }
 0x69d   :  { %v1882_v59 = vpop.xlane.xlu0 %1881  ;;  %v1885_v61 = vpop.xlane.xlu1 %1884 }
 0x69e   :  { %4494 = vpow2.f32 %v1930_v4  ;;  %v1908_v3 = vsub.f32 %v5203_v53, %v1882_v59  ;;  %v1909_v52 = vsub.f32 %v5207_v54, %v1885_v61 }
 0x69f   :  { %4496 = vpow2.f32 %v1932_v5 }
 0x6a0   :  { %v1934_v20 = vmul.f32 1.442695, %v1908_v3  ;;  %v1936_v21 = vmul.f32 1.442695, %v1909_v52 }
 0x6a1   :  { %v1888_v28 = vpop.xlane.xlu0 %1887  ;;  %v1891_v34 = vpop.xlane.xlu1 %1890 }
 0x6a2   :  { %4498 = vpow2.f32 %v1934_v20  ;;  %v1910_v41 = vsub.f32 %v5215_v0, %v1888_v28  ;;  %v1911_v27 = vsub.f32 %v5219_v15, %v1891_v34  ;;  %v2551_v34 = vld [vmem:[%s5733_s6 + $0x10] sm:$0xff] }
 0x6a3   :  { %4500 = vpow2.f32 %v1936_v21 }
 0x6a4   :  { %v1938_v13 = vmul.f32 1.442695, %v1910_v41  ;;  %v1940_v29 = vmul.f32 1.442695, %v1911_v27 }
 0x6a5   :  { %v1894_v35 = vpop.xlane.xlu0 %1893  ;;  %v1897_v32 = vpop.xlane.xlu1 %1896 }
 0x6a6   :  { %4502 = vpow2.f32 %v1938_v13  ;;  %v1912_v53 = vsub.f32 %v5227_v7, %v1894_v35  ;;  %v1913_v54 = vsub.f32 %v5231_v8, %v1897_v32 }
 0x6a7   :  { %4504 = vpow2.f32 %v1940_v29 }
 0x6a8   :  { %v5285_v2 = vpop.eup %4494  ;;  %v1942_v6 = vmul.f32 1.442695, %v1912_v53  ;;  %v1944_v39 = vmul.f32 1.442695, %v1913_v54  ;;  %v2553_v54 = vld [vmem:[%s5733_s6 + $0x20] sm:$0xff] }
 0x6a9   :  { %v5287_v17 = vpop.eup %4496  ;;  %v1970_v0 = vsel %vm709_vm2, %v5285_v2, 0.0 }
 0x6aa   :  { %4506 = vpow2.f32 %v1942_v6  ;;  %1971 = vadd.xlane.f32.xlu0 %v1970_v0  ;;  %v1973_v15 = vsel %vm709_vm2, %v5287_v17, 0.0  ;;  %v2554_v6 = vld [vmem:[%s5733_s6 + $0x28] sm:$0xff] }
 0x6ab   :  { %4508 = vpow2.f32 %v1944_v39  ;;  %1974 = vadd.xlane.f32.xlu1 %v1973_v15  ;;  %v4288_v15 = vpack.c.bf16 %v2554_v6, %v2553_v54 }
 0x6ac   :  { %v5293_v7 = vpop.eup %4498 }
 0x6ad   :  { %v5295_v8 = vpop.eup %4500  ;;  %v1976_v12 = vsel %vm709_vm2, %v5293_v7, 0.0 }
 0x6ae   :  { %1977 = vadd.xlane.f32.xlu0 %v1976_v12  ;;  %v1979_v37 = vsel %vm709_vm2, %v5295_v8, 0.0 }
 0x6af   :  { %1980 = vadd.xlane.f32.xlu1 %v1979_v37 }
 0x6b0   :  { %v5301_v14 = vpop.eup %4502 }
 0x6b1   :  { %v5303_v38 = vpop.eup %4504  ;;  %v1982_v10 = vsel %vm709_vm2, %v5301_v14, 0.0 }
 0x6b2   :  { %1983 = vadd.xlane.f32.xlu0 %v1982_v10  ;;  %v1985_v19 = vsel %vm709_vm2, %v5303_v38, 0.0 }
 0x6b3   :  { %1986 = vadd.xlane.f32.xlu1 %v1985_v19 }
 0x6b4   :  { %v5309_v18 = vpop.eup %4506 }
 0x6b5   :  { %v5311_v63 = vpop.eup %4508  ;;  %v1988_v1 = vsel %vm709_vm2, %v5309_v18, 0.0 }
 0x6b6   :  { %1989 = vadd.xlane.f32.xlu0 %v1988_v1  ;;  %v1991_v22 = vsel %vm709_vm2, %v5311_v63, 0.0 }
 0x6b7   :  { %1992 = vadd.xlane.f32.xlu1 %v1991_v22 }
 0x719   :  { %v1951_v31 = vpop.xlane.xlu1 %1950 }
 0x71a   :  { %v1948_v30 = vpop.xlane.xlu0 %1947  ;;  %4510 = vrcp.f32 %v1951_v31  ;;  %v2559_v31 = vld [vmem:[%s5733_s6 + $0x50] sm:$0xff] }
 0x71b   :  { %4512 = vrcp.f32 %v1948_v30  ;;  %v2560_v30 = vld [vmem:[%s5733_s6 + $0x58] sm:$0xff] }
 0x71e   :  { %v1954_v56 = vpop.xlane.xlu0 %1953 }
 0x71f   :  { %4514 = vrcp.f32 %v1954_v56  ;;  %v4369_v56 = vld [vmem:[%s5734_s5 + $0x18] sm:$0xff]  }
 0x721   :  { %v1957_v43 = vpop.xlane.xlu1 %1956 }
 0x722   :  { %v1960_v40 = vpop.xlane.xlu0 %1959 }
 0x723   :  { %4516 = vrcp.f32 %v1960_v40  ;;  %v4300_v40 = vpack.c.bf16 %v2560_v30, %v2559_v31 }
 0x724   :  { %v4511_v11 = vpop.eup %4510  ;;  %4518 = vrcp.f32 %v1957_v43  ;;  %v2561_v43 = vld [vmem:[%s5733_s6 + $0x60] sm:$0xff] }
 0x725   :  { %v4513_v33 = vpop.eup %4512  ;;  %v1997_v23 = vmul.f32 %v4511_v11, %v5244_v24  ;;  %v1963_v49 = vpop.xlane.xlu1 %1962  ;;  %v2562_v11 = vld [vmem:[%s5733_s6 + $0x68] sm:$0xff] }
 0x726   :  { %v1966_v42 = vpop.xlane.xlu0 %1965  ;;  %v1995_v50 = vmul.f32 %v4513_v33, %v5246_v46  ;;  %v4370_v33 = vld [vmem:[%s5734_s5 + $0x20] sm:$0xff]  }
 0x727   :  { %4520 = vrcp.f32 %v1966_v42  ;;  %v2563_v42 = vld [vmem:[%s5733_s6 + $0x70] sm:$0xff] }
 0x728   :  { %4522 = vrcp.f32 %v1963_v49  ;;  %3996 = vmatprep.mubr.msk.f32.mxu0 %vm709_vm2, %v1995_v50  ;;  %v2564_v49 = vld [vmem:[%s5733_s6 + $0x78] sm:$0xff]  ;;  %v4371_v50 = vld [vmem:[%s5734_s5 + $0x28] sm:$0xff]  }
 0x729   :  { %v4515_v55 = vpop.eup %4514  ;;  %3997 = vmatmul.mubr.msk.f32.vlgmr.msra.gmra.mrb[40].mxu0 %vm709_vm2, %v1997_v23  ;;  %v1969_v57 = vpop.xlane.xlu1 %1968  ;;  %v4304_v23 = vpack.c.bf16 %v2562_v11, %v2561_v43 }
 0x72a   :  { %v1999_v58 = vmul.f32 %v4515_v55, %v5253_v36  ;;  %4037 = vmatpush3.bf16.msra.mxu0 %v4366_v47  ;;  %4524 = vrcp.f32 %v1969_v57  ;;  %v4308_v55 = vpack.c.bf16 %v2564_v49, %v2563_v42  ;;  %v4372_v57 = vld [vmem:[%s5734_s5 + $0x30] sm:$0xff]  }
 0x72b   :  { %4038 = vmatprep.subr.bf16.mxu0 %v4367_v26 }
 0x72c   :  { %3999 = vmatprep.mubr.msk.f32.mxu0 %vm709_vm2, %v1999_v58  ;;  %v4373_v58 = vld [vmem:[%s5734_s5 + $0x38] sm:$0xff]  }
 0x72d   :  { %v4517_v4 = vpop.eup %4516 }
 0x72e   :  { %v4519_v24 = vpop.eup %4518  ;;  %v2003_v5 = vmul.f32 %v4517_v4, %v5257_v44  ;;  %4039 = vmatpush3.bf16.msra.mxu0 %v4367_v26 }
 0x72f   :  { %v2001_v46 = vmul.f32 %v4519_v24, %v5259_v45 }
 0x731   :  { %v4521_v59 = vpop.eup %4520  ;;  %4000 = vmatmul.mubr.msk.f32.gmra.mrb[42].mxu0 %vm709_vm2, %v2001_v46 }
 0x732   :  { %v4523_v61 = vpop.eup %4522  ;;  %4002 = vmatprep.mubr.msk.f32.mxu0 %vm709_vm2, %v2003_v5  ;;  %v2007_v3 = vmul.f32 %v4521_v59, %v5265_v48 }
 0x733   :  { %v2005_v36 = vmul.f32 %v4523_v61, %v5267_v62 }
 0x734   :  { %v4525_v52 = vpop.eup %4524 }
 0x735   :  { %4003 = vmatmul.mubr.msk.f32.gmra.mrb[44].mxu0 %vm709_vm2, %v2005_v36  ;;  %v2009_v20 = vmul.f32 %v4525_v52, %v5273_v51  ;;  %v2552_v51 = vld [vmem:[%s5733_s6 + $0x18] sm:$0xff] }
 0x736   :  { %4005 = vmatprep.mubr.msk.f32.mxu0 %vm709_vm2, %v2007_v3  ;;  %v4284_v53 = vpack.c.bf16 %v2552_v51, %v2551_v34 }
 0x737   :  { %v1972_v44 = vpop.xlane.xlu0 %1971 }
 0x738   :  { %4526 = vrcp.f32 %v1972_v44  ;;  %v1975_v45 = vpop.xlane.xlu1 %1974 }
 0x739   :  { %4528 = vrcp.f32 %v1975_v45  ;;  %4006 = vmatmul.mubr.msk.f32.gmra.mrb[46].mxu0 %vm709_vm2, %v2009_v20 }
 0x73b   :  { %v1978_v21 = vpop.xlane.xlu0 %1977 }
 0x73c   :  { %4530 = vrcp.f32 %v1978_v21  ;;  %v1981_v28 = vpop.xlane.xlu1 %1980 }
 0x73d   :  { %4532 = vrcp.f32 %v1981_v28 }
 0x73f   :  { %v1984_v48 = vpop.xlane.xlu0 %1983 }
 0x740   :  { %4534 = vrcp.f32 %v1984_v48  ;;  %v1987_v62 = vpop.xlane.xlu1 %1986 }
 0x741   :  { %4536 = vrcp.f32 %v1987_v62 }
 0x742   :  { %v4527_v41 = vpop.eup %4526 }
 0x743   :  { %v4529_v27 = vpop.eup %4528  ;;  %v1990_v13 = vpop.xlane.xlu0 %1989  ;;  %v2011_v29 = vmul.f32 %v4527_v41, %v5285_v2 }
 0x744   :  { %v2013_v35 = vmul.f32 %v4529_v27, %v5287_v17  ;;  %4538 = vrcp.f32 %v1990_v13  ;;  %v1993_v32 = vpop.xlane.xlu1 %1992 }
 0x745   :  { %4540 = vrcp.f32 %v1993_v32  ;;  %4024 = vmatprep.mubr.msk.f32.mxu1 %vm709_vm2, %v2011_v29 }
 0x746   :  { %v4531_v39 = vpop.eup %4530  ;;  %4025 = vmatmul.mubr.msk.f32.vlgmr.msra.gmra.mrb[40].mxu1 %vm709_vm2, %v2013_v35 }
 0x747   :  { %v4533_v2 = vpop.eup %4532  ;;  %v2015_v17 = vmul.f32 %v4531_v39, %v5293_v7  ;;  %4283 = vmatpush3.bf16.msra.mxu1 %v5323_v25  ;;  %v4368_v25 = vld [vmem:[%s5734_s5 + $0x10] sm:$0xff]  }
 0x748   :  { %v2017_v0 = vmul.f32 %v4533_v2, %v5295_v8  ;;  %4285 = vmatprep.subr.bf16.mxu1 %v4284_v53  ;;  %4040 = vmatprep.subr.bf16.mxu0 %v4368_v25 }
 0x749   :  { %4027 = vmatprep.mubr.msk.f32.mxu1 %vm709_vm2, %v2015_v17  ;;  %4041 = vmatpush3.bf16.msra.mxu0 %v4368_v25 }
 0x74a   :  { %v4535_v12 = vpop.eup %4534  ;;  %4028 = vmatmul.mubr.msk.f32.gmra.mrb[42].mxu1 %vm709_vm2, %v2017_v0  ;;  %4042 = vmatprep.subr.bf16.mxu0 %v4369_v56 }
 0x74b   :  { %v4537_v37 = vpop.eup %4536  ;;  %v2019_v10 = vmul.f32 %v4535_v12, %v5301_v14  ;;  %4287 = vmatpush3.bf16.msra.mxu1 %v4284_v53  ;;  %v2555_v14 = vld [vmem:[%s5733_s6 + $0x30] sm:$0xff] }
 0x74c   :  { %v2021_v19 = vmul.f32 %v4537_v37, %v5303_v38  ;;  %4289 = vmatprep.subr.bf16.mxu1 %v4288_v15  ;;  %v2556_v38 = vld [vmem:[%s5733_s6 + $0x38] sm:$0xff] }
 0x74d   :  { %4030 = vmatprep.mubr.msk.f32.mxu1 %vm709_vm2, %v2019_v10  ;;  %4043 = vmatpush3.bf16.msra.mxu0 %v4369_v56 }
 0x74e   :  { %v4539_v7 = vpop.eup %4538  ;;  %4031 = vmatmul.mubr.msk.f32.gmra.mrb[44].mxu1 %vm709_vm2, %v2021_v19  ;;  %4044 = vmatprep.subr.bf16.mxu0 %v4370_v33 }
 0x74f   :  { %v4541_v8 = vpop.eup %4540  ;;  %v2023_v1 = vmul.f32 %v4539_v7, %v5309_v18  ;;  %4291 = vmatpush3.bf16.msra.mxu1 %v4288_v15  ;;  %v4292_v18 = vpack.c.bf16 %v2556_v38, %v2555_v14 }
 0x750   :  { %v2025_v22 = vmul.f32 %v4541_v8, %v5311_v63  ;;  %v2557_v63 = vld [vmem:[%s5733_s6 + $0x40] sm:$0xff] }
 0x751   :  { %4033 = vmatprep.mubr.msk.f32.mxu1 %vm709_vm2, %v2023_v1  ;;  %4293 = vmatprep.subr.bf16.mxu1 %v4292_v18  ;;  %v4296_v47 = vpack.c.bf16 %v2558_v60, %v2557_v63 }
 0x752   :  { %4034 = vmatmul.mubr.msk.f32.gmra.mrb[46].mxu1 %vm709_vm2, %v2025_v22  ;;  %4045 = vmatpush3.bf16.msra.mxu0 %v4370_v33 }
 0x753   :  { %4295 = vmatpush3.bf16.msra.mxu1 %v4292_v18  ;;  %4046 = vmatprep.subr.bf16.mxu0 %v4371_v50 }
 0x754   :  { %4297 = vmatprep.subr.bf16.mxu1 %v4296_v47 }
 0x756   :  { %4047 = vmatpush3.bf16.msra.mxu0 %v4371_v50 }
 0x757   :  { %4299 = vmatpush3.bf16.msra.mxu1 %v4296_v47  ;;  %4048 = vmatprep.subr.bf16.mxu0 %v4372_v57 }
 0x758   :  { %4301 = vmatprep.subr.bf16.mxu1 %v4300_v40 }
 0x75a   :  { %4049 = vmatpush3.bf16.msra.mxu0 %v4372_v57 }
 0x75b   :  { %4303 = vmatpush3.bf16.msra.mxu1 %v4300_v40  ;;  %4050 = vmatprep.subr.bf16.mxu0 %v4373_v58 }
 0x75c   :  { %4305 = vmatprep.subr.bf16.mxu1 %v4304_v23 }
 0x75e   :  { %4051 = vmatpush3.bf16.msra.mxu0 %v4373_v58 }
 0x75f   :  { %4307 = vmatpush3.bf16.msra.mxu1 %v4304_v23 }
 0x760   :  { %4309 = vmatprep.subr.bf16.mxu1 %v4308_v55 }
 0x763   :  { %4311 = vmatpush3.bf16.msra.mxu1 %v4308_v55 }
 0x7fc   :  { %v3998_v4 = vpop.f32.mrb[40].mxu0 }
 0x7fd   :  { %v2301_v24 = vmin.f32 %v3998_v4, 0.0  ;;  %v2116_v5 = vpop.f32.mrb[41].mxu0  ;;  %vm2285_vm9 = vcmp.gt.f32.partialorder %v3998_v4, 0.0 }
 0x7fe   :  { %v2300_v46 = vmin.f32 %v2116_v5, 0.0  ;;  %vm2284_vm10 = vcmp.gt.f32.partialorder %v2116_v5, 0.0 }
 0x7ff   :  { %v2318_v59 = vmul.f32 1.442695, %v2301_v24 }
 0x800   :  { %v2316_v61 = vmul.f32 1.442695, %v2300_v46 }
 0x801   :  { %4542 = vpow2.f32 %v2318_v59 }
 0x802   :  { %4544 = vpow2.f32 %v2316_v61 }
 0x804   :  { %v4001_v3 = vpop.f32.mrb[42].mxu0 }
 0x805   :  { %v2303_v36 = vmin.f32 %v4001_v3, 0.0  ;;  %v2126_v52 = vpop.f32.mrb[43].mxu0  ;;  %vm2287_vm11 = vcmp.gt.f32.partialorder %v4001_v3, 0.0 }
 0x806   :  { %v2302_v20 = vmin.f32 %v2126_v52, 0.0  ;;  %vm2286_vm12 = vcmp.gt.f32.partialorder %v2126_v52, 0.0 }
 0x807   :  { %v2322_v44 = vmul.f32 1.442695, %v2303_v36 }
 0x808   :  { %v2320_v45 = vmul.f32 1.442695, %v2302_v20  ;;  %v4004_v21 = vpop.f32.mrb[44].mxu0 }
 0x809   :  { %4546 = vpow2.f32 %v2322_v44  ;;  %v2305_v28 = vmin.f32 %v4004_v21, 0.0  ;;  %v2136_v48 = vpop.f32.mrb[45].mxu0  ;;  %vm2289_vm13 = vcmp.gt.f32.partialorder %v4004_v21, 0.0 }
 0x80a   :  { %4548 = vpow2.f32 %v2320_v45  ;;  %v2304_v62 = vmin.f32 %v2136_v48, 0.0  ;;  %vm2288_vm14 = vcmp.gt.f32.partialorder %v2136_v48, 0.0 }
 0x80b   :  { %v4543_v34 = vpop.eup %4542  ;;  %v2326_v51 = vmul.f32 1.442695, %v2305_v28 }
 0x80c   :  { %v4545_v41 = vpop.eup %4544  ;;  %v3532_v27 = vadd.f32 -1.0, %v4543_v34  ;;  %v2324_v13 = vmul.f32 1.442695, %v2304_v62  ;;  %v4007_v29 = vpop.f32.mrb[46].mxu0 }
 0x80d   :  { %4550 = vpow2.f32 %v2326_v51  ;;  %v2307_v35 = vmin.f32 %v4007_v29, 0.0  ;;  %v2146_v32 = vpop.f32.mrb[47].mxu0  ;;  %v3531_v53 = vadd.f32 -1.0, %v4545_v41  ;;  %vm2291_vm15 = vcmp.gt.f32.partialorder %v4007_v29, 0.0 }
 0x80e   :  { %v2365_v54 = vsel %vm2285_vm9, %v3998_v4, %v3532_v27  ;;  %4552 = vpow2.f32 %v2324_v13  ;;  %v2306_v6 = vmin.f32 %v2146_v32, 0.0  ;;  %vm2290_vm0 = vcmp.gt.f32.partialorder %v2146_v32, 0.0 }
 0x80f   :  { %v2330_v39 = vmul.f32 1.442695, %v2307_v35  ;;  %v2364_v2 = vsel %vm2284_vm10, %v2116_v5, %v3531_v53 }
 0x810   :  { %v2328_v17 = vmul.f32 1.442695, %v2306_v6  ;;  %v2380_v0 = vpack.c.bf16 %v2365_v54, %v2364_v2  ;;  %4100 = vmatprep.mubr.f32.mxu1 %v2364_v2 }
 0x811   :  { %4554 = vpow2.f32 %v2330_v39  ;;  %4101 = vmatmul.mubr.f32.vlgmr.msra.gmra.mrb[48].mxu1 %v2365_v54 }
 0x812   :  { %4556 = vpow2.f32 %v2328_v17  ;;  %4052 = vmatprep.mubr.bf16.mxu0 %v2380_v0 }
 0x813   :  { %v4547_v15 = vpop.eup %4546 }
 0x814   :  { %v4549_v12 = vpop.eup %4548  ;;  %v3534_v37 = vadd.f32 -1.0, %v4547_v15 }
 0x815   :  { %v3533_v10 = vadd.f32 -1.0, %v4549_v12 }
 0x816   :  { %v2367_v19 = vsel %vm2287_vm11, %v4001_v3, %v3534_v37 }
 0x817   :  { %v4551_v7 = vpop.eup %4550  ;;  %v2366_v8 = vsel %vm2286_vm12, %v2126_v52, %v3533_v10 }
 0x818   :  { %v4553_v1 = vpop.eup %4552  ;;  %4103 = vmatprep.mubr.f32.mxu1 %v2366_v8  ;;  %v2381_v22 = vpack.c.bf16 %v2367_v19, %v2366_v8  ;;  %v3536_v14 = vadd.f32 -1.0, %v4551_v7 }
 0x819   :  { %4104 = vmatmul.mubr.f32.gmra.mrb[50].mxu1 %v2367_v19  ;;  %v4026_v38 = vpop.f32.mrb[40].mxu1  ;;  %v3535_v26 = vadd.f32 -1.0, %v4553_v1 }
 0x81a   :  { %v2309_v18 = vmin.f32 %v4026_v38, 0.0  ;;  %4053 = vmatmul.mubr.bf16.vlgmr.msra.gmra.mrb[48].mxu0 %v2381_v22  ;;  %v2245_v63 = vpop.f32.mrb[41].mxu1  ;;  %v2369_v60 = vsel %vm2289_vm13, %v4004_v21, %v3536_v14  ;;  %vm2293_vm3 = vcmp.gt.f32.partialorder %v4026_v38, 0.0 }
 0x81b   :  { %v4555_v25 = vpop.eup %4554  ;;  %v2308_v47 = vmin.f32 %v2245_v63, 0.0  ;;  %v2368_v31 = vsel %vm2288_vm14, %v2136_v48, %v3535_v26  ;;  %vm2292_vm4 = vcmp.gt.f32.partialorder %v2245_v63, 0.0 }
 0x81c   :  { %v4557_v30 = vpop.eup %4556  ;;  %v2334_v56 = vmul.f32 1.442695, %v2309_v18  ;;  %4106 = vmatprep.mubr.f32.mxu1 %v2368_v31  ;;  %v2382_v40 = vpack.c.bf16 %v2369_v60, %v2368_v31  ;;  %v3538_v43 = vadd.f32 -1.0, %v4555_v25 }
 0x81d   :  { %v2332_v11 = vmul.f32 1.442695, %v2308_v47  ;;  %4107 = vmatmul.mubr.f32.gmra.mrb[52].mxu1 %v2369_v60  ;;  %v4029_v33 = vpop.f32.mrb[42].mxu1  ;;  %v3537_v23 = vadd.f32 -1.0, %v4557_v30 }
 0x81e   :  { %4558 = vpow2.f32 %v2334_v56  ;;  %v2311_v42 = vmin.f32 %v4029_v33, 0.0  ;;  %4056 = vmatprep.mubr.bf16.mxu0 %v2382_v40  ;;  %v2255_v49 = vpop.f32.mrb[43].mxu1  ;;  %v2371_v50 = vsel %vm2291_vm15, %v4007_v29, %v3538_v43  ;;  %vm2295_vm5 = vcmp.gt.f32.partialorder %v4029_v33, 0.0 }
 0x81f   :  { %4560 = vpow2.f32 %v2332_v11  ;;  %v2310_v55 = vmin.f32 %v2255_v49, 0.0  ;;  %v2370_v57 = vsel %vm2290_vm0, %v2146_v32, %v3537_v23  ;;  %vm2294_vm6 = vcmp.gt.f32.partialorder %v2255_v49, 0.0 }
 0x820   :  { %v2338_v58 = vmul.f32 1.442695, %v2311_v42  ;;  %4109 = vmatprep.mubr.f32.mxu1 %v2370_v57  ;;  %v2383_v4 = vpack.c.bf16 %v2371_v50, %v2370_v57 }
 0x821   :  { %v2336_v24 = vmul.f32 1.442695, %v2310_v55  ;;  %4110 = vmatmul.mubr.f32.gmra.mrb[54].mxu1 %v2371_v50  ;;  %v4032_v5 = vpop.f32.mrb[44].mxu1 }
 0x822   :  { %4562 = vpow2.f32 %v2338_v58  ;;  %v2313_v46 = vmin.f32 %v4032_v5, 0.0  ;;  %4057 = vmatmul.mubr.bf16.gmra.mrb[52].mxu0 %v2383_v4  ;;  %v2265_v59 = vpop.f32.mrb[45].mxu1  ;;  %vm2297_vm7 = vcmp.gt.f32.partialorder %v4032_v5, 0.0 }
 0x823   :  { %4564 = vpow2.f32 %v2336_v24  ;;  %v2312_v61 = vmin.f32 %v2265_v59, 0.0  ;;  %vm2296_vm8 = vcmp.gt.f32.partialorder %v2265_v59, 0.0 }
 0x824   :  { %v2342_v3 = vmul.f32 1.442695, %v2313_v46 }
 0x825   :  { %v2340_v36 = vmul.f32 1.442695, %v2312_v61  ;;  %v4035_v52 = vpop.f32.mrb[46].mxu1 }
 0x826   :  { %4566 = vpow2.f32 %v2342_v3  ;;  %v2315_v20 = vmin.f32 %v4035_v52, 0.0  ;;  %v2275_v44 = vpop.f32.mrb[47].mxu1  ;;  %vm2299_vm9 = vcmp.gt.f32.partialorder %v4035_v52, 0.0 }
 0x827   :  { %4568 = vpow2.f32 %v2340_v36  ;;  %v2314_v45 = vmin.f32 %v2275_v44, 0.0  ;;  %vm2298_vm10 = vcmp.gt.f32.partialorder %v2275_v44, 0.0 }
 0x828   :  { %v4559_v21 = vpop.eup %4558  ;;  %v2346_v28 = vmul.f32 1.442695, %v2315_v20 }
 0x829   :  { %v4561_v48 = vpop.eup %4560  ;;  %v2344_v62 = vmul.f32 1.442695, %v2314_v45  ;;  %v3540_v34 = vadd.f32 -1.0, %v4559_v21 }
 0x82a   :  { %4570 = vpow2.f32 %v2346_v28  ;;  %v3539_v51 = vadd.f32 -1.0, %v4561_v48 }
 0x82b   :  { %4572 = vpow2.f32 %v2344_v62  ;;  %v2373_v41 = vsel %vm2293_vm3, %v4026_v38, %v3540_v34 }
 0x82c   :  { %v4563_v27 = vpop.eup %4562  ;;  %v2372_v13 = vsel %vm2292_vm4, %v2245_v63, %v3539_v51 }
 0x82d   :  { %v4565_v29 = vpop.eup %4564  ;;  %4112 = vmatprep.mubr.f32.mxu1 %v2372_v13  ;;  %v2384_v35 = vpack.c.bf16 %v2373_v41, %v2372_v13  ;;  %v3542_v32 = vadd.f32 -1.0, %v4563_v27 }
 0x82e   :  { %4113 = vmatmul.mubr.f32.gmra.mrb[56].mxu1 %v2373_v41  ;;  %v3541_v53 = vadd.f32 -1.0, %v4565_v29 }
 0x82f   :  { %4060 = vmatprep.mubr.bf16.mxu0 %v2384_v35  ;;  %v2375_v54 = vsel %vm2295_vm5, %v4029_v33, %v3542_v32 }
 0x830   :  { %v4567_v6 = vpop.eup %4566  ;;  %v2374_v39 = vsel %vm2294_vm6, %v2255_v49, %v3541_v53 }
 0x831   :  { %v4569_v2 = vpop.eup %4568  ;;  %4115 = vmatprep.mubr.f32.mxu1 %v2374_v39  ;;  %v2385_v17 = vpack.c.bf16 %v2375_v54, %v2374_v39  ;;  %v3544_v0 = vadd.f32 -1.0, %v4567_v6 }
 0x832   :  { %4116 = vmatmul.mubr.f32.gmra.mrb[58].mxu1 %v2375_v54  ;;  %v3543_v15 = vadd.f32 -1.0, %v4569_v2 }
 0x833   :  { %4061 = vmatmul.mubr.bf16.gmra.mrb[56].mxu0 %v2385_v17  ;;  %v2377_v12 = vsel %vm2297_vm7, %v4032_v5, %v3544_v0 }
 0x834   :  { %v4571_v37 = vpop.eup %4570  ;;  %v2376_v10 = vsel %vm2296_vm8, %v2265_v59, %v3543_v15 }
 0x835   :  { %v4573_v19 = vpop.eup %4572  ;;  %4118 = vmatprep.mubr.f32.mxu1 %v2376_v10  ;;  %v2386_v7 = vpack.c.bf16 %v2377_v12, %v2376_v10  ;;  %v3546_v8 = vadd.f32 -1.0, %v4571_v37 }
 0x836   :  { %4119 = vmatmul.mubr.f32.gmra.mrb[60].mxu1 %v2377_v12  ;;  %v3545_v1 = vadd.f32 -1.0, %v4573_v19 }
 0x837   :  { %4064 = vmatprep.mubr.bf16.mxu0 %v2386_v7  ;;  %v2379_v22 = vsel %vm2299_vm9, %v4035_v52, %v3546_v8 }
 0x838   :  { %v2378_v14 = vsel %vm2298_vm10, %v2275_v44, %v3545_v1 }
 0x839   :  { %4121 = vmatprep.mubr.f32.mxu1 %v2378_v14  ;;  %v2387_v38 = vpack.c.bf16 %v2379_v22, %v2378_v14 }
 0x83a   :  { %4122 = vmatmul.mubr.f32.gmra.mrb[62].mxu1 %v2379_v22 }
 0x83b   :  { %4065 = vmatmul.mubr.bf16.gmra.mrb[60].mxu0 %v2387_v38 }
 0x8e4   :  { %v4102_v26 = vpop.f32.mrb[48].mxu1 }
 0x8e5   :  { %2728 = vrot.lane.b32.xlu1 %v4102_v26, %s4639_s0  ;;  %v2631_v18 = vpop.f32.mrb[49].mxu1 }
 0x8e6   :  { %2726 = vrot.lane.b32.xlu0 %v2631_v18, %s4639_s0 }
 0x8e9   :  { %2843 = vperm.xlu1 %4347, %v4102_v26  }
 0x8ec   :  { %v4105_v63 = vpop.f32.mrb[50].mxu1 }
 0x8ed   :  { %v4054_v60 = vpop.f32.mrb[48].mxu0  ;;  %v2641_v25 = vpop.f32.mrb[51].mxu1  ;;  %2839 = vperm.xlu1 %4347, %v2631_v18  }
 0x8ee   :  { %v2486_v47 = vpop.f32.mrb[49].mxu0 }
 0x8ef   :  { %v4055_v31 = vpop.f32.mrb[50].mxu0 }
 0x8f0   :  { %v4316_v30 = vpack.c.bf16 %v4055_v31, %v4054_v60  ;;  %v2489_v56 = vpop.f32.mrb[51].mxu0  ;;  %v4108_v40 = vpop.f32.mrb[52].mxu1 }
 0x8f1   :  { %v4312_v43 = vpack.c.bf16 %v2489_v56, %v2486_v47  ;;  %v2651_v11 = vpop.f32.mrb[53].mxu1  ;;  %2732 = vrot.lane.b32.xlu1 %v4105_v63, %s4639_s0 }
 0x8f3   :  { %4313 = vmatprep.subr.bf16.mxu0 %v4312_v43 }
 0x8f4   :  { %v4111_v33 = vpop.f32.mrb[54].mxu1  ;;  %4315 = vmatpush3.bf16.msra.mxu0 %v4312_v43 }
 0x8f5   :  { %v4058_v23 = vpop.f32.mrb[52].mxu0  ;;  %v2661_v42 = vpop.f32.mrb[55].mxu1  ;;  %4317 = vmatprep.subr.bf16.mxu0 %v4316_v30  ;;  %2851 = vperm.xlu1 %4347, %v4105_v63  }
 0x8f6   :  { %v2502_v49 = vpop.f32.mrb[53].mxu0 }
 0x8f7   :  { %v4059_v50 = vpop.f32.mrb[54].mxu0 }
 0x8f8   :  { %v4324_v55 = vpack.c.bf16 %v4059_v50, %v4058_v23  ;;  %v2505_v57 = vpop.f32.mrb[55].mxu0  ;;  %4319 = vmatpush3.bf16.msra.mxu0 %v4316_v30 }
 0x8f9   :  { %v4320_v58 = vpack.c.bf16 %v2505_v57, %v2502_v49  ;;  %2730 = vrot.lane.b32.xlu1 %v2641_v25, %s4639_s0 }
 0x8fb   :  { %4321 = vmatprep.subr.bf16.mxu0 %v4320_v58 }
 0x8fc   :  { %4323 = vmatpush3.bf16.msra.mxu0 %v4320_v58 }
 0x8fd   :  { %4325 = vmatprep.subr.bf16.mxu0 %v4324_v55  ;;  %2847 = vperm.xlu1 %4347, %v2641_v25  }
 0x900   :  { %4327 = vmatpush3.bf16.msra.mxu0 %v4324_v55 }
 0x901   :  { %2736 = vrot.lane.b32.xlu1 %v4108_v40, %s4639_s0  ;;  %v4114_v4 = vpop.f32.mrb[56].mxu1 }
 0x902   :  { %2744 = vrot.lane.b32.xlu0 %v4114_v4, %s4639_s0  ;;  %v2671_v24 = vpop.f32.mrb[57].mxu1 }
 0x905   :  { %2859 = vperm.xlu1 %4347, %v4108_v40   ;;  %v4117_v5 = vpop.f32.mrb[58].mxu1 }
 0x906   :  { %2875 = vperm.xlu0 %4348, %v4114_v4   ;;  %v4062_v46 = vpop.f32.mrb[56].mxu0  ;;  %v2681_v59 = vpop.f32.mrb[59].mxu1 }
 0x907   :  { %v2518_v61 = vpop.f32.mrb[57].mxu0 }
 0x908   :  { %v4063_v3 = vpop.f32.mrb[58].mxu0 }
 0x909   :  { %v4332_v36 = vpack.c.bf16 %v4063_v3, %v4062_v46  ;;  %2734 = vrot.lane.b32.xlu1 %v2651_v11, %s4639_s0  ;;  %v2521_v52 = vpop.f32.mrb[59].mxu0  ;;  %v4120_v20 = vpop.f32.mrb[60].mxu1 }
 0x90a   :  { %v4328_v44 = vpack.c.bf16 %v2521_v52, %v2518_v61  ;;  %2871 = vperm.xlu0 %4348, %v2671_v24   ;;  %v2691_v45 = vpop.f32.mrb[61].mxu1 }
 0x90c   :  { %4329 = vmatprep.subr.bf16.mxu1 %v4328_v44 }
 0x90d   :  { %2855 = vperm.xlu1 %4347, %v2651_v11   ;;  %v4123_v21 = vpop.f32.mrb[62].mxu1  ;;  %4331 = vmatpush3.bf16.msra.mxu1 %v4328_v44 }
 0x90e   :  { %2748 = vrot.lane.b32.xlu0 %v4117_v5, %s4639_s0  ;;  %v4066_v28 = vpop.f32.mrb[60].mxu0  ;;  %v2701_v48 = vpop.f32.mrb[63].mxu1  ;;  %4333 = vmatprep.subr.bf16.mxu1 %v4332_v36 }
 0x90f   :  { %v2534_v62 = vpop.f32.mrb[61].mxu0 }
 0x910   :  { %v4067_v34 = vpop.f32.mrb[62].mxu0 }
 0x911   :  { %v4340_v51 = vpack.c.bf16 %v4067_v34, %v4066_v28  ;;  %2740 = vrot.lane.b32.xlu1 %v4111_v33, %s4639_s0  ;;  %v2537_v41 = vpop.f32.mrb[63].mxu0  ;;  %4335 = vmatpush3.bf16.msra.mxu1 %v4332_v36 }
 0x912   :  { %v4336_v27 = vpack.c.bf16 %v2537_v41, %v2534_v62  ;;  %2883 = vperm.xlu0 %4348, %v4117_v5  }
 0x914   :  { %4337 = vmatprep.subr.bf16.mxu1 %v4336_v27 }
 0x915   :  { %2867 = vperm.xlu1 %4347, %v4111_v33   ;;  %4339 = vmatpush3.bf16.msra.mxu1 %v4336_v27 }
 0x916   :  { %2746 = vrot.lane.b32.xlu0 %v2681_v59, %s4639_s0  ;;  %4341 = vmatprep.subr.bf16.mxu1 %v4340_v51 }
 0x919   :  { %2738 = vrot.lane.b32.xlu1 %v2661_v42, %s4639_s0  ;;  %4343 = vmatpush3.bf16.msra.mxu1 %v4340_v51 }
 0x91a   :  { %2879 = vperm.xlu0 %4348, %v2681_v59  }
 0x91d   :  { %2863 = vperm.xlu1 %4347, %v2661_v42  }
 0x91e   :  { %2752 = vrot.lane.b32.xlu0 %v4120_v20, %s4639_s0 }
 0x921   :  { %2742 = vrot.lane.b32.xlu1 %v2671_v24, %s4639_s0 }
 0x922   :  { %2891 = vperm.xlu0 %4348, %v4120_v20  }
 0x926   :  { %2750 = vrot.lane.b32.xlu0 %v2691_v45, %s4639_s0 }
 0x92a   :  { %2887 = vperm.xlu0 %4348, %v2691_v45  }
 0x92e   :  { %2756 = vrot.lane.b32.xlu0 %v4123_v21, %s4639_s0 }
 0x932   :  { %2899 = vperm.xlu0 %4348, %v4123_v21  }
 0x936   :  { %2754 = vrot.lane.b32.xlu0 %v2701_v48, %s4639_s0 }
 0x93a   :  { %2895 = vperm.xlu0 %4348, %v2701_v48  }
 0x957   :  { %v2729_v29 = vpop.permute.xlu1 %2728 }
 0x958   :  { %v2727_v13 = vpop.permute.xlu0 %2726 }
 0x959   :  { %2774 = vxpose.xlu1.b32.start [1/8] (short) (narrow) %v2727_v13, 8 }
 0x95d   :  { %2775 = vxpose.xlu1.b32.cont [2/8] (short) (narrow) %v2729_v29, 8 }
 0x968   :  { %v2844_v35 = vpop.permute.xlu1 %2843 }
 0x96c   :  { %v2840_v32 = vpop.permute.xlu1 %2839 }
 0x970   :  { %v2733_v53 = vpop.permute.xlu1 %2732 }
 0x974   :  { %v2852_v54 = vpop.permute.xlu1 %2851  ;;  %v2745_v17 = vpop.permute.xlu0 %2744 }
 0x978   :  { %v2731_v6 = vpop.permute.xlu1 %2730 }
 0x979   :  { %2776 = vxpose.xlu1.b32.cont [3/8] (short) (narrow) %v2731_v6, 8 }
 0x97c   :  { %v2848_v39 = vpop.permute.xlu1 %2847 }
 0x97d   :  { %2777 = vxpose.xlu1.b32.cont [4/8] (short) (narrow) %v2733_v53, 8 }
 0x980   :  { %v2737_v2 = vpop.permute.xlu1 %2736 }
 0x984   :  { %v2860_v0 = vpop.permute.xlu1 %2859 }
 0x985   :  { %v5441_v15 = vpop.permute.xlu0 %2875 }
 0x988   :  { %v2735_v12 = vpop.permute.xlu1 %2734 }
 0x989   :  { %v5443_v37 = vpop.permute.xlu0 %2871  ;;  %2778 = vxpose.xlu1.b32.cont [5/8] (short) (narrow) %v2735_v12, 8 }
 0x98c   :  { %v2856_v10 = vpop.permute.xlu1 %2855 }
 0x98d   :  { %2779 = vxpose.xlu1.b32.cont [6/8] (short) (narrow) %v2737_v2, 8  ;;  %v2749_v19 = vpop.permute.xlu0 %2748 }
 0x990   :  { %v2741_v7 = vpop.permute.xlu1 %2740 }
 0x991   :  { %v5445_v8 = vpop.permute.xlu0 %2883 }
 0x994   :  { %v2868_v1 = vpop.permute.xlu1 %2867 }
 0x995   :  { %v2747_v22 = vpop.permute.xlu0 %2746 }
 0x998   :  { %v2739_v14 = vpop.permute.xlu1 %2738 }
 0x999   :  { %2780 = vxpose.xlu1.b32.cont [7/8] (short) (narrow) %v2739_v14, 8  ;;  %v5447_v38 = vpop.permute.xlu0 %2879 }
 0x99c   :  { %v2864_v26 = vpop.permute.xlu1 %2863 }
 0x99d   :  { %2781 = vxpose.xlu1.b32.end [8/8] (short) (narrow) %v2741_v7, 8  ;;  %v2753_v18 = vpop.permute.xlu0 %2752 }
 0x9a0   :  { %v2743_v63 = vpop.permute.xlu1 %2742 }
 0x9a1   :  { %v5449_v60 = vpop.permute.xlu0 %2891  ;;  %2806 = vxpose.xlu0.b32.start [1/8] (short) (narrow) %v2743_v63, 8 }
 0x9a5   :  { %v2751_v25 = vpop.permute.xlu0 %2750  ;;  %2807 = vxpose.xlu0.b32.cont [2/8] (short) (narrow) %v2745_v17, 8 }
 0x9a9   :  { %v5451_v47 = vpop.permute.xlu0 %2887  ;;  %2808 = vxpose.xlu0.b32.cont [3/8] (short) (narrow) %v2747_v22, 8 }
 0x9ad   :  { %v2757_v31 = vpop.permute.xlu0 %2756  ;;  %2809 = vxpose.xlu0.b32.cont [4/8] (short) (narrow) %v2749_v19, 8 }
 0x9b1   :  { %2810 = vxpose.xlu0.b32.cont [5/8] (short) (narrow) %v2751_v25, 8  ;;  %v5453_v30 = vpop.permute.xlu0 %2899 }
 0x9b5   :  { %2811 = vxpose.xlu0.b32.cont [6/8] (short) (narrow) %v2753_v18, 8  ;;  %v2755_v56 = vpop.permute.xlu0 %2754 }
 0x9b9   :  { %2812 = vxpose.xlu0.b32.cont [7/8] (short) (narrow) %v2755_v56, 8 }
 0x9bd   :  { %2813 = vxpose.xlu0.b32.end [8/8] (short) (narrow) %v2757_v31, 8 }
 0xa01   :  { %v2790_v40 = vpop.trf.xlu1 }
 0xa02   :  { %v2905_v43 = vrot.slane %v2790_v40, %v4807_v16 }
 0xa04   :  { %v2910_v11 = vadd.f32 %v2905_v43, %v2840_v32  ;;  %v2911_v33 = vadd.f32 %v2905_v43, %v2844_v35  ;;  %v2912_v23 = vadd.f32 %v2905_v43, %v2848_v39  ;;  %v2913_v58 = vadd.f32 %v2905_v43, %v2852_v54  ;;  %v2896_v54 = vpop.permute.xlu0 %2895 }
 0xa05   :  { %v2914_v61 = vadd.f32 %v2905_v43, %v2856_v10  ;;  %v2915_v44 = vadd.f32 %v2905_v43, %v2860_v0  ;;  %v2916_v62 = vadd.f32 %v2905_v43, %v2864_v26  ;;  %v2917_v41 = vadd.f32 %v2905_v43, %v2868_v1 }
 0xa06   :  { %vm2926_vm11 = vcmp.gt.f32.partialorder %v2910_v11, 0.0  ;;  %v2942_v42 = vmul.f32 0.3, %v2910_v11  ;;  %vm2927_vm12 = vcmp.gt.f32.partialorder %v2911_v33, 0.0  ;;  %v2943_v49 = vmul.f32 0.3, %v2911_v33 }
 0xa07   :  { %v2944_v57 = vmul.f32 0.3, %v2912_v23  ;;  %vm2928_vm13 = vcmp.gt.f32.partialorder %v2912_v23, 0.0  ;;  %v2945_v59 = vmul.f32 0.3, %v2913_v58  ;;  %vm2929_vm14 = vcmp.gt.f32.partialorder %v2913_v58, 0.0 }
 0xa08   :  { %v2958_v50 = vsel %vm2926_vm11, %v2910_v11, %v2942_v42  ;;  %v2959_v55 = vsel %vm2927_vm12, %v2911_v33, %v2943_v49  ;;  %v2946_v20 = vmul.f32 0.3, %v2914_v61  ;;  %vm2930_vm15 = vcmp.gt.f32.partialorder %v2914_v61, 0.0 }
 0xa09   :  { %v5458_v4 = vsel %vm29_vm1, %v2958_v50, -1e+30  ;;  %v5464_v5 = vsel %vm29_vm1, %v2959_v55, -1e+30  ;;  %v2960_v46 = vsel %vm2928_vm13, %v2912_v23, %v2944_v57  ;;  %v2961_v52 = vsel %vm2929_vm14, %v2913_v58, %v2945_v59 }
 0xa0a   :  { %v2990_v24 = vsel %vm709_vm2, %v5458_v4, -inf  ;;  %v2993_v3 = vsel %vm709_vm2, %v5464_v5, -inf  ;;  %v5470_v36 = vsel %vm29_vm1, %v2960_v46, -1e+30  ;;  %v5476_v21 = vsel %vm29_vm1, %v2961_v52, -1e+30 }
 0xa0b   :  { %2991 = vmax.xlane.f32.xlu0 %v2990_v24  ;;  %v2996_v45 = vsel %vm709_vm2, %v5470_v36, -inf  ;;  %v2962_v28 = vsel %vm2930_vm15, %v2914_v61, %v2946_v20  ;;  %v2947_v48 = vmul.f32 0.3, %v2915_v44  ;;  %vm2931_vm0 = vcmp.gt.f32.partialorder %v2915_v44, 0.0 }
 0xa0c   :  { %v2999_v34 = vsel %vm709_vm2, %v5476_v21, -inf  ;;  %v5482_v51 = vsel %vm29_vm1, %v2962_v28, -1e+30  ;;  %v2948_v13 = vmul.f32 0.3, %v2916_v62  ;;  %vm2932_vm3 = vcmp.gt.f32.partialorder %v2916_v62, 0.0 }
 0xa0d   :  { %v2963_v27 = vsel %vm2931_vm0, %v2915_v44, %v2947_v48  ;;  %v3002_v29 = vsel %vm709_vm2, %v5482_v51, -inf  ;;  %v2949_v32 = vmul.f32 0.3, %v2917_v41  ;;  %vm2933_vm4 = vcmp.gt.f32.partialorder %v2917_v41, 0.0 }
 0xa0e   :  { %v5488_v35 = vsel %vm29_vm1, %v2963_v27, -1e+30  ;;  %v2964_v53 = vsel %vm2932_vm3, %v2916_v62, %v2948_v13 }
 0xa0f   :  { %2994 = vmax.xlane.f32.xlu0 %v2993_v3  ;;  %v3005_v6 = vsel %vm709_vm2, %v5488_v35, -inf  ;;  %v5494_v39 = vsel %vm29_vm1, %v2964_v53, -1e+30  ;;  %v2965_v2 = vsel %vm2933_vm4, %v2917_v41, %v2949_v32 }
 0xa10   :  { %v3008_v12 = vsel %vm709_vm2, %v5494_v39, -inf  ;;  %v5501_v10 = vsel %vm29_vm1, %v2965_v2, -1e+30 }
 0xa11   :  { %v3011_v22 = vsel %vm709_vm2, %v5501_v10, -inf }
 0xa13   :  { %2997 = vmax.xlane.f32.xlu0 %v2996_v45 }
 0xa17   :  { %3000 = vmax.xlane.f32.xlu0 %v2999_v34 }
 0xa1b   :  { %3003 = vmax.xlane.f32.xlu0 %v3002_v29 }
 0xa1f   :  { %3006 = vmax.xlane.f32.xlu0 %v3005_v6 }
 0xa21   :  { %v2822_v17 = vpop.trf.xlu0 }
 0xa22   :  { %v2909_v0 = vrot.slane %v2822_v17, %v4807_v16 }
 0xa23   :  { %3009 = vmax.xlane.f32.xlu0 %v3008_v12 }
 0xa24   :  { %v2918_v19 = vadd.f32 %v2909_v0, %v5443_v37  ;;  %v2919_v7 = vadd.f32 %v2909_v0, %v5441_v15  ;;  %v2920_v1 = vadd.f32 %v2909_v0, %v5447_v38  ;;  %v2921_v25 = vadd.f32 %v2909_v0, %v5445_v8 }
 0xa25   :  { %v2922_v40 = vadd.f32 %v2909_v0, %v5451_v47  ;;  %v2923_v23 = vadd.f32 %v2909_v0, %v5449_v60  ;;  %v2924_v55 = vadd.f32 %v2909_v0, %v2896_v54  ;;  %v2925_v46 = vadd.f32 %v2909_v0, %v5453_v30 }
 0xa26   :  { %vm2934_vm5 = vcmp.gt.f32.partialorder %v2918_v19, 0.0  ;;  %v2950_v14 = vmul.f32 0.3, %v2918_v19  ;;  %vm2935_vm6 = vcmp.gt.f32.partialorder %v2919_v7, 0.0  ;;  %v2951_v16 = vmul.f32 0.3, %v2919_v7 }
 0xa27   :  { %3012 = vmax.xlane.f32.xlu0 %v3011_v22  ;;  %v2952_v63 = vmul.f32 0.3, %v2920_v1  ;;  %vm2936_vm7 = vcmp.gt.f32.partialorder %v2920_v1, 0.0  ;;  %v2953_v56 = vmul.f32 0.3, %v2921_v25  ;;  %vm2937_vm8 = vcmp.gt.f32.partialorder %v2921_v25, 0.0 }
 0xa28   :  { %v2966_v26 = vsel %vm2934_vm5, %v2918_v19, %v2950_v14  ;;  %v2967_v18 = vsel %vm2935_vm6, %v2919_v7, %v2951_v16  ;;  %v2954_v33 = vmul.f32 0.3, %v2922_v40  ;;  %vm2938_vm9 = vcmp.gt.f32.partialorder %v2922_v40, 0.0 }
 0xa29   :  { %v5511_v37 = vsel %vm29_vm1, %v2966_v26, -1e+30  ;;  %v5517_v38 = vsel %vm29_vm1, %v2967_v18, -1e+30  ;;  %v2968_v31 = vsel %vm2936_vm7, %v2920_v1, %v2952_v63  ;;  %v2969_v11 = vsel %vm2937_vm8, %v2921_v25, %v2953_v56 }
 0xa2a   :  { %v3014_v15 = vsel %vm709_vm2, %v5511_v37, -inf  ;;  %v3017_v8 = vsel %vm709_vm2, %v5517_v38, -inf  ;;  %v5524_v43 = vsel %vm29_vm1, %v2968_v31, -1e+30  ;;  %v5531_v47 = vsel %vm29_vm1, %v2969_v11, -1e+30 }
 0xa2b   :  { %3015 = vmax.xlane.f32.xlu1 %v3014_v15  ;;  %v3020_v42 = vsel %vm709_vm2, %v5524_v43, -inf  ;;  %v2970_v49 = vsel %vm2938_vm9, %v2922_v40, %v2954_v33  ;;  %v2955_v50 = vmul.f32 0.3, %v2923_v23  ;;  %vm2939_vm10 = vcmp.gt.f32.partialorder %v2923_v23, 0.0 }
 0xa2c   :  { %v3023_v57 = vsel %vm709_vm2, %v5531_v47, -inf  ;;  %v5537_v60 = vsel %vm29_vm1, %v2970_v49, -1e+30  ;;  %v2956_v24 = vmul.f32 0.3, %v2924_v55  ;;  %vm2940_vm11 = vcmp.gt.f32.partialorder %v2924_v55, 0.0 }
 0xa2d   :  { %v2971_v58 = vsel %vm2939_vm10, %v2923_v23, %v2955_v50  ;;  %v3026_v59 = vsel %vm709_vm2, %v5537_v60, -inf  ;;  %v2957_v52 = vmul.f32 0.3, %v2925_v46  ;;  %vm2941_vm12 = vcmp.gt.f32.partialorder %v2925_v46, 0.0 }
 0xa2e   :  { %v5544_v61 = vsel %vm29_vm1, %v2971_v58, -1e+30  ;;  %v2972_v3 = vsel %vm2940_vm11, %v2924_v55, %v2956_v24 }
 0xa2f   :  { %3018 = vmax.xlane.f32.xlu1 %v3017_v8  ;;  %v3029_v20 = vsel %vm709_vm2, %v5544_v61, -inf  ;;  %v5550_v44 = vsel %vm29_vm1, %v2972_v3, -1e+30  ;;  %v2973_v30 = vsel %vm2941_vm12, %v2925_v46, %v2957_v52 }
 0xa30   :  { %v3032_v45 = vsel %vm709_vm2, %v5550_v44, -inf  ;;  %v5556_v28 = vsel %vm29_vm1, %v2973_v30, -1e+30  ;;  %vm3422_vm1 = vcmask 80896  }
 0xa31   :  { %v3035_v48 = vsel %vm709_vm2, %v5556_v28, -inf }
 0xa33   :  { %3021 = vmax.xlane.f32.xlu1 %v3020_v42 }
 0xa37   :  { %3024 = vmax.xlane.f32.xlu1 %v3023_v57 }
 0xa3b   :  { %3027 = vmax.xlane.f32.xlu1 %v3026_v59 }
 0xa3f   :  { %3030 = vmax.xlane.f32.xlu1 %v3029_v20 }
 0xa43   :  { %3033 = vmax.xlane.f32.xlu1 %v3032_v45 }
 0xa47   :  { %3036 = vmax.xlane.f32.xlu1 %v3035_v48 }
 0xa98   :  { %v2992_v62 = vpop.xlane.xlu0 %2991 }
 0xa99   :  { %v3038_v34 = vsub.f32 %v5458_v4, %v2992_v62 }
 0xa9b   :  { %v3054_v41 = vmul.f32 1.442695, %v3038_v34 }
 0xa9c   :  { %v2995_v27 = vpop.xlane.xlu0 %2994 }
 0xa9d   :  { %4574 = vpow2.f32 %v3054_v41  ;;  %v3039_v13 = vsub.f32 %v5464_v5, %v2995_v27 }
 0xa9f   :  { %v3056_v29 = vmul.f32 1.442695, %v3039_v13 }
 0xaa0   :  { %v2998_v32 = vpop.xlane.xlu0 %2997 }
 0xaa1   :  { %4576 = vpow2.f32 %v3056_v29  ;;  %v3040_v53 = vsub.f32 %v5470_v36, %v2998_v32 }
 0xaa3   :  { %v3058_v9 = vmul.f32 1.442695, %v3040_v53 }
 0xaa4   :  { %v3001_v54 = vpop.xlane.xlu0 %3000 }
 0xaa5   :  { %4578 = vpow2.f32 %v3058_v9  ;;  %v3041_v6 = vsub.f32 %v5476_v21, %v3001_v54 }
 0xaa7   :  { %v5564_v2 = vpop.eup %4574  ;;  %v3060_v17 = vmul.f32 1.442695, %v3041_v6 }
 0xaa8   :  { %v3004_v0 = vpop.xlane.xlu0 %3003  ;;  %v3086_v4 = vsel %vm709_vm2, %v5564_v2, 0.0 }
 0xaa9   :  { %4580 = vpow2.f32 %v3060_v17  ;;  %v3042_v5 = vsub.f32 %v5482_v51, %v3004_v0  ;;  %3087 = vadd.xlane.f32.xlu0 %v3086_v4 }
 0xaab   :  { %v5569_v12 = vpop.eup %4576  ;;  %v3062_v19 = vmul.f32 1.442695, %v3042_v5 }
 0xaac   :  { %v3007_v36 = vpop.xlane.xlu0 %3006  ;;  %v3089_v7 = vsel %vm709_vm2, %v5569_v12, 0.0 }
 0xaad   :  { %4582 = vpow2.f32 %v3062_v19  ;;  %v3043_v21 = vsub.f32 %v5488_v35, %v3007_v36  ;;  %3090 = vadd.xlane.f32.xlu0 %v3089_v7 }
 0xaaf   :  { %v5574_v1 = vpop.eup %4578  ;;  %v3064_v22 = vmul.f32 1.442695, %v3043_v21 }
 0xab0   :  { %v3010_v14 = vpop.xlane.xlu0 %3009  ;;  %v3092_v16 = vsel %vm709_vm2, %v5574_v1, 0.0 }
 0xab1   :  { %4584 = vpow2.f32 %v3064_v22  ;;  %v3044_v51 = vsub.f32 %v5494_v39, %v3010_v14  ;;  %3093 = vadd.xlane.f32.xlu0 %v3092_v16 }
 0xab3   :  { %v5579_v26 = vpop.eup %4580  ;;  %v3066_v18 = vmul.f32 1.442695, %v3044_v51 }
 0xab4   :  { %v3013_v63 = vpop.xlane.xlu0 %3012  ;;  %v3095_v25 = vsel %vm709_vm2, %v5579_v26, 0.0 }
 0xab5   :  { %4586 = vpow2.f32 %v3066_v18  ;;  %v3045_v35 = vsub.f32 %v5501_v10, %v3013_v63  ;;  %3096 = vadd.xlane.f32.xlu0 %v3095_v25 }
 0xab7   :  { %v5584_v15 = vpop.eup %4582  ;;  %v3068_v31 = vmul.f32 1.442695, %v3045_v35 }
 0xab8   :  { %v3016_v56 = vpop.xlane.xlu1 %3015  ;;  %v3098_v40 = vsel %vm709_vm2, %v5584_v15, 0.0 }
 0xab9   :  { %4588 = vpow2.f32 %v3068_v31  ;;  %v3046_v39 = vsub.f32 %v5511_v37, %v3016_v56  ;;  %3099 = vadd.xlane.f32.xlu0 %v3098_v40 }
 0xabb   :  { %v5589_v8 = vpop.eup %4584  ;;  %v3070_v11 = vmul.f32 1.442695, %v3046_v39 }
 0xabc   :  { %v3019_v33 = vpop.xlane.xlu1 %3018  ;;  %v3101_v23 = vsel %vm709_vm2, %v5589_v8, 0.0 }
 0xabd   :  { %4590 = vpow2.f32 %v3070_v11  ;;  %v3047_v10 = vsub.f32 %v5517_v38, %v3019_v33  ;;  %3102 = vadd.xlane.f32.xlu0 %v3101_v23 }
 0xabf   :  { %v5594_v42 = vpop.eup %4586  ;;  %v3072_v49 = vmul.f32 1.442695, %v3047_v10 }
 0xac0   :  { %v3022_v50 = vpop.xlane.xlu1 %3021  ;;  %v3104_v55 = vsel %vm709_vm2, %v5594_v42, 0.0 }
 0xac1   :  { %4592 = vpow2.f32 %v3072_v49  ;;  %v3048_v37 = vsub.f32 %v5524_v43, %v3022_v50  ;;  %3105 = vadd.xlane.f32.xlu0 %v3104_v55 }
 0xac3   :  { %v5599_v57 = vpop.eup %4588  ;;  %v3074_v58 = vmul.f32 1.442695, %v3048_v37 }
 0xac4   :  { %v3025_v24 = vpop.xlane.xlu1 %3024  ;;  %v3107_v46 = vsel %vm709_vm2, %v5599_v57, 0.0 }
 0xac5   :  { %4594 = vpow2.f32 %v3074_v58  ;;  %v3049_v38 = vsub.f32 %v5531_v47, %v3025_v24  ;;  %3108 = vadd.xlane.f32.xlu0 %v3107_v46 }
 0xac7   :  { %v5604_v59 = vpop.eup %4590  ;;  %v3076_v3 = vmul.f32 1.442695, %v3049_v38 }
 0xac8   :  { %v3028_v52 = vpop.xlane.xlu1 %3027  ;;  %v3110_v20 = vsel %vm709_vm2, %v5604_v59, 0.0 }
 0xac9   :  { %4596 = vpow2.f32 %v3076_v3  ;;  %v3050_v43 = vsub.f32 %v5537_v60, %v3028_v52  ;;  %3111 = vadd.xlane.f32.xlu1 %v3110_v20 }
 0xacb   :  { %v5609_v30 = vpop.eup %4592  ;;  %v3078_v45 = vmul.f32 1.442695, %v3050_v43 }
 0xacc   :  { %v3031_v48 = vpop.xlane.xlu1 %3030  ;;  %v3113_v62 = vsel %vm709_vm2, %v5609_v30, 0.0 }
 0xacd   :  { %4598 = vpow2.f32 %v3078_v45  ;;  %v3051_v47 = vsub.f32 %v5544_v61, %v3031_v48  ;;  %3114 = vadd.xlane.f32.xlu1 %v3113_v62 }
 0xacf   :  { %v5614_v34 = vpop.eup %4594  ;;  %v3080_v41 = vmul.f32 1.442695, %v3051_v47 }
 0xad0   :  { %v3034_v27 = vpop.xlane.xlu1 %3033  ;;  %v3116_v13 = vsel %vm709_vm2, %v5614_v34, 0.0 }
 0xad1   :  { %4600 = vpow2.f32 %v3080_v41  ;;  %v3052_v60 = vsub.f32 %v5550_v44, %v3034_v27  ;;  %3117 = vadd.xlane.f32.xlu1 %v3116_v13 }
 0xad3   :  { %v5619_v29 = vpop.eup %4596  ;;  %v3082_v32 = vmul.f32 1.442695, %v3052_v60 }
 0xad4   :  { %v3037_v53 = vpop.xlane.xlu1 %3036  ;;  %v3119_v9 = vsel %vm709_vm2, %v5619_v29, 0.0 }
 0xad5   :  { %4602 = vpow2.f32 %v3082_v32  ;;  %v3053_v61 = vsub.f32 %v5556_v28, %v3037_v53  ;;  %3120 = vadd.xlane.f32.xlu1 %v3119_v9 }
 0xad7   :  { %v5624_v54 = vpop.eup %4598  ;;  %v3084_v6 = vmul.f32 1.442695, %v3053_v61 }
 0xad8   :  { %v3122_v17 = vsel %vm709_vm2, %v5624_v54, 0.0 }
 0xad9   :  { %4604 = vpow2.f32 %v3084_v6  ;;  %3123 = vadd.xlane.f32.xlu1 %v3122_v17 }
 0xadb   :  { %v5628_v44 = vpop.eup %4600 }
 0xadc   :  { %v3125_v0 = vsel %vm709_vm2, %v5628_v44, 0.0 }
 0xadd   :  { %3126 = vadd.xlane.f32.xlu1 %v3125_v0 }
 0xadf   :  { %v5632_v4 = vpop.eup %4602 }
 0xae0   :  { %v3128_v28 = vsel %vm709_vm2, %v5632_v4, 0.0 }
 0xae1   :  { %3129 = vadd.xlane.f32.xlu1 %v3128_v28 }
 0xae3   :  { %v5636_v5 = vpop.eup %4604 }
 0xae4   :  { %v3131_v19 = vsel %vm709_vm2, %v5636_v5, 0.0 }
 0xae5   :  { %3132 = vadd.xlane.f32.xlu1 %v3131_v19 }
 0xb36   :  { %v3088_v36 = vpop.xlane.xlu0 %3087 }
 0xb37   :  { %4606 = vrcp.f32 %v3088_v36 }
 0xb3a   :  { %v3091_v7 = vpop.xlane.xlu0 %3090 }
 0xb3b   :  { %4608 = vrcp.f32 %v3091_v7 }
 0xb3e   :  { %v3094_v21 = vpop.xlane.xlu0 %3093 }
 0xb3f   :  { %4610 = vrcp.f32 %v3094_v21 }
 0xb41   :  { %v4607_v22 = vpop.eup %4606 }
 0xb42   :  { %v3097_v14 = vpop.xlane.xlu0 %3096  ;;  %v3135_v16 = vmul.f32 %v4607_v22, %v5564_v2 }
 0xb43   :  { %4612 = vrcp.f32 %v3097_v14 }
 0xb44   :  { %4140 = vmatprep.mubr.msk.f32.mxu0 %vm709_vm2, %v3135_v16 }
 0xb45   :  { %v4609_v51 = vpop.eup %4608 }
 0xb46   :  { %v3137_v18 = vmul.f32 %v4609_v51, %v5569_v12  ;;  %v3100_v63 = vpop.xlane.xlu0 %3099 }
 0xb47   :  { %4614 = vrcp.f32 %v3100_v63 }
 0xb48   :  { %4141 = vmatmul.mubr.msk.f32.vlgmr.msra.gmra.mrb[64].mxu0 %vm709_vm2, %v3137_v18 }
 0xb49   :  { %v4611_v25 = vpop.eup %4610 }
 0xb4a   :  { %v3103_v35 = vpop.xlane.xlu0 %3102  ;;  %v3139_v31 = vmul.f32 %v4611_v25, %v5574_v1 }
 0xb4b   :  { %4616 = vrcp.f32 %v3103_v35 }
 0xb4c   :  { %4143 = vmatprep.mubr.msk.f32.mxu0 %vm709_vm2, %v3139_v31 }
 0xb4d   :  { %v4613_v56 = vpop.eup %4612 }
 0xb4e   :  { %v3106_v40 = vpop.xlane.xlu0 %3105  ;;  %v3141_v2 = vmul.f32 %v4613_v56, %v5579_v26 }
 0xb4f   :  { %4618 = vrcp.f32 %v3106_v40 }
 0xb50   :  { %4144 = vmatmul.mubr.msk.f32.gmra.mrb[66].mxu0 %vm709_vm2, %v3141_v2 }
 0xb51   :  { %v4615_v39 = vpop.eup %4614 }
 0xb52   :  { %v3109_v12 = vpop.xlane.xlu0 %3108  ;;  %v3143_v11 = vmul.f32 %v4615_v39, %v5584_v15 }
 0xb53   :  { %4620 = vrcp.f32 %v3109_v12 }
 0xb54   :  { %4146 = vmatprep.mubr.msk.f32.mxu0 %vm709_vm2, %v3143_v11 }
 0xb55   :  { %v4617_v33 = vpop.eup %4616 }
 0xb56   :  { %v3112_v23 = vpop.xlane.xlu1 %3111  ;;  %v3145_v1 = vmul.f32 %v4617_v33, %v5589_v8 }
 0xb57   :  { %4622 = vrcp.f32 %v3112_v23 }
 0xb58   :  { %4147 = vmatmul.mubr.msk.f32.gmra.mrb[68].mxu0 %vm709_vm2, %v3145_v1 }
 0xb59   :  { %v4619_v10 = vpop.eup %4618 }
 0xb5a   :  { %v3115_v49 = vpop.xlane.xlu1 %3114  ;;  %v3147_v26 = vmul.f32 %v4619_v10, %v5594_v42 }
 0xb5b   :  { %4624 = vrcp.f32 %v3115_v49 }
 0xb5c   :  { %4149 = vmatprep.mubr.msk.f32.mxu0 %vm709_vm2, %v3147_v26 }
 0xb5d   :  { %v4621_v50 = vpop.eup %4620 }
 0xb5e   :  { %v3118_v55 = vpop.xlane.xlu1 %3117  ;;  %v3149_v15 = vmul.f32 %v4621_v50, %v5599_v57 }
 0xb5f   :  { %4626 = vrcp.f32 %v3118_v55 }
 0xb60   :  { %4150 = vmatmul.mubr.msk.f32.gmra.mrb[70].mxu0 %vm709_vm2, %v3149_v15 }
 0xb61   :  { %v4623_v37 = vpop.eup %4622 }
 0xb62   :  { %v3121_v58 = vpop.xlane.xlu1 %3120  ;;  %v3151_v8 = vmul.f32 %v4623_v37, %v5604_v59 }
 0xb63   :  { %4628 = vrcp.f32 %v3121_v58 }
 0xb64   :  { %4168 = vmatprep.mubr.msk.f32.mxu1 %vm709_vm2, %v3151_v8 }
 0xb65   :  { %v4625_v24 = vpop.eup %4624 }
 0xb66   :  { %v3153_v42 = vmul.f32 %v4625_v24, %v5609_v30  ;;  %v3124_v46 = vpop.xlane.xlu1 %3123 }
 0xb67   :  { %4630 = vrcp.f32 %v3124_v46 }
 0xb68   :  { %4169 = vmatmul.mubr.msk.f32.vlgmr.msra.gmra.mrb[64].mxu1 %vm709_vm2, %v3153_v42 }
 0xb69   :  { %v4627_v38 = vpop.eup %4626 }
 0xb6a   :  { %v3127_v3 = vpop.xlane.xlu1 %3126  ;;  %v3155_v57 = vmul.f32 %v4627_v38, %v5614_v34 }
 0xb6b   :  { %4632 = vrcp.f32 %v3127_v3 }
 0xb6c   :  { %4171 = vmatprep.mubr.msk.f32.mxu1 %vm709_vm2, %v3155_v57 }
 0xb6d   :  { %v4629_v52 = vpop.eup %4628 }
 0xb6e   :  { %v3130_v20 = vpop.xlane.xlu1 %3129  ;;  %v3157_v59 = vmul.f32 %v4629_v52, %v5619_v29 }
 0xb6f   :  { %4634 = vrcp.f32 %v3130_v20 }
 0xb70   :  { %4172 = vmatmul.mubr.msk.f32.gmra.mrb[66].mxu1 %vm709_vm2, %v3157_v59 }
 0xb71   :  { %v4631_v43 = vpop.eup %4630 }
 0xb72   :  { %v3133_v30 = vpop.xlane.xlu1 %3132  ;;  %v3159_v45 = vmul.f32 %v4631_v43, %v5624_v54 }
 0xb73   :  { %4636 = vrcp.f32 %v3133_v30 }
 0xb74   :  { %4174 = vmatprep.mubr.msk.f32.mxu1 %vm709_vm2, %v3159_v45 }
 0xb75   :  { %v4633_v48 = vpop.eup %4632 }
 0xb76   :  { %v3161_v62 = vmul.f32 %v4633_v48, %v5628_v44 }
 0xb78   :  { %4175 = vmatmul.mubr.msk.f32.gmra.mrb[68].mxu1 %vm709_vm2, %v3161_v62 }
 0xb79   :  { %v4635_v47 = vpop.eup %4634 }
 0xb7a   :  { %v3163_v34 = vmul.f32 %v4635_v47, %v5632_v4 }
 0xb7c   :  { %4177 = vmatprep.mubr.msk.f32.mxu1 %vm709_vm2, %v3163_v34 }
 0xb7d   :  { %v4637_v41 = vpop.eup %4636 }
 0xb7e   :  { %v3165_v27 = vmul.f32 %v4637_v41, %v5636_v5 }
 0xb80   :  { %4178 = vmatmul.mubr.msk.f32.gmra.mrb[70].mxu1 %vm709_vm2, %v3165_v27  ;;  %vm3429_vm2 = vcmask 74752  }
 0xc1b   :  { %v4142_v13 = vpop.f32.mrb[64].mxu0 }
 0xc1c   :  { %3424 = vst.msk [vmem:[%s5735_s7 + $0x8] sm:$0xff] %vm3422_vm1, %v4142_v13  ;;  %v3256_v60 = vpop.f32.mrb[65].mxu0 }
 0xc1d   :  { %3423 = vst.msk [vmem:[%s5735_s7] sm:$0xff] %vm3422_vm1, %v3256_v60 }
 0xc23   :  { %v4145_v29 = vpop.f32.mrb[66].mxu0 }
 0xc24   :  { %3426 = vst.msk [vmem:[%s5735_s7 + $0x18] sm:$0xff] %vm3422_vm1, %v4145_v29  ;;  %v3266_v32 = vpop.f32.mrb[67].mxu0 }
 0xc25   :  { %3425 = vst.msk [vmem:[%s5735_s7 + $0x10] sm:$0xff] %vm3422_vm1, %v3266_v32 }
 0xc2b   :  { %v4148_v53 = vpop.f32.mrb[68].mxu0 }
 0xc2c   :  { %3428 = vst.msk [vmem:[%s5735_s7 + $0x28] sm:$0xff] %vm3422_vm1, %v4148_v53  ;;  %v3276_v9 = vpop.f32.mrb[69].mxu0 }
 0xc2d   :  { %3427 = vst.msk [vmem:[%s5735_s7 + $0x20] sm:$0xff] %vm3422_vm1, %v3276_v9 }
 0xc33   :  { %v4151_v61 = vpop.f32.mrb[70].mxu0 }
 0xc34   :  { %v3286_v54 = vpop.f32.mrb[71].mxu0 }
 0xc35   :  { %3430 = vst.msk [vmem:[%s5735_s7 + $0x30] sm:$0x3] %vm3429_vm2, %v3286_v54 }
 0xc3b   :  { %v4170_v6 = vpop.f32.mrb[64].mxu1 }
 0xc3c   :  { %3432 = vst.msk [vmem:[%s5735_s7 + $0x40] sm:$0xff] %vm3422_vm1, %v4170_v6  ;;  %v3384_v17 = vpop.f32.mrb[65].mxu1 }
 0xc3d   :  { %3431 = vst.msk [vmem:[%s5735_s7 + $0x38] sm:$0xff] %vm3422_vm1, %v3384_v17 }
 0xc43   :  { %v4173_v44 = vpop.f32.mrb[66].mxu1 }
 0xc44   :  { %3434 = vst.msk [vmem:[%s5735_s7 + $0x50] sm:$0xff] %vm3422_vm1, %v4173_v44  ;;  %v3394_v0 = vpop.f32.mrb[67].mxu1 }
 0xc45   :  { %3433 = vst.msk [vmem:[%s5735_s7 + $0x48] sm:$0xff] %vm3422_vm1, %v3394_v0 }
 0xc4b   :  { %v4176_v4 = vpop.f32.mrb[68].mxu1 }
 0xc4c   :  { %3436 = vst.msk [vmem:[%s5735_s7 + $0x60] sm:$0xff] %vm3422_vm1, %v4176_v4  ;;  %v3404_v28 = vpop.f32.mrb[69].mxu1 }
 0xc4d   :  { %3435 = vst.msk [vmem:[%s5735_s7 + $0x58] sm:$0xff] %vm3422_vm1, %v3404_v28 }
 0xc53   :  { %v4179_v5 = vpop.f32.mrb[70].mxu1 }
 0xc54   :  { %v3414_v19 = vpop.f32.mrb[71].mxu1 }
 0xc55   :  { %3437 = vst.msk [vmem:[%s5735_s7 + $0x68] sm:$0x3] %vm3429_vm2, %v3414_v19 }

</bundles_post_ra>
